<compile_context>
chip_gen: v6e
topology: v6e:2x2x1
jax: 0.10.0
libtpu: 0.0.40
codegen_flags: <defaults>
</compile_context>

<pallas_src>
import functools

import jax
import jax.numpy as jnp
from jax.experimental import pallas as pl
from jax.experimental.pallas import tpu as pltpu

ICM_EMBED_DIM = 256
_LANE = 128
_SUBLANE = 8


def _round_up(x, m):
    return ((x + m - 1) // m) * m


def _icm_fused_kernel(
    feat_ref, nfeat_ref, onehot_ref,
    enc_w1_ref, enc_b1_ref, enc_w2_ref, enc_b2_ref,
    inv_w1a_ref, inv_w1b_ref, inv_b1_ref, inv_w2_ref, inv_b2_ref,
    fwd_w1p_ref, fwd_w1a_ref, fwd_b1_ref, fwd_w2_ref, fwd_b2_ref,
    logits_ref, pred_ref, phin_ref,
    *, dot_dtype,
):
    """Fused ICM forward for one batch tile (TB rows)."""
    tb = feat_ref.shape[0]

    def mm(a, w_ref):
        # MXU matmul with f32 accumulation; weights already in dot_dtype.
        return jnp.dot(a.astype(dot_dtype), w_ref[...],
                       preferred_element_type=jnp.float32)

    # ---- encoder, run once on the stacked [feat; next_feat] rows (2*TB) ----
    x2 = jnp.concatenate([feat_ref[...], nfeat_ref[...]], axis=0)
    h = jnp.maximum(mm(x2, enc_w1_ref) + enc_b1_ref[...], 0.0)
    phi2 = jnp.maximum(mm(h, enc_w2_ref) + enc_b2_ref[...], 0.0)
    phi = phi2[:tb]
    phi_next = phi2[tb:]

    # ---- inverse model: concat-free split matmul (K = 256 + 256) ----
    inv_h = jnp.maximum(
        mm(phi, inv_w1a_ref) + mm(phi_next, inv_w1b_ref) + inv_b1_ref[...], 0.0)
    logits = mm(inv_h, inv_w2_ref) + inv_b2_ref[...]          # (TB, 128) lane-dense

    # ---- forward model: concat-free split matmul (K = 256 + 128-padded onehot) ----
    fwd_h = jnp.maximum(
        mm(phi, fwd_w1p_ref) + mm(onehot_ref[...], fwd_w1a_ref) + fwd_b1_ref[...],
        0.0)
    pred = mm(fwd_h, fwd_w2_ref) + fwd_b2_ref[...]

    logits_ref[...] = logits.astype(logits_ref.dtype)
    pred_ref[...] = pred.astype(pred_ref.dtype)
    phin_ref[...] = phi_next.astype(phin_ref.dtype)


def icm_forward(params, feat, next_feat, action, n_actions, *,
                block_b=256, use_bf16=False):
    """Pallas implementation of ICM.forward.

    Returns (logits, pred_phi_next, phi_next), matching the PyTorch module.
    """
    B = feat.shape[0]
    feat_flat = feat.reshape(B, -1).astype(jnp.float32)       # nn.Flatten()
    next_feat_flat = next_feat.reshape(B, -1).astype(jnp.float32)
    Din = feat_flat.shape[1]
    E = params["enc_w2"].shape[1]
    H_inv = params["inv_w1"].shape[1]
    H_fwd = params["fwd_w1"].shape[1]

    dot_dtype = jnp.bfloat16 if use_bf16 else jnp.float32

    # Batch padding / row tiling: at least 8 sublane rows, TB-row tiles for
    # pipelining + v7x megacore ("parallel" batch axis) at larger batches.
    TB = _round_up(min(block_b, _round_up(B, _SUBLANE)), _SUBLANE)
    Bp = _round_up(B, TB)
    n_tiles = Bp // TB
    pad_b = Bp - B

    feat_p = jnp.pad(feat_flat, ((0, pad_b), (0, 0))).astype(dot_dtype)
    nfeat_p = jnp.pad(next_feat_flat, ((0, pad_b), (0, 0))).astype(dot_dtype)

    # Lane-dense one-hot / logits: pad the action dim up to 128 lanes.
    A_pad = _round_up(max(n_actions, _LANE), _LANE)
    onehot = jax.nn.one_hot(action, n_actions, dtype=jnp.float32)
    onehot = jnp.pad(onehot, ((0, pad_b), (0, A_pad - n_actions))).astype(dot_dtype)

    # Weights: split the concat-dim matmuls, zero-pad to aligned shapes.
    enc_w1 = params["enc_w1"].astype(dot_dtype)
    enc_b1 = params["enc_b1"]
    enc_w2 = params["enc_w2"].astype(dot_dtype)
    enc_b2 = params["enc_b2"]
    inv_w1a = params["inv_w1"][:E].astype(dot_dtype)           # (E, 512)
    inv_w1b = params["inv_w1"][E:].astype(dot_dtype)           # (E, 512)
    inv_b1 = params["inv_b1"]
    inv_w2 = jnp.pad(params["inv_w2"],
                     ((0, 0), (0, A_pad - n_actions))).astype(dot_dtype)   # (512, 128)
    inv_b2 = jnp.pad(params["inv_b2"], ((0, 0), (0, A_pad - n_actions)))   # (1, 128)
    fwd_w1p = params["fwd_w1"][:E].astype(dot_dtype)           # (E, 512)
    fwd_w1a = jnp.pad(params["fwd_w1"][E:],
                      ((0, A_pad - n_actions), (0, 0))).astype(dot_dtype)  # (128, 512)
    fwd_b1 = params["fwd_b1"]
    fwd_w2 = params["fwd_w2"].astype(dot_dtype)
    fwd_b2 = params["fwd_b2"]

    inputs = (feat_p, nfeat_p, onehot,
              enc_w1, enc_b1, enc_w2, enc_b2,
              inv_w1a, inv_w1b, inv_b1, inv_w2, inv_b2,
              fwd_w1p, fwd_w1a, fwd_b1, fwd_w2, fwd_b2)

    # Advisory cost estimate for XLA's scheduler.
    flops = 2 * Bp * (2 * Din * E + 2 * E * E
                      + 2 * E * H_inv + H_inv * A_pad
                      + E * H_fwd + A_pad * H_fwd + H_fwd * E)
    in_bytes = sum(int(a.size) * a.dtype.itemsize for a in inputs)
    out_bytes = 4 * (Bp * A_pad + 2 * Bp * E)
    cost = pl.CostEstimate(flops=int(flops), transcendentals=0,
                           bytes_accessed=int(in_bytes + out_bytes))

    # Explicit VMEM budget (weights + double-buffered row tiles + headroom).
    weight_bytes = sum(int(a.size) * a.dtype.itemsize for a in inputs[3:])
    tile_io_bytes = (feat_p.dtype.itemsize * 2 * TB * Din
                     + onehot.dtype.itemsize * TB * A_pad
                     + 4 * TB * (A_pad + 2 * E))
    vmem_limit = int(min(96 * 1024 * 1024,
                         max(32 * 1024 * 1024,
                             2 * (weight_bytes + tile_io_bytes) + 8 * 1024 * 1024)))

    row_tile = lambda i: (i, 0)
    const = lambda i: (0, 0)

    in_specs = (
        pl.BlockSpec((TB, Din), row_tile),
        pl.BlockSpec((TB, Din), row_tile),
        pl.BlockSpec((TB, A_pad), row_tile),
        pl.BlockSpec((Din, E), const),
        pl.BlockSpec((1, E), const),
        pl.BlockSpec((E, E), const),
        pl.BlockSpec((1, E), const),
        pl.BlockSpec((E, H_inv), const),
        pl.BlockSpec((E, H_inv), const),
        pl.BlockSpec((1, H_inv), const),
        pl.BlockSpec((H_inv, A_pad), const),
        pl.BlockSpec((1, A_pad), const),
        pl.BlockSpec((E, H_fwd), const),
        pl.BlockSpec((A_pad, H_fwd), const),
        pl.BlockSpec((1, H_fwd), const),
        pl.BlockSpec((H_fwd, E), const),
        pl.BlockSpec((1, E), const),
    )
    out_specs = (
        pl.BlockSpec((TB, A_pad), row_tile),
        pl.BlockSpec((TB, E), row_tile),
        pl.BlockSpec((TB, E), row_tile),
    )
    out_shape = (
        jax.ShapeDtypeStruct((Bp, A_pad), jnp.float32),
        jax.ShapeDtypeStruct((Bp, E), jnp.float32),
        jax.ShapeDtypeStruct((Bp, E), jnp.float32),
    )

    kernel = functools.partial(_icm_fused_kernel, dot_dtype=dot_dtype)
    logits_p, pred_p, phin_p = pl.pallas_call(
        kernel,
        out_shape=out_shape,
        grid=(n_tiles,),
        in_specs=in_specs,
        out_specs=out_specs,
        compiler_params=pltpu.CompilerParams(
            dimension_semantics=("parallel",),
            vmem_limit_bytes=vmem_limit,
        ),
        cost_estimate=cost,
    )(*inputs)

    # Strip batch / action-lane padding in the (free) wrapper slices.
    return (logits_p[:B, :n_actions], pred_p[:B], phin_p[:B])


def init_icm_params(key, feat_dim, n_actions, embed_dim=ICM_EMBED_DIM):
    """Deterministic synthetic parameter init (shapes match the PyTorch module)."""
    ks = jax.random.split(key, 12)

    def lin(kw, kb, din, dout):
        bound = 1.0 / jnp.sqrt(jnp.float32(din))
        w = jax.random.uniform(kw, (din, dout), jnp.float32, -bound, bound)
        b = jax.random.uniform(kb, (1, dout), jnp.float32, -bound, bound)
        return w, b

    params = {}
    # encoder: Linear(feat_dim, embed) -> ReLU -> Linear(embed, embed) -> ReLU
    params["enc_w1"], params["enc_b1"] = lin(ks[0], ks[1], feat_dim, embed_dim)
    params["enc_w2"], params["enc_b2"] = lin(ks[2], ks[3], embed_dim, embed_dim)
    # inverse model: Linear(2*embed, 512) -> ReLU -> Linear(512, n_actions)
    params["inv_w1"], params["inv_b1"] = lin(ks[4], ks[5], 2 * embed_dim, 512)
    params["inv_w2"], params["inv_b2"] = lin(ks[6], ks[7], 512, n_actions)
    # forward model: Linear(embed + n_actions, 512) -> ReLU -> Linear(512, embed)
    params["fwd_w1"], params["fwd_b1"] = lin(ks[8], ks[9], embed_dim + n_actions, 512)
    params["fwd_w2"], params["fwd_b2"] = lin(ks[10], ks[11], 512, embed_dim)
    return params


def icm_forward_ref(params, feat, next_feat, action, n_actions):
    """Pure-JAX reference (full-precision matmuls) for correctness checking."""
    B = feat.shape[0]
    f = feat.reshape(B, -1).astype(jnp.float32)
    nf = next_feat.reshape(B, -1).astype(jnp.float32)
    hp = jax.lax.Precision.HIGHEST

    def mm(a, b):
        return jnp.dot(a, b, precision=hp, preferred_element_type=jnp.float32)

    def enc(x):
        h = jnp.maximum(mm(x, params["enc_w1"]) + params["enc_b1"], 0.0)
        return jnp.maximum(mm(h, params["enc_w2"]) + params["enc_b2"], 0.0)

    phi, phi_next = enc(f), enc(nf)
    inv_in = jnp.concatenate([phi, phi_next], axis=1)
    h = jnp.maximum(mm(inv_in, params["inv_w1"]) + params["inv_b1"], 0.0)
    logits = mm(h, params["inv_w2"]) + params["inv_b2"]
    a_onehot = jax.nn.one_hot(action, n_actions, dtype=jnp.float32)
    fwd_in = jnp.concatenate([phi, a_onehot], axis=1)
    h2 = jnp.maximum(mm(fwd_in, params["fwd_w1"]) + params["fwd_b1"], 0.0)
    pred_phi_next = mm(h2, params["fwd_w2"]) + params["fwd_b2"]
    return logits, pred_phi_next, phi_next


if __name__ == "__main__":
    # Small deterministic example: feat is NCHW [2, 4, 16, 16] -> feat_dim = 1024.
    B, C, H, W = 2, 4, 16, 16
    feat_dim = C * H * W
    n_actions = 6

    key = jax.random.PRNGKey(0)
    k_params, k_feat, k_next, k_act = jax.random.split(key, 4)

    params = init_icm_params(k_params, feat_dim, n_actions)
    feat = jax.random.normal(k_feat, (B, C, H, W), jnp.float32)
    next_feat = jax.random.normal(k_next, (B, C, H, W), jnp.float32)
    action = jax.random.randint(k_act, (B,), 0, n_actions, jnp.int32)

    icm_fwd = jax.jit(functools.partial(icm_forward, n_actions=n_actions))
    logits, pred_phi_next, phi_next = jax.block_until_ready(
        icm_fwd(params, feat, next_feat, action)
    )

    # Verify against pure-JAX reference.
    logits_r, pred_r, phin_r = icm_forward_ref(params, feat, next_feat, action,
                                               n_actions)
    assert logits.shape == (B, n_actions)
    assert pred_phi_next.shape == (B, ICM_EMBED_DIM)
    assert phi_next.shape == (B, ICM_EMBED_DIM)
    assert jnp.allclose(logits, logits_r, atol=2e-4, rtol=2e-4)
    assert jnp.allclose(pred_phi_next, pred_r, atol=2e-4, rtol=2e-4)
    assert jnp.allclose(phi_next, phin_r, atol=2e-4, rtol=2e-4)

    print("KERNEL_OK")
</pallas_src>

<mosaic_0001>
module attributes {stable_mosaic.version = 11 : i64} {
  func.func @_icm_fused_kernel(%arg0: i32, %arg1: memref<8x1024xf32, #tpu.memory_space<vmem>>, %arg2: memref<8x1024xf32, #tpu.memory_space<vmem>>, %arg3: memref<8x128xf32, #tpu.memory_space<vmem>>, %arg4: memref<1024x256xf32, #tpu.memory_space<vmem>>, %arg5: memref<1x256xf32, #tpu.memory_space<vmem>>, %arg6: memref<256x256xf32, #tpu.memory_space<vmem>>, %arg7: memref<1x256xf32, #tpu.memory_space<vmem>>, %arg8: memref<256x512xf32, #tpu.memory_space<vmem>>, %arg9: memref<256x512xf32, #tpu.memory_space<vmem>>, %arg10: memref<1x512xf32, #tpu.memory_space<vmem>>, %arg11: memref<512x128xf32, #tpu.memory_space<vmem>>, %arg12: memref<1x128xf32, #tpu.memory_space<vmem>>, %arg13: memref<256x512xf32, #tpu.memory_space<vmem>>, %arg14: memref<128x512xf32, #tpu.memory_space<vmem>>, %arg15: memref<1x512xf32, #tpu.memory_space<vmem>>, %arg16: memref<512x256xf32, #tpu.memory_space<vmem>>, %arg17: memref<1x256xf32, #tpu.memory_space<vmem>>, %arg18: memref<8x128xf32, #tpu.memory_space<vmem>>, %arg19: memref<8x256xf32, #tpu.memory_space<vmem>>, %arg20: memref<8x256xf32, #tpu.memory_space<vmem>>) attributes {dimension_semantics = [#tpu.dimension_semantics<parallel>], iteration_bounds = array<i64: 1>, scalar_prefetch = 0 : i64, scratch_operands = 0 : i64, tpu.core_type = #tpu.core_type<tc>, window_params = [{transform_indices = @transform_0, window_bounds = array<i64: 8, 1024>}, {transform_indices = @transform_1, window_bounds = array<i64: 8, 1024>}, {transform_indices = @transform_2, window_bounds = array<i64: 8, 128>}, {pipeline_mode = #tpu.pipeline_mode<synchronous>, transform_indices = @transform_3, window_bounds = array<i64: 1024, 256>}, {pipeline_mode = #tpu.pipeline_mode<synchronous>, transform_indices = @transform_4, window_bounds = array<i64: 1, 256>}, {pipeline_mode = #tpu.pipeline_mode<synchronous>, transform_indices = @transform_5, window_bounds = array<i64: 256, 256>}, {pipeline_mode = #tpu.pipeline_mode<synchronous>, transform_indices = @transform_6, window_bounds = array<i64: 1, 256>}, {pipeline_mode = #tpu.pipeline_mode<synchronous>, transform_indices = @transform_7, window_bounds = array<i64: 256, 512>}, {pipeline_mode = #tpu.pipeline_mode<synchronous>, transform_indices = @transform_8, window_bounds = array<i64: 256, 512>}, {pipeline_mode = #tpu.pipeline_mode<synchronous>, transform_indices = @transform_9, window_bounds = array<i64: 1, 512>}, {pipeline_mode = #tpu.pipeline_mode<synchronous>, transform_indices = @transform_10, window_bounds = array<i64: 512, 128>}, {pipeline_mode = #tpu.pipeline_mode<synchronous>, transform_indices = @transform_11, window_bounds = array<i64: 1, 128>}, {pipeline_mode = #tpu.pipeline_mode<synchronous>, transform_indices = @transform_12, window_bounds = array<i64: 256, 512>}, {pipeline_mode = #tpu.pipeline_mode<synchronous>, transform_indices = @transform_13, window_bounds = array<i64: 128, 512>}, {pipeline_mode = #tpu.pipeline_mode<synchronous>, transform_indices = @transform_14, window_bounds = array<i64: 1, 512>}, {pipeline_mode = #tpu.pipeline_mode<synchronous>, transform_indices = @transform_15, window_bounds = array<i64: 512, 256>}, {pipeline_mode = #tpu.pipeline_mode<synchronous>, transform_indices = @transform_16, window_bounds = array<i64: 1, 256>}, {transform_indices = @transform_17, window_bounds = array<i64: 8, 128>}, {transform_indices = @transform_18, window_bounds = array<i64: 8, 256>}, {transform_indices = @transform_19, window_bounds = array<i64: 8, 256>}]} {
    %c0 = arith.constant 0 : index
    %c0_0 = arith.constant 0 : index
    %0 = vector.load %arg1[%c0, %c0_0] : memref<8x1024xf32, #tpu.memory_space<vmem>>, vector<8x1024xf32>
    %c0_1 = arith.constant 0 : index
    %c0_2 = arith.constant 0 : index
    %1 = vector.load %arg2[%c0_1, %c0_2] : memref<8x1024xf32, #tpu.memory_space<vmem>>, vector<8x1024xf32>
    %2 = tpu.concatenate %0, %1 in 0 : vector<8x1024xf32>, vector<8x1024xf32> -> vector<16x1024xf32>
    %c0_3 = arith.constant 0 : index
    %c0_4 = arith.constant 0 : index
    %3 = vector.load %arg4[%c0_3, %c0_4] : memref<1024x256xf32, #tpu.memory_space<vmem>>, vector<1024x256xf32>
    %cst = arith.constant dense<0.000000e+00> : vector<16x256xf32>
    %4 = tpu.matmul %2, %3, %cst {dimension_numbers = #tpu.dot_dimension_numbers<[1], [0], [0], [1], [0, 0, 1, 1], [], []>} : vector<16x1024xf32>, vector<1024x256xf32>, vector<16x256xf32> -> vector<16x256xf32>
    %c0_5 = arith.constant 0 : index
    %c0_6 = arith.constant 0 : index
    %5 = vector.load %arg5[%c0_5, %c0_6] : memref<1x256xf32, #tpu.memory_space<vmem>>, vector<1x256xf32>
    %6 = vector.broadcast %5 : vector<1x256xf32> to vector<16x256xf32>
    %7 = arith.addf %4, %6 : vector<16x256xf32>
    %cst_7 = arith.constant 0.000000e+00 : f32
    %8 = vector.broadcast %cst_7 : f32 to vector<16x256xf32>
    %9 = arith.maximumf %7, %8 : vector<16x256xf32>
    %c0_8 = arith.constant 0 : index
    %c0_9 = arith.constant 0 : index
    %10 = vector.load %arg6[%c0_8, %c0_9] : memref<256x256xf32, #tpu.memory_space<vmem>>, vector<256x256xf32>
    %cst_10 = arith.constant dense<0.000000e+00> : vector<16x256xf32>
    %11 = tpu.matmul %9, %10, %cst_10 {dimension_numbers = #tpu.dot_dimension_numbers<[1], [0], [0], [1], [0, 0, 1, 1], [], []>} : vector<16x256xf32>, vector<256x256xf32>, vector<16x256xf32> -> vector<16x256xf32>
    %c0_11 = arith.constant 0 : index
    %c0_12 = arith.constant 0 : index
    %12 = vector.load %arg7[%c0_11, %c0_12] : memref<1x256xf32, #tpu.memory_space<vmem>>, vector<1x256xf32>
    %13 = vector.broadcast %12 : vector<1x256xf32> to vector<16x256xf32>
    %14 = arith.addf %11, %13 : vector<16x256xf32>
    %cst_13 = arith.constant 0.000000e+00 : f32
    %15 = vector.broadcast %cst_13 : f32 to vector<16x256xf32>
    %16 = arith.maximumf %14, %15 : vector<16x256xf32>
    %17 = vector.extract_strided_slice %16 {offsets = [0, 0], sizes = [8, 256], strides = [1, 1]} : vector<16x256xf32> to vector<8x256xf32>
    %18 = vector.extract_strided_slice %16 {offsets = [8, 0], sizes = [8, 256], strides = [1, 1]} : vector<16x256xf32> to vector<8x256xf32>
    %c0_14 = arith.constant 0 : index
    %c0_15 = arith.constant 0 : index
    %19 = vector.load %arg8[%c0_14, %c0_15] : memref<256x512xf32, #tpu.memory_space<vmem>>, vector<256x512xf32>
    %cst_16 = arith.constant dense<0.000000e+00> : vector<8x512xf32>
    %20 = tpu.matmul %17, %19, %cst_16 {dimension_numbers = #tpu.dot_dimension_numbers<[1], [0], [0], [1], [0, 0, 1, 1], [], []>} : vector<8x256xf32>, vector<256x512xf32>, vector<8x512xf32> -> vector<8x512xf32>
    %c0_17 = arith.constant 0 : index
    %c0_18 = arith.constant 0 : index
    %21 = vector.load %arg9[%c0_17, %c0_18] : memref<256x512xf32, #tpu.memory_space<vmem>>, vector<256x512xf32>
    %cst_19 = arith.constant dense<0.000000e+00> : vector<8x512xf32>
    %22 = tpu.matmul %18, %21, %cst_19 {dimension_numbers = #tpu.dot_dimension_numbers<[1], [0], [0], [1], [0, 0, 1, 1], [], []>} : vector<8x256xf32>, vector<256x512xf32>, vector<8x512xf32> -> vector<8x512xf32>
    %23 = arith.addf %20, %22 : vector<8x512xf32>
    %c0_20 = arith.constant 0 : index
    %c0_21 = arith.constant 0 : index
    %24 = vector.load %arg10[%c0_20, %c0_21] : memref<1x512xf32, #tpu.memory_space<vmem>>, vector<1x512xf32>
    %25 = vector.broadcast %24 : vector<1x512xf32> to vector<8x512xf32>
    %26 = arith.addf %23, %25 : vector<8x512xf32>
    %cst_22 = arith.constant 0.000000e+00 : f32
    %27 = vector.broadcast %cst_22 : f32 to vector<8x512xf32>
    %28 = arith.maximumf %26, %27 : vector<8x512xf32>
    %c0_23 = arith.constant 0 : index
    %c0_24 = arith.constant 0 : index
    %29 = vector.load %arg11[%c0_23, %c0_24] : memref<512x128xf32, #tpu.memory_space<vmem>>, vector<512x128xf32>
    %cst_25 = arith.constant dense<0.000000e+00> : vector<8x128xf32>
    %30 = tpu.matmul %28, %29, %cst_25 {dimension_numbers = #tpu.dot_dimension_numbers<[1], [0], [0], [1], [0, 0, 1, 1], [], []>} : vector<8x512xf32>, vector<512x128xf32>, vector<8x128xf32> -> vector<8x128xf32>
    %c0_26 = arith.constant 0 : index
    %c0_27 = arith.constant 0 : index
    %31 = vector.load %arg12[%c0_26, %c0_27] : memref<1x128xf32, #tpu.memory_space<vmem>>, vector<1x128xf32>
    %32 = vector.broadcast %31 : vector<1x128xf32> to vector<8x128xf32>
    %33 = arith.addf %30, %32 : vector<8x128xf32>
    %c0_28 = arith.constant 0 : index
    %c0_29 = arith.constant 0 : index
    %34 = vector.load %arg13[%c0_28, %c0_29] : memref<256x512xf32, #tpu.memory_space<vmem>>, vector<256x512xf32>
    %cst_30 = arith.constant dense<0.000000e+00> : vector<8x512xf32>
    %35 = tpu.matmul %17, %34, %cst_30 {dimension_numbers = #tpu.dot_dimension_numbers<[1], [0], [0], [1], [0, 0, 1, 1], [], []>} : vector<8x256xf32>, vector<256x512xf32>, vector<8x512xf32> -> vector<8x512xf32>
    %c0_31 = arith.constant 0 : index
    %c0_32 = arith.constant 0 : index
    %36 = vector.load %arg3[%c0_31, %c0_32] : memref<8x128xf32, #tpu.memory_space<vmem>>, vector<8x128xf32>
    %c0_33 = arith.constant 0 : index
    %c0_34 = arith.constant 0 : index
    %37 = vector.load %arg14[%c0_33, %c0_34] : memref<128x512xf32, #tpu.memory_space<vmem>>, vector<128x512xf32>
    %cst_35 = arith.constant dense<0.000000e+00> : vector<8x512xf32>
    %38 = tpu.matmul %36, %37, %cst_35 {dimension_numbers = #tpu.dot_dimension_numbers<[1], [0], [0], [1], [0, 0, 1, 1], [], []>} : vector<8x128xf32>, vector<128x512xf32>, vector<8x512xf32> -> vector<8x512xf32>
    %39 = arith.addf %35, %38 : vector<8x512xf32>
    %c0_36 = arith.constant 0 : index
    %c0_37 = arith.constant 0 : index
    %40 = vector.load %arg15[%c0_36, %c0_37] : memref<1x512xf32, #tpu.memory_space<vmem>>, vector<1x512xf32>
    %41 = vector.broadcast %40 : vector<1x512xf32> to vector<8x512xf32>
    %42 = arith.addf %39, %41 : vector<8x512xf32>
    %cst_38 = arith.constant 0.000000e+00 : f32
    %43 = vector.broadcast %cst_38 : f32 to vector<8x512xf32>
    %44 = arith.maximumf %42, %43 : vector<8x512xf32>
    %c0_39 = arith.constant 0 : index
    %c0_40 = arith.constant 0 : index
    %45 = vector.load %arg16[%c0_39, %c0_40] : memref<512x256xf32, #tpu.memory_space<vmem>>, vector<512x256xf32>
    %cst_41 = arith.constant dense<0.000000e+00> : vector<8x256xf32>
    %46 = tpu.matmul %44, %45, %cst_41 {dimension_numbers = #tpu.dot_dimension_numbers<[1], [0], [0], [1], [0, 0, 1, 1], [], []>} : vector<8x512xf32>, vector<512x256xf32>, vector<8x256xf32> -> vector<8x256xf32>
    %c0_42 = arith.constant 0 : index
    %c0_43 = arith.constant 0 : index
    %47 = vector.load %arg17[%c0_42, %c0_43] : memref<1x256xf32, #tpu.memory_space<vmem>>, vector<1x256xf32>
    %48 = vector.broadcast %47 : vector<1x256xf32> to vector<8x256xf32>
    %49 = arith.addf %46, %48 : vector<8x256xf32>
    %c0_44 = arith.constant 0 : index
    %c0_45 = arith.constant 0 : index
    %50 = vector.load %arg18[%c0_44, %c0_45] : memref<8x128xf32, #tpu.memory_space<vmem>>, vector<8x128xf32>
    tpu.vector_store %arg18[%c0_44, %c0_45], %33 {strides = array<i32>} : memref<8x128xf32, #tpu.memory_space<vmem>>, vector<8x128xf32>,
    %c0_46 = arith.constant 0 : index
    %c0_47 = arith.constant 0 : index
    %51 = vector.load %arg19[%c0_46, %c0_47] : memref<8x256xf32, #tpu.memory_space<vmem>>, vector<8x256xf32>
    tpu.vector_store %arg19[%c0_46, %c0_47], %49 {strides = array<i32>} : memref<8x256xf32, #tpu.memory_space<vmem>>, vector<8x256xf32>,
    %c0_48 = arith.constant 0 : index
    %c0_49 = arith.constant 0 : index
    %52 = vector.load %arg20[%c0_48, %c0_49] : memref<8x256xf32, #tpu.memory_space<vmem>>, vector<8x256xf32>
    tpu.vector_store %arg20[%c0_48, %c0_49], %18 {strides = array<i32>} : memref<8x256xf32, #tpu.memory_space<vmem>>, vector<8x256xf32>,
    return
  }
  func.func @transform_0(%arg0: i32) -> (i32, i32) {
    %c0_i32 = arith.constant 0 : i32
    %c0_i32_0 = arith.constant 0 : i32
    return %arg0, %c0_i32 : i32, i32
  }
  func.func @transform_1(%arg0: i32) -> (i32, i32) {
    %c0_i32 = arith.constant 0 : i32
    %c0_i32_0 = arith.constant 0 : i32
    return %arg0, %c0_i32 : i32, i32
  }
  func.func @transform_2(%arg0: i32) -> (i32, i32) {
    %c0_i32 = arith.constant 0 : i32
    %c0_i32_0 = arith.constant 0 : i32
    return %arg0, %c0_i32 : i32, i32
  }
  func.func @transform_3(%arg0: i32) -> (i32, i32) {
    %c0_i32 = arith.constant 0 : i32
    %c0_i32_0 = arith.constant 0 : i32
    %c0_i32_1 = arith.constant 0 : i32
    return %c0_i32, %c0_i32_0 : i32, i32
  }
  func.func @transform_4(%arg0: i32) -> (i32, i32) {
    %c0_i32 = arith.constant 0 : i32
    %c0_i32_0 = arith.constant 0 : i32
    %c0_i32_1 = arith.constant 0 : i32
    return %c0_i32, %c0_i32_0 : i32, i32
  }
  func.func @transform_5(%arg0: i32) -> (i32, i32) {
    %c0_i32 = arith.constant 0 : i32
    %c0_i32_0 = arith.constant 0 : i32
    %c0_i32_1 = arith.constant 0 : i32
    return %c0_i32, %c0_i32_0 : i32, i32
  }
  func.func @transform_6(%arg0: i32) -> (i32, i32) {
    %c0_i32 = arith.constant 0 : i32
    %c0_i32_0 = arith.constant 0 : i32
    %c0_i32_1 = arith.constant 0 : i32
    return %c0_i32, %c0_i32_0 : i32, i32
  }
  func.func @transform_7(%arg0: i32) -> (i32, i32) {
    %c0_i32 = arith.constant 0 : i32
    %c0_i32_0 = arith.constant 0 : i32
    %c0_i32_1 = arith.constant 0 : i32
    return %c0_i32, %c0_i32_0 : i32, i32
  }
  func.func @transform_8(%arg0: i32) -> (i32, i32) {
    %c0_i32 = arith.constant 0 : i32
    %c0_i32_0 = arith.constant 0 : i32
    %c0_i32_1 = arith.constant 0 : i32
    return %c0_i32, %c0_i32_0 : i32, i32
  }
  func.func @transform_9(%arg0: i32) -> (i32, i32) {
    %c0_i32 = arith.constant 0 : i32
    %c0_i32_0 = arith.constant 0 : i32
    %c0_i32_1 = arith.constant 0 : i32
    return %c0_i32, %c0_i32_0 : i32, i32
  }
  func.func @transform_10(%arg0: i32) -> (i32, i32) {
    %c0_i32 = arith.constant 0 : i32
    %c0_i32_0 = arith.constant 0 : i32
    %c0_i32_1 = arith.constant 0 : i32
    return %c0_i32, %c0_i32_0 : i32, i32
  }
  func.func @transform_11(%arg0: i32) -> (i32, i32) {
    %c0_i32 = arith.constant 0 : i32
    %c0_i32_0 = arith.constant 0 : i32
    %c0_i32_1 = arith.constant 0 : i32
    return %c0_i32, %c0_i32_0 : i32, i32
  }
  func.func @transform_12(%arg0: i32) -> (i32, i32) {
    %c0_i32 = arith.constant 0 : i32
    %c0_i32_0 = arith.constant 0 : i32
    %c0_i32_1 = arith.constant 0 : i32
    return %c0_i32, %c0_i32_0 : i32, i32
  }
  func.func @transform_13(%arg0: i32) -> (i32, i32) {
    %c0_i32 = arith.constant 0 : i32
    %c0_i32_0 = arith.constant 0 : i32
    %c0_i32_1 = arith.constant 0 : i32
    return %c0_i32, %c0_i32_0 : i32, i32
  }
  func.func @transform_14(%arg0: i32) -> (i32, i32) {
    %c0_i32 = arith.constant 0 : i32
    %c0_i32_0 = arith.constant 0 : i32
    %c0_i32_1 = arith.constant 0 : i32
    return %c0_i32, %c0_i32_0 : i32, i32
  }
  func.func @transform_15(%arg0: i32) -> (i32, i32) {
    %c0_i32 = arith.constant 0 : i32
    %c0_i32_0 = arith.constant 0 : i32
    %c0_i32_1 = arith.constant 0 : i32
    return %c0_i32, %c0_i32_0 : i32, i32
  }
  func.func @transform_16(%arg0: i32) -> (i32, i32) {
    %c0_i32 = arith.constant 0 : i32
    %c0_i32_0 = arith.constant 0 : i32
    %c0_i32_1 = arith.constant 0 : i32
    return %c0_i32, %c0_i32_0 : i32, i32
  }
  func.func @transform_17(%arg0: i32) -> (i32, i32) {
    %c0_i32 = arith.constant 0 : i32
    %c0_i32_0 = arith.constant 0 : i32
    return %arg0, %c0_i32 : i32, i32
  }
  func.func @transform_18(%arg0: i32) -> (i32, i32) {
    %c0_i32 = arith.constant 0 : i32
    %c0_i32_0 = arith.constant 0 : i32
    return %arg0, %c0_i32 : i32, i32
  }
  func.func @transform_19(%arg0: i32) -> (i32, i32) {
    %c0_i32 = arith.constant 0 : i32
    %c0_i32_0 = arith.constant 0 : i32
    return %arg0, %c0_i32 : i32, i32
  }
}

</mosaic_0001>

<bundles_post_ra>
// kernel: icm_forward.1
= control target key start
LH: loop header
LB: loop body
LE: loop exit
PB: predicated region body
PF: predicated region fallthrough
CT: control target
= control target key end

     0   :  { %s5603_s3 = inlined_call_operand.vmem [shape: f32[1024,256], index: 3, kind: input, shape index: {}]   ;;  %s5604_s0 = inlined_call_operand.vmem [shape: f32[8,1024], index: 0, kind: input, shape index: {}]   ;;  %s5605_s1 = inlined_call_operand.vmem [shape: f32[8,1024], index: 1, kind: input, shape index: {}]   ;;  %s5606_s5 = inlined_call_operand.vmem [shape: f32[256,256], index: 5, kind: input, shape index: {}]   ;;  %s5607_s8 = inlined_call_operand.vmem [shape: f32[256,512], index: 8, kind: input, shape index: {}]   ;;  %s5608_s4 = inlined_call_operand.vmem [shape: f32[1,256], index: 4, kind: input, shape index: {}]   ;;  %s5609_s7 = inlined_call_operand.vmem [shape: f32[256,512], index: 7, kind: input, shape index: {}]   ;;  %s5610_s6 = inlined_call_operand.vmem [shape: f32[1,256], index: 6, kind: input, shape index: {}]   ;;  %s5611_s19 = inlined_call_operand.vmem [shape: f32[8,256], index: 19, kind: output, shape index: {2}]   ;;  %s5612_s13 = inlined_call_operand.vmem [shape: f32[128,512], index: 13, kind: input, shape index: {}]   ;;  %s5613_s10 = inlined_call_operand.vmem [shape: f32[512,128], index: 10, kind: input, shape index: {}]   ;;  %s5614_s2 = inlined_call_operand.vmem [shape: f32[8,128], index: 2, kind: input, shape index: {}]   ;;  %s5615_s12 = inlined_call_operand.vmem [shape: f32[256,512], index: 12, kind: input, shape index: {}]   ;;  %s5616_s15 = inlined_call_operand.vmem [shape: f32[512,256], index: 15, kind: input, shape index: {}]   ;;  %s5617_s9 = inlined_call_operand.vmem [shape: f32[1,512], index: 9, kind: input, shape index: {}]   ;;  %s5618_s14 = inlined_call_operand.vmem [shape: f32[1,512], index: 14, kind: input, shape index: {}]   ;;  %s5619_s11 = inlined_call_operand.vmem [shape: f32[1,128], index: 11, kind: input, shape index: {}]   ;;  %s5620_s17 = inlined_call_operand.vmem [shape: f32[8,128], index: 17, kind: output, shape index: {0}]   ;;  %s5621_s16 = inlined_call_operand.vmem [shape: f32[1,256], index: 16, kind: input, shape index: {}]   ;;  %s5622_s18 = inlined_call_operand.vmem [shape: f32[8,256], index: 18, kind: output, shape index: {1}]  }
   0x1   :  { %5627 = sst [smem:[#allocation2_spill]] %s5603_s3 }
   0x2   :  { %5628 = sst [smem:[#allocation3_spill]] %s5604_s0 }
   0x3   :  { %5629 = sst [smem:[#allocation4_spill]] %s5605_s1 }
   0x4   :  { %5630 = sst [smem:[#allocation5_spill]] %s5606_s5 }
   0x5   :  { %s5631_s20 = sld [smem:[#allocation2_spill]] }
   0x6   :  { %s5632_s22 = sld [smem:[#allocation3_spill]] }
   0x7   :  { %s5633_s5 = sld [smem:[#allocation4_spill]] }
   0x8   :  { %s5634_s28 = sld [smem:[#allocation5_spill]] }
   0xb   :  { %v106_v0 = vld [vmem:[%s5631_s20 + $0xf8] sm:$0xff]  ;;  %v105_v2 = vld [vmem:[%s5631_s20 + $0xf0] sm:$0xff]  ;;  %v104_v4 = vld [vmem:[%s5631_s20 + $0xe8] sm:$0xff] }
   0xc   :  { %v170_v1 = vld [vmem:[%s5631_s20 + $0x2f8] sm:$0xff]  ;;  %343 = vmatprep.subr.mxu0 %v106_v0  ;;  %v169_v3 = vld [vmem:[%s5631_s20 + $0x2f0] sm:$0xff]  ;;  %v168_v5 = vld [vmem:[%s5631_s20 + $0x2e8] sm:$0xff] }
   0xd   :  { %420 = vmatprep.subr.mxu1 %v170_v1  ;;  %344 = vmatpush1.msra.mxu0 %v105_v2  ;;  %v103_v6 = vld [vmem:[%s5631_s20 + $0xe0] sm:$0xff]  ;;  %v102_v8 = vld [vmem:[%s5631_s20 + $0xd8] sm:$0xff]  ;;  %v101_v10 = vld [vmem:[%s5631_s20 + $0xd0] sm:$0xff] }
   0xe   :  { %421 = vmatpush1.msra.mxu1 %v169_v3  ;;  %v167_v7 = vld [vmem:[%s5631_s20 + $0x2e0] sm:$0xff]  ;;  %345 = vmatprep.subr.mxu0 %v104_v4  ;;  %v166_v9 = vld [vmem:[%s5631_s20 + $0x2d8] sm:$0xff]  ;;  %v165_v11 = vld [vmem:[%s5631_s20 + $0x2d0] sm:$0xff] }
   0xf   :  { %422 = vmatprep.subr.mxu1 %v168_v5  ;;  %346 = vmatpush1.msra.mxu0 %v103_v6  ;;  %v100_v12 = vld [vmem:[%s5631_s20 + $0xc8] sm:$0xff]  ;;  %v99_v14 = vld [vmem:[%s5631_s20 + $0xc0] sm:$0xff]  ;;  %v98_v16 = vld [vmem:[%s5631_s20 + $0xb8] sm:$0xff] }
  0x10   :  { %423 = vmatpush1.msra.mxu1 %v167_v7  ;;  %v164_v13 = vld [vmem:[%s5631_s20 + $0x2c8] sm:$0xff]  ;;  %347 = vmatprep.subr.mxu0 %v102_v8  ;;  %v163_v15 = vld [vmem:[%s5631_s20 + $0x2c0] sm:$0xff]  ;;  %v162_v17 = vld [vmem:[%s5631_s20 + $0x2b8] sm:$0xff] }
  0x11   :  { %424 = vmatprep.subr.mxu1 %v166_v9  ;;  %348 = vmatpush1.msra.mxu0 %v101_v10  ;;  %v97_v18 = vld [vmem:[%s5631_s20 + $0xb0] sm:$0xff]  ;;  %v96_v20 = vld [vmem:[%s5631_s20 + $0xa8] sm:$0xff]  ;;  %v95_v22 = vld [vmem:[%s5631_s20 + $0xa0] sm:$0xff] }
  0x12   :  { %425 = vmatpush1.msra.mxu1 %v165_v11  ;;  %349 = vmatprep.subr.mxu0 %v100_v12  ;;  %v161_v19 = vld [vmem:[%s5631_s20 + $0x2b0] sm:$0xff]  ;;  %v160_v21 = vld [vmem:[%s5631_s20 + $0x2a8] sm:$0xff]  ;;  %v159_v23 = vld [vmem:[%s5631_s20 + $0x2a0] sm:$0xff] }
  0x13   :  { %426 = vmatprep.subr.mxu1 %v164_v13  ;;  %350 = vmatpush1.msra.mxu0 %v99_v14  ;;  %v94_v24 = vld [vmem:[%s5631_s20 + $0x98] sm:$0xff]  ;;  %v93_v26 = vld [vmem:[%s5631_s20 + $0x90] sm:$0xff]  ;;  %v92_v28 = vld [vmem:[%s5631_s20 + $0x88] sm:$0xff] }
  0x14   :  { %427 = vmatpush1.msra.mxu1 %v163_v15  ;;  %351 = vmatprep.subr.mxu0 %v98_v16  ;;  %v158_v25 = vld [vmem:[%s5631_s20 + $0x298] sm:$0xff]  ;;  %v157_v27 = vld [vmem:[%s5631_s20 + $0x290] sm:$0xff]  ;;  %v156_v29 = vld [vmem:[%s5631_s20 + $0x288] sm:$0xff] }
  0x15   :  { %428 = vmatprep.subr.mxu1 %v162_v17  ;;  %352 = vmatpush1.msra.mxu0 %v97_v18  ;;  %v91_v30 = vld [vmem:[%s5631_s20 + $0x80] sm:$0xff]  ;;  %v90_v32 = vld [vmem:[%s5631_s20 + $0x78] sm:$0xff]  ;;  %v89_v34 = vld [vmem:[%s5631_s20 + $0x70] sm:$0xff] }
  0x16   :  { %429 = vmatpush1.msra.mxu1 %v161_v19  ;;  %353 = vmatprep.subr.mxu0 %v96_v20  ;;  %v155_v31 = vld [vmem:[%s5631_s20 + $0x280] sm:$0xff]  ;;  %v154_v33 = vld [vmem:[%s5631_s20 + $0x278] sm:$0xff]  ;;  %v153_v35 = vld [vmem:[%s5631_s20 + $0x270] sm:$0xff] }
  0x17   :  { %430 = vmatprep.subr.mxu1 %v160_v21  ;;  %354 = vmatpush1.msra.mxu0 %v95_v22  ;;  %v88_v36 = vld [vmem:[%s5631_s20 + $0x68] sm:$0xff]  ;;  %v87_v38 = vld [vmem:[%s5631_s20 + $0x60] sm:$0xff]  ;;  %v86_v40 = vld [vmem:[%s5631_s20 + $0x58] sm:$0xff] }
  0x18   :  { %431 = vmatpush1.msra.mxu1 %v159_v23  ;;  %355 = vmatprep.subr.mxu0 %v94_v24  ;;  %v152_v37 = vld [vmem:[%s5631_s20 + $0x268] sm:$0xff]  ;;  %v151_v39 = vld [vmem:[%s5631_s20 + $0x260] sm:$0xff]  ;;  %v150_v41 = vld [vmem:[%s5631_s20 + $0x258] sm:$0xff] }
  0x19   :  { %432 = vmatprep.subr.mxu1 %v158_v25  ;;  %356 = vmatpush1.msra.mxu0 %v93_v26  ;;  %v85_v42 = vld [vmem:[%s5631_s20 + $0x50] sm:$0xff]  ;;  %v84_v44 = vld [vmem:[%s5631_s20 + $0x48] sm:$0xff]  ;;  %v83_v46 = vld [vmem:[%s5631_s20 + $0x40] sm:$0xff] }
  0x1a   :  { %433 = vmatpush1.msra.mxu1 %v157_v27  ;;  %357 = vmatprep.subr.mxu0 %v92_v28  ;;  %v149_v43 = vld [vmem:[%s5631_s20 + $0x250] sm:$0xff]  ;;  %v148_v45 = vld [vmem:[%s5631_s20 + $0x248] sm:$0xff]  ;;  %v147_v47 = vld [vmem:[%s5631_s20 + $0x240] sm:$0xff] }
  0x1b   :  { %434 = vmatprep.subr.mxu1 %v156_v29  ;;  %358 = vmatpush1.msra.mxu0 %v91_v30  ;;  %v82_v48 = vld [vmem:[%s5631_s20 + $0x38] sm:$0xff]  ;;  %v81_v50 = vld [vmem:[%s5631_s20 + $0x30] sm:$0xff]  ;;  %v80_v52 = vld [vmem:[%s5631_s20 + $0x28] sm:$0xff] }
  0x1c   :  { %435 = vmatpush1.msra.mxu1 %v155_v31  ;;  %359 = vmatprep.subr.mxu0 %v90_v32  ;;  %v146_v49 = vld [vmem:[%s5631_s20 + $0x238] sm:$0xff]  ;;  %v145_v51 = vld [vmem:[%s5631_s20 + $0x230] sm:$0xff]  ;;  %v144_v53 = vld [vmem:[%s5631_s20 + $0x228] sm:$0xff] }
  0x1d   :  { %436 = vmatprep.subr.mxu1 %v154_v33  ;;  %360 = vmatpush1.msra.mxu0 %v89_v34  ;;  %v79_v54 = vld [vmem:[%s5631_s20 + $0x20] sm:$0xff]  ;;  %v78_v56 = vld [vmem:[%s5631_s20 + $0x18] sm:$0xff]  ;;  %v77_v58 = vld [vmem:[%s5631_s20 + $0x10] sm:$0xff] }
  0x1e   :  { %437 = vmatpush1.msra.mxu1 %v153_v35  ;;  %361 = vmatprep.subr.mxu0 %v88_v36  ;;  %v143_v55 = vld [vmem:[%s5631_s20 + $0x220] sm:$0xff]  ;;  %v142_v57 = vld [vmem:[%s5631_s20 + $0x218] sm:$0xff]  ;;  %v141_v59 = vld [vmem:[%s5631_s20 + $0x210] sm:$0xff] }
  0x1f   :  { %438 = vmatprep.subr.mxu1 %v152_v37  ;;  %362 = vmatpush1.msra.mxu0 %v87_v38  ;;  %v76_v60 = vld [vmem:[%s5631_s20 + $0x8] sm:$0xff]  ;;  %v75_v62 = vld [vmem:[%s5631_s20] sm:$0xff]  ;;  %v138_v0 = vld [vmem:[%s5631_s20 + $0x1f8] sm:$0xff] }
  0x20   :  { %439 = vmatpush1.msra.mxu1 %v151_v39  ;;  %363 = vmatprep.subr.mxu0 %v86_v40  ;;  %v140_v61 = vld [vmem:[%s5631_s20 + $0x208] sm:$0xff]  ;;  %v139_v63 = vld [vmem:[%s5631_s20 + $0x200] sm:$0xff]  ;;  %v202_v1 = vld [vmem:[%s5631_s20 + $0x3f8] sm:$0xff] }
  0x21   :  { %440 = vmatprep.subr.mxu1 %v150_v41  ;;  %364 = vmatpush1.msra.mxu0 %v85_v42  ;;  %v137_v2 = vld [vmem:[%s5631_s20 + $0x1f0] sm:$0xff]  ;;  %v136_v4 = vld [vmem:[%s5631_s20 + $0x1e8] sm:$0xff]  ;;  %v135_v6 = vld [vmem:[%s5631_s20 + $0x1e0] sm:$0xff] }
  0x22   :  { %441 = vmatpush1.msra.mxu1 %v149_v43  ;;  %365 = vmatprep.subr.mxu0 %v84_v44  ;;  %v201_v3 = vld [vmem:[%s5631_s20 + $0x3f0] sm:$0xff]  ;;  %v200_v5 = vld [vmem:[%s5631_s20 + $0x3e8] sm:$0xff]  ;;  %v199_v7 = vld [vmem:[%s5631_s20 + $0x3e0] sm:$0xff] }
  0x23   :  { %442 = vmatprep.subr.mxu1 %v148_v45  ;;  %366 = vmatpush1.msra.mxu0 %v83_v46  ;;  %v134_v8 = vld [vmem:[%s5631_s20 + $0x1d8] sm:$0xff]  ;;  %v133_v10 = vld [vmem:[%s5631_s20 + $0x1d0] sm:$0xff]  ;;  %v132_v12 = vld [vmem:[%s5631_s20 + $0x1c8] sm:$0xff] }
  0x24   :  { %443 = vmatpush1.msra.mxu1 %v147_v47  ;;  %367 = vmatprep.subr.mxu0 %v82_v48  ;;  %v198_v9 = vld [vmem:[%s5631_s20 + $0x3d8] sm:$0xff]  ;;  %v197_v11 = vld [vmem:[%s5631_s20 + $0x3d0] sm:$0xff]  ;;  %v196_v13 = vld [vmem:[%s5631_s20 + $0x3c8] sm:$0xff] }
  0x25   :  { %444 = vmatprep.subr.mxu1 %v146_v49  ;;  %368 = vmatpush1.msra.mxu0 %v81_v50  ;;  %v131_v14 = vld [vmem:[%s5631_s20 + $0x1c0] sm:$0xff]  ;;  %v130_v16 = vld [vmem:[%s5631_s20 + $0x1b8] sm:$0xff]  ;;  %v129_v18 = vld [vmem:[%s5631_s20 + $0x1b0] sm:$0xff] }
  0x26   :  { %445 = vmatpush1.msra.mxu1 %v145_v51  ;;  %369 = vmatprep.subr.mxu0 %v80_v52  ;;  %v195_v15 = vld [vmem:[%s5631_s20 + $0x3c0] sm:$0xff]  ;;  %v194_v17 = vld [vmem:[%s5631_s20 + $0x3b8] sm:$0xff]  ;;  %v193_v19 = vld [vmem:[%s5631_s20 + $0x3b0] sm:$0xff] }
  0x27   :  { %446 = vmatprep.subr.mxu1 %v144_v53  ;;  %370 = vmatpush1.msra.mxu0 %v79_v54  ;;  %v128_v20 = vld [vmem:[%s5631_s20 + $0x1a8] sm:$0xff]  ;;  %v127_v22 = vld [vmem:[%s5631_s20 + $0x1a0] sm:$0xff]  ;;  %v126_v24 = vld [vmem:[%s5631_s20 + $0x198] sm:$0xff] }
  0x28   :  { %447 = vmatpush1.msra.mxu1 %v143_v55  ;;  %371 = vmatprep.subr.mxu0 %v78_v56  ;;  %v192_v21 = vld [vmem:[%s5631_s20 + $0x3a8] sm:$0xff]  ;;  %v191_v23 = vld [vmem:[%s5631_s20 + $0x3a0] sm:$0xff]  ;;  %v190_v25 = vld [vmem:[%s5631_s20 + $0x398] sm:$0xff] }
  0x29   :  { %448 = vmatprep.subr.mxu1 %v142_v57  ;;  %372 = vmatpush1.msra.mxu0 %v77_v58  ;;  %v125_v26 = vld [vmem:[%s5631_s20 + $0x190] sm:$0xff]  ;;  %v124_v28 = vld [vmem:[%s5631_s20 + $0x188] sm:$0xff]  ;;  %v123_v30 = vld [vmem:[%s5631_s20 + $0x180] sm:$0xff] }
  0x2a   :  { %449 = vmatpush1.msra.mxu1 %v141_v59  ;;  %373 = vmatprep.subr.mxu0 %v76_v60  ;;  %v189_v27 = vld [vmem:[%s5631_s20 + $0x390] sm:$0xff]  ;;  %v188_v29 = vld [vmem:[%s5631_s20 + $0x388] sm:$0xff]  ;;  %v187_v31 = vld [vmem:[%s5631_s20 + $0x380] sm:$0xff] }
  0x2b   :  { %450 = vmatprep.subr.mxu1 %v140_v61  ;;  %374 = vmatpush1.msra.mxu0 %v75_v62  ;;  %v122_v32 = vld [vmem:[%s5631_s20 + $0x178] sm:$0xff]  ;;  %v121_v34 = vld [vmem:[%s5631_s20 + $0x170] sm:$0xff]  ;;  %v120_v36 = vld [vmem:[%s5631_s20 + $0x168] sm:$0xff] }
  0x2c   :  { %451 = vmatpush1.msra.mxu1 %v139_v63  ;;  %375 = vmatprep.subr.mxu0 %v138_v0  ;;  %v186_v33 = vld [vmem:[%s5631_s20 + $0x378] sm:$0xff]  ;;  %v185_v35 = vld [vmem:[%s5631_s20 + $0x370] sm:$0xff]  ;;  %v184_v37 = vld [vmem:[%s5631_s20 + $0x368] sm:$0xff] }
  0x2d   :  { %452 = vmatprep.subr.mxu1 %v202_v1  ;;  %376 = vmatpush2.msra.mxu0 %v137_v2  ;;  %v119_v38 = vld [vmem:[%s5631_s20 + $0x160] sm:$0xff]  ;;  %v118_v40 = vld [vmem:[%s5631_s20 + $0x158] sm:$0xff]  ;;  %v117_v42 = vld [vmem:[%s5631_s20 + $0x150] sm:$0xff] }
  0x2e   :  { %453 = vmatpush2.msra.mxu1 %v201_v3  ;;  %377 = vmatprep.subr.mxu0 %v136_v4  ;;  %v183_v39 = vld [vmem:[%s5631_s20 + $0x360] sm:$0xff]  ;;  %v182_v41 = vld [vmem:[%s5631_s20 + $0x358] sm:$0xff]  ;;  %v181_v43 = vld [vmem:[%s5631_s20 + $0x350] sm:$0xff] }
  0x2f   :  { %454 = vmatprep.subr.mxu1 %v200_v5  ;;  %378 = vmatpush2.msra.mxu0 %v135_v6  ;;  %v116_v44 = vld [vmem:[%s5631_s20 + $0x148] sm:$0xff]  ;;  %v115_v46 = vld [vmem:[%s5631_s20 + $0x140] sm:$0xff]  ;;  %v114_v48 = vld [vmem:[%s5631_s20 + $0x138] sm:$0xff] }
  0x30   :  { %455 = vmatpush2.msra.mxu1 %v199_v7  ;;  %379 = vmatprep.subr.mxu0 %v134_v8  ;;  %v180_v45 = vld [vmem:[%s5631_s20 + $0x348] sm:$0xff]  ;;  %v179_v47 = vld [vmem:[%s5631_s20 + $0x340] sm:$0xff]  ;;  %v178_v49 = vld [vmem:[%s5631_s20 + $0x338] sm:$0xff] }
  0x31   :  { %456 = vmatprep.subr.mxu1 %v198_v9  ;;  %380 = vmatpush2.msra.mxu0 %v133_v10  ;;  %v113_v50 = vld [vmem:[%s5631_s20 + $0x130] sm:$0xff]  ;;  %v112_v52 = vld [vmem:[%s5631_s20 + $0x128] sm:$0xff]  ;;  %v111_v54 = vld [vmem:[%s5631_s20 + $0x120] sm:$0xff] }
  0x32   :  { %457 = vmatpush2.msra.mxu1 %v197_v11  ;;  %381 = vmatprep.subr.mxu0 %v132_v12  ;;  %v177_v51 = vld [vmem:[%s5631_s20 + $0x330] sm:$0xff]  ;;  %v176_v53 = vld [vmem:[%s5631_s20 + $0x328] sm:$0xff]  ;;  %v175_v55 = vld [vmem:[%s5631_s20 + $0x320] sm:$0xff] }
  0x33   :  { %458 = vmatprep.subr.mxu1 %v196_v13  ;;  %382 = vmatpush2.msra.mxu0 %v131_v14  ;;  %v110_v56 = vld [vmem:[%s5631_s20 + $0x118] sm:$0xff]  ;;  %v109_v58 = vld [vmem:[%s5631_s20 + $0x110] sm:$0xff]  ;;  %v108_v60 = vld [vmem:[%s5631_s20 + $0x108] sm:$0xff] }
  0x34   :  { %459 = vmatpush2.msra.mxu1 %v195_v15  ;;  %383 = vmatprep.subr.mxu0 %v130_v16  ;;  %v174_v57 = vld [vmem:[%s5631_s20 + $0x318] sm:$0xff]  ;;  %v173_v59 = vld [vmem:[%s5631_s20 + $0x310] sm:$0xff]  ;;  %v172_v61 = vld [vmem:[%s5631_s20 + $0x308] sm:$0xff] }
  0x35   :  { %460 = vmatprep.subr.mxu1 %v194_v17  ;;  %384 = vmatpush2.msra.mxu0 %v129_v18  ;;  %v107_v62 = vld [vmem:[%s5631_s20 + $0x100] sm:$0xff]  ;;  %v60_v63 = vld [vmem:[%s5632_s22 + $0x8] sm:$0xff]  ;;  %v62_v2 = vld [vmem:[%s5632_s22 + $0x18] sm:$0xff] }
  0x36   :  { %461 = vmatpush2.msra.mxu1 %v193_v19  ;;  %385 = vmatprep.subr.mxu0 %v128_v20  ;;  %v171_v0 = vld [vmem:[%s5631_s20 + $0x300] sm:$0xff]  ;;  %v234_v3 = vld [vmem:[%s5631_s20 + $0x4f8] sm:$0xff]  ;;  %v61_v5 = vld [vmem:[%s5632_s22 + $0x10] sm:$0xff] }
  0x37   :  { %462 = vmatprep.subr.mxu1 %v192_v21  ;;  %386 = vmatpush2.msra.mxu0 %v127_v22  ;;  %v59_v1 = vld [vmem:[%s5632_s22] sm:$0xff]  ;;  %v298_v4 = vld [vmem:[%s5631_s20 + $0x6f8] sm:$0xff]  ;;  %v233_v6 = vld [vmem:[%s5631_s20 + $0x4f0] sm:$0xff] }
  0x38   :  { %463 = vmatpush2.msra.mxu1 %v191_v23  ;;  %387 = vmatprep.subr.mxu0 %v126_v24  ;;  %v297_v7 = vld [vmem:[%s5631_s20 + $0x6f0] sm:$0xff]  ;;  %v232_v8 = vld [vmem:[%s5631_s20 + $0x4e8] sm:$0xff]  ;;  %v231_v10 = vld [vmem:[%s5631_s20 + $0x4e0] sm:$0xff] }
  0x39   :  { %464 = vmatprep.subr.mxu1 %v190_v25  ;;  %388 = vmatpush2.msra.mxu0 %v125_v26  ;;  %v296_v9 = vld [vmem:[%s5631_s20 + $0x6e8] sm:$0xff]  ;;  %v295_v11 = vld [vmem:[%s5631_s20 + $0x6e0] sm:$0xff]  ;;  %v230_v12 = vld [vmem:[%s5631_s20 + $0x4d8] sm:$0xff] }
  0x3a   :  { %465 = vmatpush2.msra.mxu1 %v189_v27  ;;  %389 = vmatprep.subr.mxu0 %v124_v28  ;;  %v294_v13 = vld [vmem:[%s5631_s20 + $0x6d8] sm:$0xff]  ;;  %v229_v14 = vld [vmem:[%s5631_s20 + $0x4d0] sm:$0xff]  ;;  %v228_v16 = vld [vmem:[%s5631_s20 + $0x4c8] sm:$0xff] }
  0x3b   :  { %466 = vmatprep.subr.mxu1 %v188_v29  ;;  %390 = vmatpush2.msra.mxu0 %v123_v30  ;;  %v293_v15 = vld [vmem:[%s5631_s20 + $0x6d0] sm:$0xff]  ;;  %v292_v17 = vld [vmem:[%s5631_s20 + $0x6c8] sm:$0xff]  ;;  %v227_v18 = vld [vmem:[%s5631_s20 + $0x4c0] sm:$0xff] }
  0x3c   :  { %467 = vmatpush2.msra.mxu1 %v187_v31  ;;  %391 = vmatprep.subr.mxu0 %v122_v32  ;;  %v291_v19 = vld [vmem:[%s5631_s20 + $0x6c0] sm:$0xff]  ;;  %v226_v20 = vld [vmem:[%s5631_s20 + $0x4b8] sm:$0xff]  ;;  %v225_v22 = vld [vmem:[%s5631_s20 + $0x4b0] sm:$0xff] }
  0x3d   :  { %468 = vmatprep.subr.mxu1 %v186_v33  ;;  %392 = vmatpush2.msra.mxu0 %v121_v34  ;;  %v290_v21 = vld [vmem:[%s5631_s20 + $0x6b8] sm:$0xff]  ;;  %v289_v23 = vld [vmem:[%s5631_s20 + $0x6b0] sm:$0xff]  ;;  %v224_v24 = vld [vmem:[%s5631_s20 + $0x4a8] sm:$0xff] }
  0x3e   :  { %469 = vmatpush2.msra.mxu1 %v185_v35  ;;  %393 = vmatprep.subr.mxu0 %v120_v36  ;;  %v288_v25 = vld [vmem:[%s5631_s20 + $0x6a8] sm:$0xff]  ;;  %v223_v26 = vld [vmem:[%s5631_s20 + $0x4a0] sm:$0xff]  ;;  %v222_v28 = vld [vmem:[%s5631_s20 + $0x498] sm:$0xff] }
  0x3f   :  { %470 = vmatprep.subr.mxu1 %v184_v37  ;;  %394 = vmatpush2.msra.mxu0 %v119_v38  ;;  %v287_v27 = vld [vmem:[%s5631_s20 + $0x6a0] sm:$0xff]  ;;  %v286_v29 = vld [vmem:[%s5631_s20 + $0x698] sm:$0xff]  ;;  %v221_v30 = vld [vmem:[%s5631_s20 + $0x490] sm:$0xff] }
  0x40   :  { %471 = vmatpush2.msra.mxu1 %v183_v39  ;;  %395 = vmatprep.subr.mxu0 %v118_v40  ;;  %v285_v31 = vld [vmem:[%s5631_s20 + $0x690] sm:$0xff]  ;;  %v220_v32 = vld [vmem:[%s5631_s20 + $0x488] sm:$0xff]  ;;  %v219_v34 = vld [vmem:[%s5631_s20 + $0x480] sm:$0xff] }
  0x41   :  { %472 = vmatprep.subr.mxu1 %v182_v41  ;;  %396 = vmatpush2.msra.mxu0 %v117_v42  ;;  %v284_v33 = vld [vmem:[%s5631_s20 + $0x688] sm:$0xff]  ;;  %v283_v35 = vld [vmem:[%s5631_s20 + $0x680] sm:$0xff]  ;;  %v218_v36 = vld [vmem:[%s5631_s20 + $0x478] sm:$0xff] }
  0x42   :  { %473 = vmatpush2.msra.mxu1 %v181_v43  ;;  %397 = vmatprep.subr.mxu0 %v116_v44  ;;  %v282_v37 = vld [vmem:[%s5631_s20 + $0x678] sm:$0xff]  ;;  %v217_v38 = vld [vmem:[%s5631_s20 + $0x470] sm:$0xff]  ;;  %v216_v40 = vld [vmem:[%s5631_s20 + $0x468] sm:$0xff] }
  0x43   :  { %474 = vmatprep.subr.mxu1 %v180_v45  ;;  %398 = vmatpush2.msra.mxu0 %v115_v46  ;;  %v281_v39 = vld [vmem:[%s5631_s20 + $0x670] sm:$0xff]  ;;  %v280_v41 = vld [vmem:[%s5631_s20 + $0x668] sm:$0xff]  ;;  %v215_v42 = vld [vmem:[%s5631_s20 + $0x460] sm:$0xff] }
  0x44   :  { %475 = vmatpush2.msra.mxu1 %v179_v47  ;;  %399 = vmatprep.subr.mxu0 %v114_v48  ;;  %v279_v43 = vld [vmem:[%s5631_s20 + $0x660] sm:$0xff]  ;;  %v214_v44 = vld [vmem:[%s5631_s20 + $0x458] sm:$0xff]  ;;  %v213_v46 = vld [vmem:[%s5631_s20 + $0x450] sm:$0xff] }
  0x45   :  { %476 = vmatprep.subr.mxu1 %v178_v49  ;;  %400 = vmatpush2.msra.mxu0 %v113_v50  ;;  %v278_v45 = vld [vmem:[%s5631_s20 + $0x658] sm:$0xff]  ;;  %v277_v47 = vld [vmem:[%s5631_s20 + $0x650] sm:$0xff]  ;;  %v212_v48 = vld [vmem:[%s5631_s20 + $0x448] sm:$0xff] }
  0x46   :  { %477 = vmatpush2.msra.mxu1 %v177_v51  ;;  %401 = vmatprep.subr.mxu0 %v112_v52  ;;  %v276_v49 = vld [vmem:[%s5631_s20 + $0x648] sm:$0xff]  ;;  %v211_v50 = vld [vmem:[%s5631_s20 + $0x440] sm:$0xff]  ;;  %v210_v52 = vld [vmem:[%s5631_s20 + $0x438] sm:$0xff] }
  0x47   :  { %478 = vmatprep.subr.mxu1 %v176_v53  ;;  %402 = vmatpush2.msra.mxu0 %v111_v54  ;;  %v275_v51 = vld [vmem:[%s5631_s20 + $0x640] sm:$0xff]  ;;  %v274_v53 = vld [vmem:[%s5631_s20 + $0x638] sm:$0xff]  ;;  %v209_v54 = vld [vmem:[%s5631_s20 + $0x430] sm:$0xff] }
  0x48   :  { %479 = vmatpush2.msra.mxu1 %v175_v55  ;;  %403 = vmatprep.subr.mxu0 %v110_v56  ;;  %v273_v55 = vld [vmem:[%s5631_s20 + $0x630] sm:$0xff]  ;;  %v208_v56 = vld [vmem:[%s5631_s20 + $0x428] sm:$0xff] }
  0x49   :  { %480 = vmatprep.subr.mxu1 %v174_v57  ;;  %404 = vmatpush2.msra.mxu0 %v109_v58  ;;  %v272_v57 = vld [vmem:[%s5631_s20 + $0x628] sm:$0xff]  ;;  %v207_v58 = vld [vmem:[%s5631_s20 + $0x420] sm:$0xff] }
  0x4a   :  { %481 = vmatpush2.msra.mxu1 %v173_v59  ;;  %405 = vmatprep.subr.mxu0 %v108_v60  ;;  %v271_v59 = vld [vmem:[%s5631_s20 + $0x620] sm:$0xff]  ;;  %v206_v60 = vld [vmem:[%s5631_s20 + $0x418] sm:$0xff] }
  0x4b   :  { %482 = vmatprep.subr.mxu1 %v172_v61  ;;  %406 = vmatpush2.msra.mxu0 %v107_v62  ;;  %v270_v61 = vld [vmem:[%s5631_s20 + $0x618] sm:$0xff]  ;;  %v205_v62 = vld [vmem:[%s5631_s20 + $0x410] sm:$0xff] }
  0x4c   :  { %407 = vmatprep.mubr.f32.mxu0 %v60_v63  ;;  %483 = vmatpush2.msra.mxu1 %v171_v0  ;;  %v269_v63 = vld [vmem:[%s5631_s20 + $0x610] sm:$0xff]  ;;  %v204_v0 = vld [vmem:[%s5631_s20 + $0x408] sm:$0xff] }
  0x4d   :  { %408 = vmatmul.mubr.f32.vlgmr.msra.gmra.mxu0 %v59_v1  ;;  %484 = vmatprep.mubr.f32.mxu1 %v62_v2  ;;  %v268_v1 = vld [vmem:[%s5631_s20 + $0x608] sm:$0xff]  ;;  %v203_v2 = vld [vmem:[%s5631_s20 + $0x400] sm:$0xff] }
  0x4e   :  { %497 = vmatprep.subr.mxu0 %v234_v3  ;;  %574 = vmatprep.subr.mxu1 %v298_v4  ;;  %v267_v3 = vld [vmem:[%s5631_s20 + $0x600] sm:$0xff]  ;;  %v266_v4 = vld [vmem:[%s5631_s20 + $0x5f8] sm:$0xff] }
  0x4f   :  { %485 = vmatmul.mubr.f32.vlgmr.msra.gmra.mxu1 %v61_v5  ;;  %498 = vmatpush1.msra.mxu0 %v233_v6  ;;  %v330_v5 = vld [vmem:[%s5631_s20 + $0x7f8] sm:$0xff]  ;;  %v265_v6 = vld [vmem:[%s5631_s20 + $0x5f0] sm:$0xff] }
  0x50   :  { %575 = vmatpush1.msra.mxu1 %v297_v7  ;;  %499 = vmatprep.subr.mxu0 %v232_v8  ;;  %v329_v7 = vld [vmem:[%s5631_s20 + $0x7f0] sm:$0xff]  ;;  %v264_v8 = vld [vmem:[%s5631_s20 + $0x5e8] sm:$0xff] }
  0x51   :  { %576 = vmatprep.subr.mxu1 %v296_v9  ;;  %500 = vmatpush1.msra.mxu0 %v231_v10  ;;  %v328_v9 = vld [vmem:[%s5631_s20 + $0x7e8] sm:$0xff]  ;;  %v263_v10 = vld [vmem:[%s5631_s20 + $0x5e0] sm:$0xff] }
  0x52   :  { %577 = vmatpush1.msra.mxu1 %v295_v11  ;;  %501 = vmatprep.subr.mxu0 %v230_v12  ;;  %v327_v11 = vld [vmem:[%s5631_s20 + $0x7e0] sm:$0xff]  ;;  %v262_v12 = vld [vmem:[%s5631_s20 + $0x5d8] sm:$0xff] }
  0x53   :  { %578 = vmatprep.subr.mxu1 %v294_v13  ;;  %502 = vmatpush1.msra.mxu0 %v229_v14  ;;  %v326_v13 = vld [vmem:[%s5631_s20 + $0x7d8] sm:$0xff]  ;;  %v261_v14 = vld [vmem:[%s5631_s20 + $0x5d0] sm:$0xff] }
  0x54   :  { %579 = vmatpush1.msra.mxu1 %v293_v15  ;;  %503 = vmatprep.subr.mxu0 %v228_v16  ;;  %v325_v15 = vld [vmem:[%s5631_s20 + $0x7d0] sm:$0xff]  ;;  %v260_v16 = vld [vmem:[%s5631_s20 + $0x5c8] sm:$0xff] }
  0x55   :  { %580 = vmatprep.subr.mxu1 %v292_v17  ;;  %504 = vmatpush1.msra.mxu0 %v227_v18  ;;  %v324_v17 = vld [vmem:[%s5631_s20 + $0x7c8] sm:$0xff]  ;;  %v259_v18 = vld [vmem:[%s5631_s20 + $0x5c0] sm:$0xff] }
  0x56   :  { %581 = vmatpush1.msra.mxu1 %v291_v19  ;;  %505 = vmatprep.subr.mxu0 %v226_v20  ;;  %v323_v19 = vld [vmem:[%s5631_s20 + $0x7c0] sm:$0xff]  ;;  %v258_v20 = vld [vmem:[%s5631_s20 + $0x5b8] sm:$0xff] }
  0x57   :  { %582 = vmatprep.subr.mxu1 %v290_v21  ;;  %506 = vmatpush1.msra.mxu0 %v225_v22  ;;  %v322_v21 = vld [vmem:[%s5631_s20 + $0x7b8] sm:$0xff]  ;;  %v257_v22 = vld [vmem:[%s5631_s20 + $0x5b0] sm:$0xff] }
  0x58   :  { %583 = vmatpush1.msra.mxu1 %v289_v23  ;;  %507 = vmatprep.subr.mxu0 %v224_v24  ;;  %v321_v23 = vld [vmem:[%s5631_s20 + $0x7b0] sm:$0xff]  ;;  %v256_v24 = vld [vmem:[%s5631_s20 + $0x5a8] sm:$0xff] }
  0x59   :  { %584 = vmatprep.subr.mxu1 %v288_v25  ;;  %508 = vmatpush1.msra.mxu0 %v223_v26  ;;  %v320_v25 = vld [vmem:[%s5631_s20 + $0x7a8] sm:$0xff]  ;;  %v255_v26 = vld [vmem:[%s5631_s20 + $0x5a0] sm:$0xff] }
  0x5a   :  { %585 = vmatpush1.msra.mxu1 %v287_v27  ;;  %509 = vmatprep.subr.mxu0 %v222_v28  ;;  %v319_v27 = vld [vmem:[%s5631_s20 + $0x7a0] sm:$0xff]  ;;  %v254_v28 = vld [vmem:[%s5631_s20 + $0x598] sm:$0xff] }
  0x5b   :  { %586 = vmatprep.subr.mxu1 %v286_v29  ;;  %510 = vmatpush1.msra.mxu0 %v221_v30  ;;  %v318_v29 = vld [vmem:[%s5631_s20 + $0x798] sm:$0xff]  ;;  %v253_v30 = vld [vmem:[%s5631_s20 + $0x590] sm:$0xff] }
  0x5c   :  { %587 = vmatpush1.msra.mxu1 %v285_v31  ;;  %511 = vmatprep.subr.mxu0 %v220_v32  ;;  %v317_v31 = vld [vmem:[%s5631_s20 + $0x790] sm:$0xff]  ;;  %v252_v32 = vld [vmem:[%s5631_s20 + $0x588] sm:$0xff] }
  0x5d   :  { %588 = vmatprep.subr.mxu1 %v284_v33  ;;  %512 = vmatpush1.msra.mxu0 %v219_v34  ;;  %v316_v33 = vld [vmem:[%s5631_s20 + $0x788] sm:$0xff]  ;;  %v251_v34 = vld [vmem:[%s5631_s20 + $0x580] sm:$0xff] }
  0x5e   :  { %589 = vmatpush1.msra.mxu1 %v283_v35  ;;  %513 = vmatprep.subr.mxu0 %v218_v36  ;;  %v315_v35 = vld [vmem:[%s5631_s20 + $0x780] sm:$0xff]  ;;  %v250_v36 = vld [vmem:[%s5631_s20 + $0x578] sm:$0xff] }
  0x5f   :  { %590 = vmatprep.subr.mxu1 %v282_v37  ;;  %514 = vmatpush1.msra.mxu0 %v217_v38  ;;  %v314_v37 = vld [vmem:[%s5631_s20 + $0x778] sm:$0xff]  ;;  %v249_v38 = vld [vmem:[%s5631_s20 + $0x570] sm:$0xff] }
  0x60   :  { %591 = vmatpush1.msra.mxu1 %v281_v39  ;;  %515 = vmatprep.subr.mxu0 %v216_v40  ;;  %v313_v39 = vld [vmem:[%s5631_s20 + $0x770] sm:$0xff]  ;;  %v248_v40 = vld [vmem:[%s5631_s20 + $0x568] sm:$0xff] }
  0x61   :  { %592 = vmatprep.subr.mxu1 %v280_v41  ;;  %516 = vmatpush1.msra.mxu0 %v215_v42  ;;  %v312_v41 = vld [vmem:[%s5631_s20 + $0x768] sm:$0xff]  ;;  %v247_v42 = vld [vmem:[%s5631_s20 + $0x560] sm:$0xff] }
  0x62   :  { %593 = vmatpush1.msra.mxu1 %v279_v43  ;;  %517 = vmatprep.subr.mxu0 %v214_v44  ;;  %v311_v43 = vld [vmem:[%s5631_s20 + $0x760] sm:$0xff]  ;;  %v246_v44 = vld [vmem:[%s5631_s20 + $0x558] sm:$0xff] }
  0x63   :  { %594 = vmatprep.subr.mxu1 %v278_v45  ;;  %518 = vmatpush1.msra.mxu0 %v213_v46  ;;  %v310_v45 = vld [vmem:[%s5631_s20 + $0x758] sm:$0xff]  ;;  %v245_v46 = vld [vmem:[%s5631_s20 + $0x550] sm:$0xff] }
  0x64   :  { %595 = vmatpush1.msra.mxu1 %v277_v47  ;;  %519 = vmatprep.subr.mxu0 %v212_v48  ;;  %v309_v47 = vld [vmem:[%s5631_s20 + $0x750] sm:$0xff]  ;;  %v244_v48 = vld [vmem:[%s5631_s20 + $0x548] sm:$0xff] }
  0x65   :  { %596 = vmatprep.subr.mxu1 %v276_v49  ;;  %520 = vmatpush1.msra.mxu0 %v211_v50  ;;  %v308_v49 = vld [vmem:[%s5631_s20 + $0x748] sm:$0xff]  ;;  %v243_v50 = vld [vmem:[%s5631_s20 + $0x540] sm:$0xff] }
  0x66   :  { %597 = vmatpush1.msra.mxu1 %v275_v51  ;;  %521 = vmatprep.subr.mxu0 %v210_v52  ;;  %v307_v51 = vld [vmem:[%s5631_s20 + $0x740] sm:$0xff]  ;;  %v242_v52 = vld [vmem:[%s5631_s20 + $0x538] sm:$0xff] }
  0x67   :  { %598 = vmatprep.subr.mxu1 %v274_v53  ;;  %522 = vmatpush1.msra.mxu0 %v209_v54  ;;  %v306_v53 = vld [vmem:[%s5631_s20 + $0x738] sm:$0xff]  ;;  %v68_v54 = vld [vmem:[%s5633_s5 + $0x8] sm:$0xff] }
  0x68   :  { %599 = vmatpush1.msra.mxu1 %v273_v55  ;;  %523 = vmatprep.subr.mxu0 %v208_v56  ;;  %v241_v55 = vld [vmem:[%s5631_s20 + $0x530] sm:$0xff] }
  0x69   :  { %600 = vmatprep.subr.mxu1 %v272_v57  ;;  %524 = vmatpush1.msra.mxu0 %v207_v58  ;;  %v305_v56 = vld [vmem:[%s5631_s20 + $0x730] sm:$0xff]  ;;  %v67_v57 = vld [vmem:[%s5633_s5] sm:$0xff]  ;;  %v240_v58 = vld [vmem:[%s5631_s20 + $0x528] sm:$0xff] }
  0x6a   :  { %601 = vmatpush1.msra.mxu1 %v271_v59  ;;  %525 = vmatprep.subr.mxu0 %v206_v60  ;;  %v304_v59 = vld [vmem:[%s5631_s20 + $0x728] sm:$0xff]  ;;  %v70_v60 = vld [vmem:[%s5633_s5 + $0x18] sm:$0xff] }
  0x6b   :  { %602 = vmatprep.subr.mxu1 %v270_v61  ;;  %526 = vmatpush1.msra.mxu0 %v205_v62  ;;  %v239_v61 = vld [vmem:[%s5631_s20 + $0x520] sm:$0xff] }
  0x6c   :  { %603 = vmatpush1.msra.mxu1 %v269_v63  ;;  %527 = vmatprep.subr.mxu0 %v204_v0  ;;  %v303_v62 = vld [vmem:[%s5631_s20 + $0x720] sm:$0xff]  ;;  %v238_v63 = vld [vmem:[%s5631_s20 + $0x518] sm:$0xff]  ;;  %v69_v0 = vld [vmem:[%s5633_s5 + $0x10] sm:$0xff] }
  0x6d   :  { %604 = vmatprep.subr.mxu1 %v268_v1  ;;  %528 = vmatpush1.msra.mxu0 %v203_v2  ;;  %v302_v1 = vld [vmem:[%s5631_s20 + $0x718] sm:$0xff]  ;;  %v237_v2 = vld [vmem:[%s5631_s20 + $0x510] sm:$0xff] }
  0x6e   :  { %605 = vmatpush1.msra.mxu1 %v267_v3  ;;  %529 = vmatprep.subr.mxu0 %v266_v4  ;;  %v301_v3 = vld [vmem:[%s5631_s20 + $0x710] sm:$0xff]  ;;  %v236_v4 = vld [vmem:[%s5631_s20 + $0x508] sm:$0xff] }
  0x6f   :  { %606 = vmatprep.subr.mxu1 %v330_v5  ;;  %530 = vmatpush2.msra.mxu0 %v265_v6  ;;  %v300_v5 = vld [vmem:[%s5631_s20 + $0x708] sm:$0xff]  ;;  %v235_v6 = vld [vmem:[%s5631_s20 + $0x500] sm:$0xff] }
  0x70   :  { %607 = vmatpush2.msra.mxu1 %v329_v7  ;;  %531 = vmatprep.subr.mxu0 %v264_v8  ;;  %v64_v7 = vld [vmem:[%s5632_s22 + $0x28] sm:$0xff]  ;;  %v299_v8 = vld [vmem:[%s5631_s20 + $0x700] sm:$0xff] }
  0x71   :  { %608 = vmatprep.subr.mxu1 %v328_v9  ;;  %532 = vmatpush2.msra.mxu0 %v263_v10  ;;  %v66_v9 = vld [vmem:[%s5632_s22 + $0x38] sm:$0xff]  ;;  %v63_v10 = vld [vmem:[%s5632_s22 + $0x20] sm:$0xff] }
  0x72   :  { %609 = vmatpush2.msra.mxu1 %v327_v11  ;;  %533 = vmatprep.subr.mxu0 %v262_v12  ;;  %v65_v11 = vld [vmem:[%s5632_s22 + $0x30] sm:$0xff]  ;;  %v72_v12 = vld [vmem:[%s5633_s5 + $0x28] sm:$0xff] }
  0x73   :  { %610 = vmatprep.subr.mxu1 %v326_v13  ;;  %534 = vmatpush2.msra.mxu0 %v261_v14  ;;  %v74_v13 = vld [vmem:[%s5633_s5 + $0x38] sm:$0xff]  ;;  %v71_v14 = vld [vmem:[%s5633_s5 + $0x20] sm:$0xff] }
  0x74   :  { %611 = vmatpush2.msra.mxu1 %v325_v15  ;;  %535 = vmatprep.subr.mxu0 %v260_v16  ;;  %v73_v15 = vld [vmem:[%s5633_s5 + $0x30] sm:$0xff]  ;;  %v686_v16 = vld [vmem:[%s5634_s28 + $0xf8] sm:$0xff] }
  0x75   :  { %612 = vmatprep.subr.mxu1 %v324_v17  ;;  %536 = vmatpush2.msra.mxu0 %v259_v18  ;;  %v685_v17 = vld [vmem:[%s5634_s28 + $0xf0] sm:$0xff]  ;;  %v684_v18 = vld [vmem:[%s5634_s28 + $0xe8] sm:$0xff] }
  0x76   :  { %613 = vmatpush2.msra.mxu1 %v323_v19  ;;  %537 = vmatprep.subr.mxu0 %v258_v20  ;;  %v683_v19 = vld [vmem:[%s5634_s28 + $0xe0] sm:$0xff]  ;;  %v682_v20 = vld [vmem:[%s5634_s28 + $0xd8] sm:$0xff] }
  0x77   :  { %614 = vmatprep.subr.mxu1 %v322_v21  ;;  %538 = vmatpush2.msra.mxu0 %v257_v22  ;;  %v681_v21 = vld [vmem:[%s5634_s28 + $0xd0] sm:$0xff]  ;;  %v680_v22 = vld [vmem:[%s5634_s28 + $0xc8] sm:$0xff] }
  0x78   :  { %615 = vmatpush2.msra.mxu1 %v321_v23  ;;  %539 = vmatprep.subr.mxu0 %v256_v24  ;;  %v679_v23 = vld [vmem:[%s5634_s28 + $0xc0] sm:$0xff]  ;;  %v678_v24 = vld [vmem:[%s5634_s28 + $0xb8] sm:$0xff] }
  0x79   :  { %616 = vmatprep.subr.mxu1 %v320_v25  ;;  %540 = vmatpush2.msra.mxu0 %v255_v26  ;;  %v677_v25 = vld [vmem:[%s5634_s28 + $0xb0] sm:$0xff]  ;;  %v676_v26 = vld [vmem:[%s5634_s28 + $0xa8] sm:$0xff] }
  0x7a   :  { %617 = vmatpush2.msra.mxu1 %v319_v27  ;;  %541 = vmatprep.subr.mxu0 %v254_v28  ;;  %v675_v27 = vld [vmem:[%s5634_s28 + $0xa0] sm:$0xff]  ;;  %v674_v28 = vld [vmem:[%s5634_s28 + $0x98] sm:$0xff] }
  0x7b   :  { %618 = vmatprep.subr.mxu1 %v318_v29  ;;  %542 = vmatpush2.msra.mxu0 %v253_v30  ;;  %v673_v29 = vld [vmem:[%s5634_s28 + $0x90] sm:$0xff]  ;;  %v672_v30 = vld [vmem:[%s5634_s28 + $0x88] sm:$0xff] }
  0x7c   :  { %619 = vmatpush2.msra.mxu1 %v317_v31  ;;  %543 = vmatprep.subr.mxu0 %v252_v32  ;;  %v671_v31 = vld [vmem:[%s5634_s28 + $0x80] sm:$0xff]  ;;  %v670_v32 = vld [vmem:[%s5634_s28 + $0x78] sm:$0xff] }
  0x7d   :  { %620 = vmatprep.subr.mxu1 %v316_v33  ;;  %544 = vmatpush2.msra.mxu0 %v251_v34  ;;  %v669_v33 = vld [vmem:[%s5634_s28 + $0x70] sm:$0xff]  ;;  %v668_v34 = vld [vmem:[%s5634_s28 + $0x68] sm:$0xff] }
  0x7e   :  { %621 = vmatpush2.msra.mxu1 %v315_v35  ;;  %545 = vmatprep.subr.mxu0 %v250_v36  ;;  %v667_v35 = vld [vmem:[%s5634_s28 + $0x60] sm:$0xff]  ;;  %v666_v36 = vld [vmem:[%s5634_s28 + $0x58] sm:$0xff] }
  0x7f   :  { %622 = vmatprep.subr.mxu1 %v314_v37  ;;  %546 = vmatpush2.msra.mxu0 %v249_v38  ;;  %v665_v37 = vld [vmem:[%s5634_s28 + $0x50] sm:$0xff]  ;;  %v664_v38 = vld [vmem:[%s5634_s28 + $0x48] sm:$0xff] }
  0x80   :  { %623 = vmatpush2.msra.mxu1 %v313_v39  ;;  %547 = vmatprep.subr.mxu0 %v248_v40  ;;  %v663_v39 = vld [vmem:[%s5634_s28 + $0x40] sm:$0xff]  ;;  %v662_v40 = vld [vmem:[%s5634_s28 + $0x38] sm:$0xff] }
  0x81   :  { %624 = vmatprep.subr.mxu1 %v312_v41  ;;  %548 = vmatpush2.msra.mxu0 %v247_v42  ;;  %v661_v41 = vld [vmem:[%s5634_s28 + $0x30] sm:$0xff]  ;;  %v660_v42 = vld [vmem:[%s5634_s28 + $0x28] sm:$0xff] }
  0x82   :  { %625 = vmatpush2.msra.mxu1 %v311_v43  ;;  %549 = vmatprep.subr.mxu0 %v246_v44  ;;  %v659_v43 = vld [vmem:[%s5634_s28 + $0x20] sm:$0xff]  ;;  %v658_v44 = vld [vmem:[%s5634_s28 + $0x18] sm:$0xff] }
  0x83   :  { %626 = vmatprep.subr.mxu1 %v310_v45  ;;  %550 = vmatpush2.msra.mxu0 %v245_v46  ;;  %v657_v45 = vld [vmem:[%s5634_s28 + $0x10] sm:$0xff]  ;;  %v656_v46 = vld [vmem:[%s5634_s28 + $0x8] sm:$0xff] }
  0x84   :  { %627 = vmatpush2.msra.mxu1 %v309_v47  ;;  %551 = vmatprep.subr.mxu0 %v244_v48  ;;  %v655_v47 = vld [vmem:[%s5634_s28] sm:$0xff]  ;;  %v718_v48 = vld [vmem:[%s5634_s28 + $0x1f8] sm:$0xff] }
  0x85   :  { %628 = vmatprep.subr.mxu1 %v308_v49  ;;  %552 = vmatpush2.msra.mxu0 %v243_v50  ;;  %v717_v49 = vld [vmem:[%s5634_s28 + $0x1f0] sm:$0xff]  ;;  %v716_v50 = vld [vmem:[%s5634_s28 + $0x1e8] sm:$0xff] }
  0x86   :  { %629 = vmatpush2.msra.mxu1 %v307_v51  ;;  %553 = vmatprep.subr.mxu0 %v242_v52  ;;  %v715_v51 = vld [vmem:[%s5634_s28 + $0x1e0] sm:$0xff]  ;;  %v714_v52 = vld [vmem:[%s5634_s28 + $0x1d8] sm:$0xff] }
  0x87   :  { %630 = vmatprep.subr.mxu1 %v306_v53  ;;  %413 = vmatprep.mubr.f32.mxu0 %v68_v54  ;;  %v713_v53 = vld [vmem:[%s5634_s28 + $0x1d0] sm:$0xff]  ;;  %v712_v54 = vld [vmem:[%s5634_s28 + $0x1c8] sm:$0xff] }
  0x88   :  { %554 = vmatpush2.msra.mxu0 %v241_v55  ;;  %631 = vmatpush2.msra.mxu1 %v305_v56  ;;  %v711_v55 = vld [vmem:[%s5634_s28 + $0x1c0] sm:$0xff]  ;;  %v710_v56 = vld [vmem:[%s5634_s28 + $0x1b8] sm:$0xff] }
  0x89   :  { %414 = vmatmul.mubr.f32.gmra.mxu0 %v67_v57  ;;  %555 = vmatprep.subr.mxu0 %v240_v58  ;;  %v709_v57 = vld [vmem:[%s5634_s28 + $0x1b0] sm:$0xff]  ;;  %v708_v58 = vld [vmem:[%s5634_s28 + $0x1a8] sm:$0xff] }
  0x8a   :  { %632 = vmatprep.subr.mxu1 %v304_v59  ;;  %490 = vmatprep.mubr.f32.mxu1 %v70_v60  ;;  %v707_v59 = vld [vmem:[%s5634_s28 + $0x1a0] sm:$0xff]  ;;  %v706_v60 = vld [vmem:[%s5634_s28 + $0x198] sm:$0xff] }
  0x8b   :  { %556 = vmatpush2.msra.mxu0 %v239_v61  ;;  %633 = vmatpush2.msra.mxu1 %v303_v62  ;;  %v705_v61 = vld [vmem:[%s5634_s28 + $0x190] sm:$0xff]  ;;  %v704_v62 = vld [vmem:[%s5634_s28 + $0x188] sm:$0xff] }
  0x8c   :  { %557 = vmatprep.subr.mxu0 %v238_v63  ;;  %491 = vmatmul.mubr.f32.gmra.mxu1 %v69_v0  ;;  %v703_v63 = vld [vmem:[%s5634_s28 + $0x180] sm:$0xff]  ;;  %v702_v0 = vld [vmem:[%s5634_s28 + $0x178] sm:$0xff] }
  0x8d   :  { %634 = vmatprep.subr.mxu1 %v302_v1  ;;  %558 = vmatpush2.msra.mxu0 %v237_v2  ;;  %v701_v1 = vld [vmem:[%s5634_s28 + $0x170] sm:$0xff]  ;;  %v700_v2 = vld [vmem:[%s5634_s28 + $0x168] sm:$0xff] }
  0x8e   :  { %635 = vmatpush2.msra.mxu1 %v301_v3  ;;  %559 = vmatprep.subr.mxu0 %v236_v4  ;;  %v699_v3 = vld [vmem:[%s5634_s28 + $0x160] sm:$0xff]  ;;  %v698_v4 = vld [vmem:[%s5634_s28 + $0x158] sm:$0xff] }
  0x8f   :  { %636 = vmatprep.subr.mxu1 %v300_v5  ;;  %560 = vmatpush2.msra.mxu0 %v235_v6  ;;  %v697_v5 = vld [vmem:[%s5634_s28 + $0x150] sm:$0xff]  ;;  %v696_v6 = vld [vmem:[%s5634_s28 + $0x148] sm:$0xff] }
  0x90   :  { %561 = vmatprep.mubr.f32.mxu0 %v64_v7  ;;  %637 = vmatpush2.msra.mxu1 %v299_v8  ;;  %v695_v7 = vld [vmem:[%s5634_s28 + $0x140] sm:$0xff]  ;;  %v694_v8 = vld [vmem:[%s5634_s28 + $0x138] sm:$0xff] }
  0x91   :  { %638 = vmatprep.mubr.f32.mxu1 %v66_v9  ;;  %562 = vmatmul.mubr.f32.vlgmr.msra.gmra.mxu0 %v63_v10  ;;  %v693_v9 = vld [vmem:[%s5634_s28 + $0x130] sm:$0xff]  ;;  %v692_v10 = vld [vmem:[%s5634_s28 + $0x128] sm:$0xff] }
  0x92   :  { %639 = vmatmul.mubr.f32.vlgmr.msra.gmra.mxu1 %v65_v11  ;;  %567 = vmatprep.mubr.f32.mxu0 %v72_v12  ;;  %v691_v11 = vld [vmem:[%s5634_s28 + $0x120] sm:$0xff]  ;;  %v690_v12 = vld [vmem:[%s5634_s28 + $0x118] sm:$0xff] }
  0x93   :  { %644 = vmatprep.mubr.f32.mxu1 %v74_v13  ;;  %731 = vmatprep.subr.mxu0 %v686_v16  ;;  %v689_v13 = vld [vmem:[%s5634_s28 + $0x110] sm:$0xff]  ;;  %v1001_v16 = vld [vmem:[%s5607_s8 + $0x1e8] sm:$0xff] }
  0x94   :  { %732 = vmatpush1.msra.mxu0 %v685_v17  ;;  %v1003_v17 = vld [vmem:[%s5607_s8 + $0x1f8] sm:$0xff]  ;;  %1068 = vmatprep.subr.mxu1 %v1001_v16 }
  0x95   :  { %568 = vmatmul.mubr.f32.gmra.mxu0 %v71_v14  ;;  %733 = vmatprep.subr.mxu0 %v684_v18  ;;  %v688_v14 = vld [vmem:[%s5634_s28 + $0x108] sm:$0xff]  ;;  %v1000_v18 = vld [vmem:[%s5607_s8 + $0x1e0] sm:$0xff] }
  0x96   :  { %645 = vmatmul.mubr.f32.gmra.mxu1 %v73_v15  ;;  %734 = vmatpush1.msra.mxu0 %v683_v19  ;;  %v687_v15 = vld [vmem:[%s5634_s28 + $0x100] sm:$0xff]  ;;  %v997_v19 = vld [vmem:[%s5607_s8 + $0x1c8] sm:$0xff] }
  0x97   :  { %735 = vmatprep.subr.mxu0 %v682_v20  ;;  %1069 = vmatpush1.msra.mxu1 %v1000_v18  ;;  %v996_v20 = vld [vmem:[%s5607_s8 + $0x1c0] sm:$0xff] }
  0x98   :  { %736 = vmatpush1.msra.mxu0 %v681_v21  ;;  %v993_v21 = vld [vmem:[%s5607_s8 + $0x1a8] sm:$0xff]  ;;  %1070 = vmatprep.subr.mxu1 %v997_v19 }
  0x99   :  { %737 = vmatprep.subr.mxu0 %v680_v22  ;;  %v992_v22 = vld [vmem:[%s5607_s8 + $0x1a0] sm:$0xff]  ;;  %1071 = vmatpush1.msra.mxu1 %v996_v20 }
  0x9a   :  { %738 = vmatpush1.msra.mxu0 %v679_v23  ;;  %v989_v23 = vld [vmem:[%s5607_s8 + $0x188] sm:$0xff]  ;;  %1072 = vmatprep.subr.mxu1 %v993_v21 }
  0x9b   :  { %739 = vmatprep.subr.mxu0 %v678_v24  ;;  %v988_v24 = vld [vmem:[%s5607_s8 + $0x180] sm:$0xff]  ;;  %1073 = vmatpush1.msra.mxu1 %v992_v22 }
  0x9c   :  { %740 = vmatpush1.msra.mxu0 %v677_v25  ;;  %v985_v25 = vld [vmem:[%s5607_s8 + $0x168] sm:$0xff]  ;;  %1074 = vmatprep.subr.mxu1 %v989_v23 }
  0x9d   :  { %741 = vmatprep.subr.mxu0 %v676_v26  ;;  %v984_v26 = vld [vmem:[%s5607_s8 + $0x160] sm:$0xff]  ;;  %1075 = vmatpush1.msra.mxu1 %v988_v24 }
  0x9e   :  { %742 = vmatpush1.msra.mxu0 %v675_v27  ;;  %v981_v27 = vld [vmem:[%s5607_s8 + $0x148] sm:$0xff]  ;;  %1076 = vmatprep.subr.mxu1 %v985_v25 }
  0x9f   :  { %743 = vmatprep.subr.mxu0 %v674_v28  ;;  %v980_v28 = vld [vmem:[%s5607_s8 + $0x140] sm:$0xff]  ;;  %1077 = vmatpush1.msra.mxu1 %v984_v26 }
  0xa0   :  { %744 = vmatpush1.msra.mxu0 %v673_v29  ;;  %v977_v29 = vld [vmem:[%s5607_s8 + $0x128] sm:$0xff]  ;;  %1078 = vmatprep.subr.mxu1 %v981_v27 }
  0xa1   :  { %745 = vmatprep.subr.mxu0 %v672_v30  ;;  %v976_v30 = vld [vmem:[%s5607_s8 + $0x120] sm:$0xff]  ;;  %1079 = vmatpush1.msra.mxu1 %v980_v28 }
  0xa2   :  { %746 = vmatpush1.msra.mxu0 %v671_v31  ;;  %v973_v31 = vld [vmem:[%s5607_s8 + $0x108] sm:$0xff]  ;;  %1080 = vmatprep.subr.mxu1 %v977_v29 }
  0xa3   :  { %747 = vmatprep.subr.mxu0 %v670_v32  ;;  %v972_v32 = vld [vmem:[%s5607_s8 + $0x100] sm:$0xff]  ;;  %1081 = vmatpush1.msra.mxu1 %v976_v30 }
  0xa4   :  { %748 = vmatpush1.msra.mxu0 %v669_v33  ;;  %v969_v33 = vld [vmem:[%s5607_s8 + $0xe8] sm:$0xff]  ;;  %1082 = vmatprep.subr.mxu1 %v973_v31 }
  0xa5   :  { %749 = vmatprep.subr.mxu0 %v668_v34  ;;  %v968_v34 = vld [vmem:[%s5607_s8 + $0xe0] sm:$0xff]  ;;  %1083 = vmatpush1.msra.mxu1 %v972_v32 }
  0xa6   :  { %750 = vmatpush1.msra.mxu0 %v667_v35  ;;  %v965_v35 = vld [vmem:[%s5607_s8 + $0xc8] sm:$0xff]  ;;  %1084 = vmatprep.subr.mxu1 %v969_v33 }
  0xa7   :  { %751 = vmatprep.subr.mxu0 %v666_v36  ;;  %v964_v36 = vld [vmem:[%s5607_s8 + $0xc0] sm:$0xff]  ;;  %1085 = vmatpush1.msra.mxu1 %v968_v34 }
  0xa8   :  { %752 = vmatpush1.msra.mxu0 %v665_v37  ;;  %v961_v37 = vld [vmem:[%s5607_s8 + $0xa8] sm:$0xff]  ;;  %1086 = vmatprep.subr.mxu1 %v965_v35 }
  0xa9   :  { %753 = vmatprep.subr.mxu0 %v664_v38  ;;  %v960_v38 = vld [vmem:[%s5607_s8 + $0xa0] sm:$0xff]  ;;  %1087 = vmatpush1.msra.mxu1 %v964_v36 }
  0xaa   :  { %754 = vmatpush1.msra.mxu0 %v663_v39  ;;  %v957_v39 = vld [vmem:[%s5607_s8 + $0x88] sm:$0xff]  ;;  %1088 = vmatprep.subr.mxu1 %v961_v37 }
  0xab   :  { %755 = vmatprep.subr.mxu0 %v662_v40  ;;  %v956_v40 = vld [vmem:[%s5607_s8 + $0x80] sm:$0xff]  ;;  %1089 = vmatpush1.msra.mxu1 %v960_v38 }
  0xac   :  { %756 = vmatpush1.msra.mxu0 %v661_v41  ;;  %v953_v41 = vld [vmem:[%s5607_s8 + $0x68] sm:$0xff]  ;;  %1090 = vmatprep.subr.mxu1 %v957_v39 }
  0xad   :  { %757 = vmatprep.subr.mxu0 %v660_v42  ;;  %v952_v42 = vld [vmem:[%s5607_s8 + $0x60] sm:$0xff]  ;;  %1091 = vmatpush1.msra.mxu1 %v956_v40 }
  0xae   :  { %758 = vmatpush1.msra.mxu0 %v659_v43  ;;  %v949_v43 = vld [vmem:[%s5607_s8 + $0x48] sm:$0xff]  ;;  %1092 = vmatprep.subr.mxu1 %v953_v41 }
  0xaf   :  { %759 = vmatprep.subr.mxu0 %v658_v44  ;;  %v948_v44 = vld [vmem:[%s5607_s8 + $0x40] sm:$0xff]  ;;  %1093 = vmatpush1.msra.mxu1 %v952_v42 }
  0xb0   :  { %760 = vmatpush1.msra.mxu0 %v657_v45  ;;  %v945_v45 = vld [vmem:[%s5607_s8 + $0x28] sm:$0xff]  ;;  %1094 = vmatprep.subr.mxu1 %v949_v43 }
  0xb1   :  { %761 = vmatprep.subr.mxu0 %v656_v46  ;;  %v944_v46 = vld [vmem:[%s5607_s8 + $0x20] sm:$0xff]  ;;  %1095 = vmatpush1.msra.mxu1 %v948_v44 }
  0xb2   :  { %762 = vmatpush1.msra.mxu0 %v655_v47  ;;  %v941_v47 = vld [vmem:[%s5607_s8 + $0x8] sm:$0xff]  ;;  %1096 = vmatprep.subr.mxu1 %v945_v45 }
  0xb3   :  { %763 = vmatprep.subr.mxu0 %v718_v48  ;;  %v940_v48 = vld [vmem:[%s5607_s8] sm:$0xff]  ;;  %1097 = vmatpush1.msra.mxu1 %v944_v46  ;;  %v1002_v46 = vld [vmem:[%s5607_s8 + $0x1f0] sm:$0xff] }
  0xb4   :  { %764 = vmatpush2.msra.mxu0 %v717_v49  ;;  %v1065_v49 = vld [vmem:[%s5607_s8 + $0x3e8] sm:$0xff]  ;;  %1098 = vmatprep.subr.mxu1 %v941_v47 }
  0xb5   :  { %765 = vmatprep.subr.mxu0 %v716_v50  ;;  %v1064_v50 = vld [vmem:[%s5607_s8 + $0x3e0] sm:$0xff]  ;;  %1099 = vmatpush1.msra.mxu1 %v940_v48  ;;  %v999_v48 = vld [vmem:[%s5607_s8 + $0x1d8] sm:$0xff] }
  0xb6   :  { %766 = vmatpush2.msra.mxu0 %v715_v51  ;;  %v1061_v51 = vld [vmem:[%s5607_s8 + $0x3c8] sm:$0xff]  ;;  %1100 = vmatprep.subr.mxu1 %v1065_v49  ;;  %v998_v49 = vld [vmem:[%s5607_s8 + $0x1d0] sm:$0xff] }
  0xb7   :  { %767 = vmatprep.subr.mxu0 %v714_v52  ;;  %v1060_v52 = vld [vmem:[%s5607_s8 + $0x3c0] sm:$0xff]  ;;  %1101 = vmatpush2.msra.mxu1 %v1064_v50 }
  0xb8   :  { %768 = vmatpush2.msra.mxu0 %v713_v53  ;;  %v1057_v53 = vld [vmem:[%s5607_s8 + $0x3a8] sm:$0xff]  ;;  %1102 = vmatprep.subr.mxu1 %v1061_v51  ;;  %v995_v51 = vld [vmem:[%s5607_s8 + $0x1b8] sm:$0xff] }
  0xb9   :  { %769 = vmatprep.subr.mxu0 %v712_v54  ;;  %v1056_v54 = vld [vmem:[%s5607_s8 + $0x3a0] sm:$0xff]  ;;  %1103 = vmatpush2.msra.mxu1 %v1060_v52 }
  0xba   :  { %770 = vmatpush2.msra.mxu0 %v711_v55  ;;  %v1053_v55 = vld [vmem:[%s5607_s8 + $0x388] sm:$0xff]  ;;  %1104 = vmatprep.subr.mxu1 %v1057_v53  ;;  %v994_v53 = vld [vmem:[%s5607_s8 + $0x1b0] sm:$0xff] }
  0xbb   :  { %771 = vmatprep.subr.mxu0 %v710_v56  ;;  %v1052_v56 = vld [vmem:[%s5607_s8 + $0x380] sm:$0xff]  ;;  %1105 = vmatpush2.msra.mxu1 %v1056_v54  ;;  %v991_v54 = vld [vmem:[%s5607_s8 + $0x198] sm:$0xff] }
  0xbc   :  { %772 = vmatpush2.msra.mxu0 %v709_v57  ;;  %v1049_v57 = vld [vmem:[%s5607_s8 + $0x368] sm:$0xff]  ;;  %1106 = vmatprep.subr.mxu1 %v1053_v55  ;;  %v990_v55 = vld [vmem:[%s5607_s8 + $0x190] sm:$0xff] }
  0xbd   :  { %773 = vmatprep.subr.mxu0 %v708_v58  ;;  %v1048_v58 = vld [vmem:[%s5607_s8 + $0x360] sm:$0xff]  ;;  %1107 = vmatpush2.msra.mxu1 %v1052_v56  ;;  %v987_v56 = vld [vmem:[%s5607_s8 + $0x178] sm:$0xff] }
  0xbe   :  { %774 = vmatpush2.msra.mxu0 %v707_v59  ;;  %v1045_v59 = vld [vmem:[%s5607_s8 + $0x348] sm:$0xff]  ;;  %1108 = vmatprep.subr.mxu1 %v1049_v57  ;;  %v986_v57 = vld [vmem:[%s5607_s8 + $0x170] sm:$0xff] }
  0xbf   :  { %775 = vmatprep.subr.mxu0 %v706_v60  ;;  %v1044_v60 = vld [vmem:[%s5607_s8 + $0x340] sm:$0xff]  ;;  %1109 = vmatpush2.msra.mxu1 %v1048_v58  ;;  %v983_v58 = vld [vmem:[%s5607_s8 + $0x158] sm:$0xff] }
  0xc0   :  { %776 = vmatpush2.msra.mxu0 %v705_v61  ;;  %v1041_v61 = vld [vmem:[%s5607_s8 + $0x328] sm:$0xff]  ;;  %1110 = vmatprep.subr.mxu1 %v1045_v59  ;;  %v982_v59 = vld [vmem:[%s5607_s8 + $0x150] sm:$0xff] }
  0xc1   :  { %777 = vmatprep.subr.mxu0 %v704_v62  ;;  %v1040_v62 = vld [vmem:[%s5607_s8 + $0x320] sm:$0xff]  ;;  %1111 = vmatpush2.msra.mxu1 %v1044_v60  ;;  %v979_v60 = vld [vmem:[%s5607_s8 + $0x138] sm:$0xff] }
  0xc2   :  { %778 = vmatpush2.msra.mxu0 %v703_v63  ;;  %v1037_v63 = vld [vmem:[%s5607_s8 + $0x308] sm:$0xff]  ;;  %1112 = vmatprep.subr.mxu1 %v1041_v61  ;;  %v978_v61 = vld [vmem:[%s5607_s8 + $0x130] sm:$0xff] }
  0xc3   :  { %779 = vmatprep.subr.mxu0 %v702_v0  ;;  %v1036_v0 = vld [vmem:[%s5607_s8 + $0x300] sm:$0xff]  ;;  %1113 = vmatpush2.msra.mxu1 %v1040_v62  ;;  %v975_v62 = vld [vmem:[%s5607_s8 + $0x118] sm:$0xff] }
  0xc4   :  { %780 = vmatpush2.msra.mxu0 %v701_v1  ;;  %v1033_v1 = vld [vmem:[%s5607_s8 + $0x2e8] sm:$0xff]  ;;  %1114 = vmatprep.subr.mxu1 %v1037_v63  ;;  %v974_v63 = vld [vmem:[%s5607_s8 + $0x110] sm:$0xff] }
  0xc5   :  { %781 = vmatprep.subr.mxu0 %v700_v2  ;;  %v1032_v2 = vld [vmem:[%s5607_s8 + $0x2e0] sm:$0xff]  ;;  %1115 = vmatpush2.msra.mxu1 %v1036_v0  ;;  %v971_v0 = vld [vmem:[%s5607_s8 + $0xf8] sm:$0xff] }
  0xc6   :  { %782 = vmatpush2.msra.mxu0 %v699_v3  ;;  %v1029_v3 = vld [vmem:[%s5607_s8 + $0x2c8] sm:$0xff]  ;;  %1116 = vmatprep.subr.mxu1 %v1033_v1  ;;  %v970_v1 = vld [vmem:[%s5607_s8 + $0xf0] sm:$0xff] }
  0xc7   :  { %783 = vmatprep.subr.mxu0 %v698_v4  ;;  %v1028_v4 = vld [vmem:[%s5607_s8 + $0x2c0] sm:$0xff]  ;;  %1117 = vmatpush2.msra.mxu1 %v1032_v2  ;;  %v967_v2 = vld [vmem:[%s5607_s8 + $0xd8] sm:$0xff] }
  0xc8   :  { %784 = vmatpush2.msra.mxu0 %v697_v5  ;;  %v1025_v5 = vld [vmem:[%s5607_s8 + $0x2a8] sm:$0xff]  ;;  %1118 = vmatprep.subr.mxu1 %v1029_v3  ;;  %v966_v3 = vld [vmem:[%s5607_s8 + $0xd0] sm:$0xff] }
  0xc9   :  { %785 = vmatprep.subr.mxu0 %v696_v6  ;;  %1119 = vmatpush2.msra.mxu1 %v1028_v4  ;;  %v333_v6 = vlaneseq  ;;  %v963_v4 = vld [vmem:[%s5607_s8 + $0xb8] sm:$0xff] }
  0xca   :  { %786 = vmatpush2.msra.mxu0 %v695_v7  ;;  %1120 = vmatprep.subr.mxu1 %v1025_v5  ;;  %v962_v5 = vld [vmem:[%s5607_s8 + $0xb0] sm:$0xff] }
  0xcb   :  { %787 = vmatprep.subr.mxu0 %v694_v8  ;;  %v3742_v7 = vshrl.u32 %v333_v6, 7  ;;  %v959_v6 = vld [vmem:[%s5607_s8 + $0x98] sm:$0xff] }
  0xcc   :  { %788 = vmatpush2.msra.mxu0 %v693_v9  ;;  %v331_v9 = vld [vmem:[%s5608_s4] sm:$0x3] }
  0xcd   :  { %789 = vmatprep.subr.mxu0 %v692_v10  ;;  %v3745_v8 = vsub.s32 0, %v3742_v7 }
  0xce   :  { %790 = vmatpush2.msra.mxu0 %v691_v11 }
  0xcf   :  { %791 = vmatprep.subr.mxu0 %v690_v12  ;;  %v3751_v12 = vsub.s32 1, %v3742_v7 }
  0xd0   :  { %792 = vmatpush2.msra.mxu0 %v689_v13  ;;  %v336_v13 = vrot.slane %v331_v9, %v3745_v8 }
  0xd1   :  { %793 = vmatprep.subr.mxu0 %v688_v14 }
  0xd2   :  { %794 = vmatpush2.msra.mxu0 %v687_v15  ;;  %v340_v15 = vrot.slane %v331_v9, %v3751_v12  ;;  %v958_v9 = vld [vmem:[%s5607_s8 + $0x90] sm:$0xff] }
  0xd3   :  { %1139 = vmatprep.subr.mxu0 %v1003_v17 }
 0x10d   :  { %v409_v10 = vpop.f32.mrf.mxu0 }
 0x10e   :  { %v410_v18 = vadd.f32 %v409_v10, %v336_v13  ;;  %v955_v10 = vld [vmem:[%s5607_s8 + $0x78] sm:$0xff] }
 0x10f   :  { %v486_v11 = vpop.f32.mrf.mxu1  ;;  %v411_v14 = vpop.f32.mrf.mxu0 }
 0x110   :  { %v412_v20 = vadd.f32 %v411_v14, %v340_v15  ;;  %v487_v23 = vadd.f32 %v486_v11, %v410_v18  ;;  %v954_v11 = vld [vmem:[%s5607_s8 + $0x70] sm:$0xff] }
 0x111   :  { %v488_v16 = vpop.f32.mrf.mxu1  ;;  %v950_v14 = vld [vmem:[%s5607_s8 + $0x50] sm:$0xff] }
 0x112   :  { %v489_v27 = vadd.f32 %v488_v16, %v412_v20  ;;  %v946_v16 = vld [vmem:[%s5607_s8 + $0x30] sm:$0xff] }
 0x113   :  { %v942_v18 = vld [vmem:[%s5607_s8 + $0x10] sm:$0xff] }
 0x114   :  { %v1066_v20 = vld [vmem:[%s5607_s8 + $0x3f0] sm:$0xff] }
 0x149   :  { %v415_v17 = vpop.f32.mrf.mxu0 }
 0x14a   :  { %v416_v24 = vadd.f32 %v415_v17, %v336_v13  ;;  %v951_v13 = vld [vmem:[%s5607_s8 + $0x58] sm:$0xff] }
 0x14b   :  { %v417_v22 = vpop.f32.mrf.mxu0  ;;  %v943_v17 = vld [vmem:[%s5607_s8 + $0x18] sm:$0xff] }
 0x14c   :  { %v492_v19 = vpop.f32.mrf.mxu1  ;;  %v418_v28 = vadd.f32 %v417_v22, %v340_v15  ;;  %v947_v15 = vld [vmem:[%s5607_s8 + $0x38] sm:$0xff]  ;;  %v1062_v22 = vld [vmem:[%s5607_s8 + $0x3d0] sm:$0xff] }
 0x14d   :  { %v493_v32 = vadd.f32 %v492_v19, %v416_v24  ;;  %v1067_v19 = vld [vmem:[%s5607_s8 + $0x3f8] sm:$0xff]  ;;  %v1058_v24 = vld [vmem:[%s5607_s8 + $0x3b0] sm:$0xff] }
 0x14e   :  { %v494_v21 = vpop.f32.mrf.mxu1 }
 0x14f   :  { %v495_v37 = vadd.f32 %v494_v21, %v418_v28  ;;  %v1063_v21 = vld [vmem:[%s5607_s8 + $0x3d8] sm:$0xff]  ;;  %v1050_v28 = vld [vmem:[%s5607_s8 + $0x370] sm:$0xff] }
 0x151   :  { %v563_v25 = vpop.f32.mrf.mxu0 }
 0x152   :  { %v640_v26 = vpop.f32.mrf.mxu1  ;;  %v564_v29 = vadd.f32 %v563_v25, %v487_v23  ;;  %v1059_v23 = vld [vmem:[%s5607_s8 + $0x3b8] sm:$0xff] }
 0x153   :  { %v565_v30 = vpop.f32.mrf.mxu0  ;;  %v1055_v25 = vld [vmem:[%s5607_s8 + $0x398] sm:$0xff] }
 0x154   :  { %v642_v31 = vpop.f32.mrf.mxu1  ;;  %v566_v33 = vadd.f32 %v565_v30, %v489_v27  ;;  %v641_v34 = vadd.f32 %v640_v26, %v564_v29  ;;  %v1054_v26 = vld [vmem:[%s5607_s8 + $0x390] sm:$0xff]  ;;  %v1051_v27 = vld [vmem:[%s5607_s8 + $0x378] sm:$0xff] }
 0x155   :  { %v569_v35 = vpop.f32.mrf.mxu0  ;;  %v1047_v29 = vld [vmem:[%s5607_s8 + $0x358] sm:$0xff]  ;;  %v1046_v30 = vld [vmem:[%s5607_s8 + $0x350] sm:$0xff] }
 0x156   :  { %v646_v36 = vpop.f32.mrf.mxu1  ;;  %v643_v38 = vadd.f32 %v642_v31, %v566_v33  ;;  %v570_v39 = vadd.f32 %v569_v35, %v493_v32  ;;  %v651_v43 = vmax.f32 %v641_v34, 0.0  ;;  %v1043_v31 = vld [vmem:[%s5607_s8 + $0x338] sm:$0xff]  ;;  %v1042_v32 = vld [vmem:[%s5607_s8 + $0x330] sm:$0xff] }
 0x157   :  { %v571_v40 = vpop.f32.mrf.mxu0  ;;  %v1039_v33 = vld [vmem:[%s5607_s8 + $0x318] sm:$0xff]  ;;  %v1038_v34 = vld [vmem:[%s5607_s8 + $0x310] sm:$0xff] }
 0x158   :  { %v652_v41 = vmax.f32 %v643_v38, 0.0  ;;  %v572_v42 = vadd.f32 %v571_v40, %v495_v37  ;;  %v647_v44 = vadd.f32 %v646_v36, %v570_v39  ;;  %v648_v45 = vpop.f32.mrf.mxu1  ;;  %v1035_v35 = vld [vmem:[%s5607_s8 + $0x2f8] sm:$0xff]  ;;  %v1034_v36 = vld [vmem:[%s5607_s8 + $0x2f0] sm:$0xff]  ;;  %v1024_v40 = vld [vmem:[%s5607_s8 + $0x2a0] sm:$0xff] }
 0x159   :  { %v1031_v37 = vld [vmem:[%s5607_s8 + $0x2d8] sm:$0xff]  ;;  %v1030_v38 = vld [vmem:[%s5607_s8 + $0x2d0] sm:$0xff]  ;;  %1121 = vmatpush2.msra.mxu1 %v1024_v40 }
 0x15a   :  { %v649_v47 = vadd.f32 %v648_v45, %v572_v42  ;;  %795 = vmatprep.mubr.f32.mxu0 %v652_v41  ;;  %v653_v52 = vmax.f32 %v647_v44, 0.0  ;;  %v1027_v39 = vld [vmem:[%s5607_s8 + $0x2b8] sm:$0xff]  ;;  %v1026_v41 = vld [vmem:[%s5607_s8 + $0x2b0] sm:$0xff]  ;;  %v1021_v42 = vld [vmem:[%s5607_s8 + $0x288] sm:$0xff] }
 0x15b   :  { %796 = vmatmul.mubr.f32.vlgmr.msra.gmra.mxu0 %v651_v43  ;;  %v1023_v43 = vld [vmem:[%s5607_s8 + $0x298] sm:$0xff]  ;;  %1122 = vmatprep.subr.mxu1 %v1021_v42  ;;  %v1020_v44 = vld [vmem:[%s5607_s8 + $0x280] sm:$0xff]  ;;  %v1022_v45 = vld [vmem:[%s5607_s8 + $0x290] sm:$0xff] }
 0x15c   :  { %v654_v50 = vmax.f32 %v649_v47, 0.0  ;;  %1140 = vmatpush1.msra.mxu0 %v1002_v46  ;;  %1123 = vmatpush2.msra.mxu1 %v1020_v44  ;;  %v1017_v46 = vld [vmem:[%s5607_s8 + $0x268] sm:$0xff]  ;;  %v1019_v47 = vld [vmem:[%s5607_s8 + $0x278] sm:$0xff]  ;;  %v850_v42 = vld [vmem:[%s5609_s7 + $0x130] sm:$0xff] }
 0x15d   :  { %1141 = vmatprep.subr.mxu0 %v999_v48  ;;  %1124 = vmatprep.subr.mxu1 %v1017_v46  ;;  %v1016_v48 = vld [vmem:[%s5607_s8 + $0x260] sm:$0xff]  ;;  %v851_v40 = vld [vmem:[%s5609_s7 + $0x138] sm:$0xff]  ;;  %v846_v46 = vld [vmem:[%s5609_s7 + $0x110] sm:$0xff] }
 0x15e   :  { %801 = vmatprep.mubr.f32.mxu0 %v654_v50  ;;  %1142 = vmatpush1.msra.mxu0 %v998_v49  ;;  %v1018_v49 = vld [vmem:[%s5607_s8 + $0x270] sm:$0xff]  ;;  %v1013_v50 = vld [vmem:[%s5607_s8 + $0x248] sm:$0xff]  ;;  %v847_v44 = vld [vmem:[%s5609_s7 + $0x118] sm:$0xff] }
 0x15f   :  { %802 = vmatmul.mubr.f32.gmra.mxu0 %v653_v52  ;;  %1143 = vmatprep.subr.mxu0 %v995_v51  ;;  %v1015_v51 = vld [vmem:[%s5607_s8 + $0x258] sm:$0xff]  ;;  %v1012_v52 = vld [vmem:[%s5607_s8 + $0x240] sm:$0xff] }
 0x160   :  { %1144 = vmatpush1.msra.mxu0 %v994_v53  ;;  %1125 = vmatpush2.msra.mxu1 %v1016_v48  ;;  %v1014_v53 = vld [vmem:[%s5607_s8 + $0x250] sm:$0xff]  ;;  %v843_v48 = vld [vmem:[%s5609_s7 + $0xf8] sm:$0xff] }
 0x161   :  { %1145 = vmatprep.subr.mxu0 %v991_v54  ;;  %1126 = vmatprep.subr.mxu1 %v1013_v50  ;;  %v1009_v54 = vld [vmem:[%s5607_s8 + $0x228] sm:$0xff]  ;;  %v842_v50 = vld [vmem:[%s5609_s7 + $0xf0] sm:$0xff] }
 0x162   :  { %1146 = vmatpush1.msra.mxu0 %v990_v55  ;;  %1127 = vmatpush2.msra.mxu1 %v1012_v52  ;;  %v1011_v55 = vld [vmem:[%s5607_s8 + $0x238] sm:$0xff] }
 0x163   :  { %1147 = vmatprep.subr.mxu0 %v987_v56  ;;  %1128 = vmatprep.subr.mxu1 %v1009_v54  ;;  %v1008_v56 = vld [vmem:[%s5607_s8 + $0x220] sm:$0xff]  ;;  %v839_v52 = vld [vmem:[%s5609_s7 + $0xd8] sm:$0xff]  ;;  %v838_v54 = vld [vmem:[%s5609_s7 + $0xd0] sm:$0xff] }
 0x164   :  { %1148 = vmatpush1.msra.mxu0 %v986_v57  ;;  %v1010_v57 = vld [vmem:[%s5607_s8 + $0x230] sm:$0xff]  ;;  %1129 = vmatpush2.msra.mxu1 %v1008_v56  ;;  %v835_v56 = vld [vmem:[%s5609_s7 + $0xb8] sm:$0xff] }
 0x165   :  { %1149 = vmatprep.subr.mxu0 %v983_v58  ;;  %v1005_v58 = vld [vmem:[%s5607_s8 + $0x208] sm:$0xff] }
 0x166   :  { %1150 = vmatpush1.msra.mxu0 %v982_v59  ;;  %v1007_v59 = vld [vmem:[%s5607_s8 + $0x218] sm:$0xff]  ;;  %1130 = vmatprep.subr.mxu1 %v1005_v58  ;;  %v834_v58 = vld [vmem:[%s5609_s7 + $0xb0] sm:$0xff] }
 0x167   :  { %1151 = vmatprep.subr.mxu0 %v979_v60  ;;  %v1004_v60 = vld [vmem:[%s5607_s8 + $0x200] sm:$0xff] }
 0x168   :  { %1152 = vmatpush1.msra.mxu0 %v978_v61  ;;  %v1006_v61 = vld [vmem:[%s5607_s8 + $0x210] sm:$0xff]  ;;  %1131 = vmatpush2.msra.mxu1 %v1004_v60  ;;  %v831_v60 = vld [vmem:[%s5609_s7 + $0x98] sm:$0xff] }
 0x169   :  { %1153 = vmatprep.subr.mxu0 %v975_v62  ;;  %v873_v62 = vld [vmem:[%s5609_s7 + $0x1e8] sm:$0xff] }
 0x16a   :  { %1154 = vmatpush1.msra.mxu0 %v974_v63  ;;  %v875_v63 = vld [vmem:[%s5609_s7 + $0x1f8] sm:$0xff]  ;;  %1210 = vmatprep.subr.mxu1 %v873_v62  ;;  %v830_v62 = vld [vmem:[%s5609_s7 + $0x90] sm:$0xff] }
 0x16b   :  { %1155 = vmatprep.subr.mxu0 %v971_v0  ;;  %v719_v0 = vld [vmem:[%s5610_s6] sm:$0x3] }
 0x16c   :  { %1156 = vmatpush1.msra.mxu0 %v970_v1  ;;  %v724_v1 = vrot.slane %v719_v0, %v3745_v8 }
 0x16d   :  { %1157 = vmatprep.subr.mxu0 %v967_v2 }
 0x16e   :  { %1158 = vmatpush1.msra.mxu0 %v966_v3 }
 0x16f   :  { %1159 = vmatprep.subr.mxu0 %v963_v4 }
 0x170   :  { %1160 = vmatpush1.msra.mxu0 %v962_v5  ;;  %v728_v5 = vrot.slane %v719_v0, %v3751_v12  ;;  %v827_v0 = vld [vmem:[%s5609_s7 + $0x78] sm:$0xff] }
 0x171   :  { %1161 = vmatprep.subr.mxu0 %v959_v6 }
 0x172   :  { %1162 = vmatpush1.msra.mxu0 %v958_v9 }
 0x173   :  { %1163 = vmatprep.subr.mxu0 %v955_v10 }
 0x174   :  { %1164 = vmatpush1.msra.mxu0 %v954_v11 }
 0x175   :  { %1165 = vmatprep.subr.mxu0 %v951_v13 }
 0x176   :  { %1166 = vmatpush1.msra.mxu0 %v950_v14 }
 0x177   :  { %1167 = vmatprep.subr.mxu0 %v947_v15 }
 0x178   :  { %1168 = vmatpush1.msra.mxu0 %v946_v16  ;;  %v872_v16 = vld [vmem:[%s5609_s7 + $0x1e0] sm:$0xff] }
 0x179   :  { %1169 = vmatprep.subr.mxu0 %v943_v17  ;;  %v874_v17 = vld [vmem:[%s5609_s7 + $0x1f0] sm:$0xff] }
 0x17a   :  { %1170 = vmatpush1.msra.mxu0 %v942_v18  ;;  %v869_v18 = vld [vmem:[%s5609_s7 + $0x1c8] sm:$0xff] }
 0x17b   :  { %1171 = vmatprep.subr.mxu0 %v1067_v19 }
 0x17c   :  { %1172 = vmatpush2.msra.mxu0 %v1066_v20  ;;  %v871_v20 = vld [vmem:[%s5609_s7 + $0x1d8] sm:$0xff] }
 0x17d   :  { %1173 = vmatprep.subr.mxu0 %v1063_v21  ;;  %v868_v21 = vld [vmem:[%s5609_s7 + $0x1c0] sm:$0xff] }
 0x17e   :  { %1174 = vmatpush2.msra.mxu0 %v1062_v22  ;;  %v870_v22 = vld [vmem:[%s5609_s7 + $0x1d0] sm:$0xff] }
 0x17f   :  { %1175 = vmatprep.subr.mxu0 %v1059_v23  ;;  %v865_v23 = vld [vmem:[%s5609_s7 + $0x1a8] sm:$0xff] }
 0x180   :  { %1176 = vmatpush2.msra.mxu0 %v1058_v24  ;;  %v867_v24 = vld [vmem:[%s5609_s7 + $0x1b8] sm:$0xff] }
 0x181   :  { %1177 = vmatprep.subr.mxu0 %v1055_v25  ;;  %v864_v25 = vld [vmem:[%s5609_s7 + $0x1a0] sm:$0xff] }
 0x182   :  { %1178 = vmatpush2.msra.mxu0 %v1054_v26  ;;  %v866_v26 = vld [vmem:[%s5609_s7 + $0x1b0] sm:$0xff] }
 0x183   :  { %1179 = vmatprep.subr.mxu0 %v1051_v27  ;;  %v861_v27 = vld [vmem:[%s5609_s7 + $0x188] sm:$0xff] }
 0x184   :  { %1180 = vmatpush2.msra.mxu0 %v1050_v28  ;;  %v863_v28 = vld [vmem:[%s5609_s7 + $0x198] sm:$0xff] }
 0x185   :  { %1181 = vmatprep.subr.mxu0 %v1047_v29  ;;  %v860_v29 = vld [vmem:[%s5609_s7 + $0x180] sm:$0xff] }
 0x186   :  { %1182 = vmatpush2.msra.mxu0 %v1046_v30  ;;  %v862_v30 = vld [vmem:[%s5609_s7 + $0x190] sm:$0xff] }
 0x187   :  { %1183 = vmatprep.subr.mxu0 %v1043_v31  ;;  %v857_v31 = vld [vmem:[%s5609_s7 + $0x168] sm:$0xff] }
 0x188   :  { %1184 = vmatpush2.msra.mxu0 %v1042_v32  ;;  %v859_v32 = vld [vmem:[%s5609_s7 + $0x178] sm:$0xff] }
 0x189   :  { %1185 = vmatprep.subr.mxu0 %v1039_v33  ;;  %v856_v33 = vld [vmem:[%s5609_s7 + $0x160] sm:$0xff] }
 0x18a   :  { %1186 = vmatpush2.msra.mxu0 %v1038_v34  ;;  %v858_v34 = vld [vmem:[%s5609_s7 + $0x170] sm:$0xff] }
 0x18b   :  { %1187 = vmatprep.subr.mxu0 %v1035_v35  ;;  %v853_v35 = vld [vmem:[%s5609_s7 + $0x148] sm:$0xff] }
 0x18c   :  { %1188 = vmatpush2.msra.mxu0 %v1034_v36  ;;  %v855_v36 = vld [vmem:[%s5609_s7 + $0x158] sm:$0xff] }
 0x18d   :  { %1189 = vmatprep.subr.mxu0 %v1031_v37  ;;  %v852_v37 = vld [vmem:[%s5609_s7 + $0x140] sm:$0xff] }
 0x18e   :  { %1190 = vmatpush2.msra.mxu0 %v1030_v38  ;;  %v854_v38 = vld [vmem:[%s5609_s7 + $0x150] sm:$0xff] }
 0x18f   :  { %1191 = vmatprep.subr.mxu0 %v1027_v39  ;;  %v849_v39 = vld [vmem:[%s5609_s7 + $0x128] sm:$0xff] }
 0x190   :  { %1192 = vmatpush2.msra.mxu0 %v1026_v41  ;;  %v848_v41 = vld [vmem:[%s5609_s7 + $0x120] sm:$0xff] }
 0x191   :  { %1193 = vmatprep.subr.mxu0 %v1023_v43  ;;  %v845_v43 = vld [vmem:[%s5609_s7 + $0x108] sm:$0xff] }
 0x192   :  { %1194 = vmatpush2.msra.mxu0 %v1022_v45  ;;  %v844_v45 = vld [vmem:[%s5609_s7 + $0x100] sm:$0xff] }
 0x193   :  { %1195 = vmatprep.subr.mxu0 %v1019_v47  ;;  %v841_v47 = vld [vmem:[%s5609_s7 + $0xe8] sm:$0xff] }
 0x194   :  { %1196 = vmatpush2.msra.mxu0 %v1018_v49  ;;  %v840_v49 = vld [vmem:[%s5609_s7 + $0xe0] sm:$0xff] }
 0x195   :  { %1197 = vmatprep.subr.mxu0 %v1015_v51  ;;  %v837_v51 = vld [vmem:[%s5609_s7 + $0xc8] sm:$0xff] }
 0x196   :  { %1198 = vmatpush2.msra.mxu0 %v1014_v53  ;;  %v836_v53 = vld [vmem:[%s5609_s7 + $0xc0] sm:$0xff] }
 0x197   :  { %1199 = vmatprep.subr.mxu0 %v1011_v55  ;;  %v833_v55 = vld [vmem:[%s5609_s7 + $0xa8] sm:$0xff] }
 0x198   :  { %1200 = vmatpush2.msra.mxu0 %v1010_v57  ;;  %v832_v57 = vld [vmem:[%s5609_s7 + $0xa0] sm:$0xff] }
 0x199   :  { %1201 = vmatprep.subr.mxu0 %v1007_v59  ;;  %v829_v59 = vld [vmem:[%s5609_s7 + $0x88] sm:$0xff] }
 0x19a   :  { %1202 = vmatpush2.msra.mxu0 %v1006_v61  ;;  %v828_v61 = vld [vmem:[%s5609_s7 + $0x80] sm:$0xff] }
 0x19b   :  { %1281 = vmatprep.subr.mxu0 %v875_v63  ;;  %v825_v63 = vld [vmem:[%s5609_s7 + $0x68] sm:$0xff] }
 0x21b   :  { %v797_v2 = vpop.f32.mrf.mxu0 }
 0x21c   :  { %v3987_v3 = vadd.f32 %v797_v2, %v724_v1  ;;  %v826_v2 = vld [vmem:[%s5609_s7 + $0x70] sm:$0xff] }
 0x21d   :  { %v799_v4 = vpop.f32.mrf.mxu0 }
 0x21e   :  { %v800_v14 = vadd.f32 %v799_v4, %v728_v5  ;;  %v821_v4 = vld [vmem:[%s5609_s7 + $0x48] sm:$0xff] }
 0x21f   :  { %v803_v6 = vpop.f32.mrf.mxu0 }
 0x220   :  { %v804_v9 = vadd.f32 %v803_v6, %v724_v1  ;;  %v4005_v19 = vmax.f32 %v800_v14, 0.0  ;;  %v824_v1 = vld [vmem:[%s5609_s7 + $0x60] sm:$0xff]  ;;  %v818_v14 = vld [vmem:[%s5609_s7 + $0x30] sm:$0xff] }
 0x221   :  { %v805_v10 = vpop.f32.mrf.mxu0  ;;  %v820_v6 = vld [vmem:[%s5609_s7 + $0x40] sm:$0xff] }
 0x222   :  { %v810_v11 = vmax.f32 %v804_v9, 0.0  ;;  %v806_v13 = vadd.f32 %v805_v10, %v728_v5  ;;  %v823_v5 = vld [vmem:[%s5609_s7 + $0x58] sm:$0xff]  ;;  %v822_v9 = vld [vmem:[%s5609_s7 + $0x50] sm:$0xff]  ;;  %v817_v10 = vld [vmem:[%s5609_s7 + $0x28] sm:$0xff] }
 0x224   :  { %2385 = vst [vmem:[%s5611_s19] sm:$0xff] %v810_v11  ;;  %v811_v15 = vmax.f32 %v806_v13, 0.0  ;;  %v816_v13 = vld [vmem:[%s5609_s7 + $0x20] sm:$0xff] }
 0x226   :  { %2386 = vst [vmem:[%s5611_s19 + $0x8] sm:$0xff] %v811_v15  ;;  %1132 = vmatprep.mubr.f32.mxu1 %v811_v15  ;;  %1203 = vmatprep.mubr.f32.mxu0 %v811_v15  ;;  %v813_v15 = vld [vmem:[%s5609_s7 + $0x8] sm:$0xff] }
 0x227   :  { %1133 = vmatmul.mubr.f32.vlgmr.msra.gmra.mxu1 %v810_v11  ;;  %1204 = vmatmul.mubr.f32.vlgmr.msra.gmra.mxu0 %v810_v11  ;;  %v819_v11 = vld [vmem:[%s5609_s7 + $0x38] sm:$0xff] }
 0x228   :  { %1211 = vmatpush1.msra.mxu1 %v872_v16  ;;  %1282 = vmatpush1.msra.mxu0 %v874_v17  ;;  %v815_v16 = vld [vmem:[%s5609_s7 + $0x18] sm:$0xff]  ;;  %v812_v17 = vld [vmem:[%s5609_s7] sm:$0xff] }
 0x229   :  { %1212 = vmatprep.subr.mxu1 %v869_v18  ;;  %1274 = vmatprep.mubr.f32.mxu1 %v4005_v19  ;;  %v814_v18 = vld [vmem:[%s5609_s7 + $0x10] sm:$0xff] }
 0x22a   :  { %1283 = vmatprep.subr.mxu0 %v871_v20  ;;  %1345 = vmatprep.mubr.f32.mxu0 %v4005_v19  ;;  %v937_v20 = vld [vmem:[%s5609_s7 + $0x3e8] sm:$0xff] }
 0x22b   :  { %1213 = vmatpush1.msra.mxu1 %v868_v21  ;;  %1284 = vmatpush1.msra.mxu0 %v870_v22  ;;  %v939_v21 = vld [vmem:[%s5609_s7 + $0x3f8] sm:$0xff]  ;;  %v936_v22 = vld [vmem:[%s5609_s7 + $0x3e0] sm:$0xff] }
 0x22c   :  { %1214 = vmatprep.subr.mxu1 %v865_v23  ;;  %1285 = vmatprep.subr.mxu0 %v867_v24  ;;  %v938_v23 = vld [vmem:[%s5609_s7 + $0x3f0] sm:$0xff]  ;;  %v933_v24 = vld [vmem:[%s5609_s7 + $0x3c8] sm:$0xff] }
 0x22d   :  { %1215 = vmatpush1.msra.mxu1 %v864_v25  ;;  %1286 = vmatpush1.msra.mxu0 %v866_v26  ;;  %v935_v25 = vld [vmem:[%s5609_s7 + $0x3d8] sm:$0xff]  ;;  %v932_v26 = vld [vmem:[%s5609_s7 + $0x3c0] sm:$0xff] }
 0x22e   :  { %1216 = vmatprep.subr.mxu1 %v861_v27  ;;  %1287 = vmatprep.subr.mxu0 %v863_v28  ;;  %v934_v27 = vld [vmem:[%s5609_s7 + $0x3d0] sm:$0xff]  ;;  %v929_v28 = vld [vmem:[%s5609_s7 + $0x3a8] sm:$0xff] }
 0x22f   :  { %1217 = vmatpush1.msra.mxu1 %v860_v29  ;;  %1288 = vmatpush1.msra.mxu0 %v862_v30  ;;  %v931_v29 = vld [vmem:[%s5609_s7 + $0x3b8] sm:$0xff]  ;;  %v928_v30 = vld [vmem:[%s5609_s7 + $0x3a0] sm:$0xff] }
 0x230   :  { %1218 = vmatprep.subr.mxu1 %v857_v31  ;;  %1289 = vmatprep.subr.mxu0 %v859_v32  ;;  %v930_v31 = vld [vmem:[%s5609_s7 + $0x3b0] sm:$0xff]  ;;  %v925_v32 = vld [vmem:[%s5609_s7 + $0x388] sm:$0xff] }
 0x231   :  { %1219 = vmatpush1.msra.mxu1 %v856_v33  ;;  %1290 = vmatpush1.msra.mxu0 %v858_v34  ;;  %v927_v33 = vld [vmem:[%s5609_s7 + $0x398] sm:$0xff]  ;;  %v924_v34 = vld [vmem:[%s5609_s7 + $0x380] sm:$0xff] }
 0x232   :  { %1220 = vmatprep.subr.mxu1 %v853_v35  ;;  %1291 = vmatprep.subr.mxu0 %v855_v36  ;;  %v926_v35 = vld [vmem:[%s5609_s7 + $0x390] sm:$0xff]  ;;  %v921_v36 = vld [vmem:[%s5609_s7 + $0x368] sm:$0xff] }
 0x233   :  { %1221 = vmatpush1.msra.mxu1 %v852_v37  ;;  %1292 = vmatpush1.msra.mxu0 %v854_v38  ;;  %v923_v37 = vld [vmem:[%s5609_s7 + $0x378] sm:$0xff]  ;;  %v920_v38 = vld [vmem:[%s5609_s7 + $0x360] sm:$0xff] }
 0x234   :  { %1222 = vmatprep.subr.mxu1 %v849_v39  ;;  %1293 = vmatprep.subr.mxu0 %v851_v40  ;;  %v922_v39 = vld [vmem:[%s5609_s7 + $0x370] sm:$0xff]  ;;  %v917_v40 = vld [vmem:[%s5609_s7 + $0x348] sm:$0xff] }
 0x235   :  { %1223 = vmatpush1.msra.mxu1 %v848_v41  ;;  %1294 = vmatpush1.msra.mxu0 %v850_v42  ;;  %v919_v41 = vld [vmem:[%s5609_s7 + $0x358] sm:$0xff]  ;;  %v916_v42 = vld [vmem:[%s5609_s7 + $0x340] sm:$0xff] }
 0x236   :  { %1224 = vmatprep.subr.mxu1 %v845_v43  ;;  %1295 = vmatprep.subr.mxu0 %v847_v44  ;;  %v918_v43 = vld [vmem:[%s5609_s7 + $0x350] sm:$0xff]  ;;  %v913_v44 = vld [vmem:[%s5609_s7 + $0x328] sm:$0xff] }
 0x237   :  { %1225 = vmatpush1.msra.mxu1 %v844_v45  ;;  %1296 = vmatpush1.msra.mxu0 %v846_v46  ;;  %v915_v45 = vld [vmem:[%s5609_s7 + $0x338] sm:$0xff]  ;;  %v912_v46 = vld [vmem:[%s5609_s7 + $0x320] sm:$0xff] }
 0x238   :  { %1226 = vmatprep.subr.mxu1 %v841_v47  ;;  %1297 = vmatprep.subr.mxu0 %v843_v48  ;;  %v914_v47 = vld [vmem:[%s5609_s7 + $0x330] sm:$0xff]  ;;  %v909_v48 = vld [vmem:[%s5609_s7 + $0x308] sm:$0xff] }
 0x239   :  { %1227 = vmatpush1.msra.mxu1 %v840_v49  ;;  %1298 = vmatpush1.msra.mxu0 %v842_v50  ;;  %v911_v49 = vld [vmem:[%s5609_s7 + $0x318] sm:$0xff]  ;;  %v908_v50 = vld [vmem:[%s5609_s7 + $0x300] sm:$0xff] }
 0x23a   :  { %1228 = vmatprep.subr.mxu1 %v837_v51  ;;  %1299 = vmatprep.subr.mxu0 %v839_v52  ;;  %v910_v51 = vld [vmem:[%s5609_s7 + $0x310] sm:$0xff]  ;;  %v905_v52 = vld [vmem:[%s5609_s7 + $0x2e8] sm:$0xff] }
 0x23b   :  { %1229 = vmatpush1.msra.mxu1 %v836_v53  ;;  %1300 = vmatpush1.msra.mxu0 %v838_v54  ;;  %v907_v53 = vld [vmem:[%s5609_s7 + $0x2f8] sm:$0xff]  ;;  %v904_v54 = vld [vmem:[%s5609_s7 + $0x2e0] sm:$0xff] }
 0x23c   :  { %1230 = vmatprep.subr.mxu1 %v833_v55  ;;  %1301 = vmatprep.subr.mxu0 %v835_v56  ;;  %v906_v55 = vld [vmem:[%s5609_s7 + $0x2f0] sm:$0xff]  ;;  %v901_v56 = vld [vmem:[%s5609_s7 + $0x2c8] sm:$0xff] }
 0x23d   :  { %1231 = vmatpush1.msra.mxu1 %v832_v57  ;;  %1302 = vmatpush1.msra.mxu0 %v834_v58  ;;  %v903_v57 = vld [vmem:[%s5609_s7 + $0x2d8] sm:$0xff]  ;;  %v900_v58 = vld [vmem:[%s5609_s7 + $0x2c0] sm:$0xff] }
 0x23e   :  { %1232 = vmatprep.subr.mxu1 %v829_v59  ;;  %1303 = vmatprep.subr.mxu0 %v831_v60  ;;  %v902_v59 = vld [vmem:[%s5609_s7 + $0x2d0] sm:$0xff]  ;;  %v897_v60 = vld [vmem:[%s5609_s7 + $0x2a8] sm:$0xff] }
 0x23f   :  { %1233 = vmatpush1.msra.mxu1 %v828_v61  ;;  %1304 = vmatpush1.msra.mxu0 %v830_v62  ;;  %v899_v61 = vld [vmem:[%s5609_s7 + $0x2b8] sm:$0xff]  ;;  %v896_v62 = vld [vmem:[%s5609_s7 + $0x2a0] sm:$0xff] }
 0x240   :  { %1234 = vmatprep.subr.mxu1 %v825_v63  ;;  %1305 = vmatprep.subr.mxu0 %v827_v0  ;;  %v898_v63 = vld [vmem:[%s5609_s7 + $0x2b0] sm:$0xff]  ;;  %v893_v0 = vld [vmem:[%s5609_s7 + $0x288] sm:$0xff] }
 0x241   :  { %1235 = vmatpush1.msra.mxu1 %v824_v1  ;;  %1306 = vmatpush1.msra.mxu0 %v826_v2  ;;  %v895_v1 = vld [vmem:[%s5609_s7 + $0x298] sm:$0xff]  ;;  %v892_v2 = vld [vmem:[%s5609_s7 + $0x280] sm:$0xff] }
 0x242   :  { %1236 = vmatprep.subr.mxu1 %v821_v4  ;;  %1307 = vmatprep.subr.mxu0 %v823_v5  ;;  %v894_v4 = vld [vmem:[%s5609_s7 + $0x290] sm:$0xff]  ;;  %v889_v5 = vld [vmem:[%s5609_s7 + $0x268] sm:$0xff] }
 0x243   :  { %1237 = vmatpush1.msra.mxu1 %v820_v6  ;;  %1308 = vmatpush1.msra.mxu0 %v822_v9  ;;  %v891_v6 = vld [vmem:[%s5609_s7 + $0x278] sm:$0xff]  ;;  %v888_v9 = vld [vmem:[%s5609_s7 + $0x260] sm:$0xff] }
 0x244   :  { %1238 = vmatprep.subr.mxu1 %v817_v10  ;;  %1309 = vmatprep.subr.mxu0 %v819_v11  ;;  %v890_v10 = vld [vmem:[%s5609_s7 + $0x270] sm:$0xff]  ;;  %v885_v11 = vld [vmem:[%s5609_s7 + $0x248] sm:$0xff] }
 0x245   :  { %1239 = vmatpush1.msra.mxu1 %v816_v13  ;;  %1310 = vmatpush1.msra.mxu0 %v818_v14  ;;  %v887_v13 = vld [vmem:[%s5609_s7 + $0x258] sm:$0xff]  ;;  %v884_v14 = vld [vmem:[%s5609_s7 + $0x240] sm:$0xff] }
 0x246   :  { %1240 = vmatprep.subr.mxu1 %v813_v15  ;;  %1311 = vmatprep.subr.mxu0 %v815_v16  ;;  %v886_v15 = vld [vmem:[%s5609_s7 + $0x250] sm:$0xff]  ;;  %v881_v16 = vld [vmem:[%s5609_s7 + $0x228] sm:$0xff] }
 0x247   :  { %1241 = vmatpush1.msra.mxu1 %v812_v17  ;;  %1312 = vmatpush1.msra.mxu0 %v814_v18  ;;  %v883_v17 = vld [vmem:[%s5609_s7 + $0x238] sm:$0xff]  ;;  %v880_v18 = vld [vmem:[%s5609_s7 + $0x220] sm:$0xff] }
 0x248   :  { %1242 = vmatprep.subr.mxu1 %v937_v20  ;;  %1313 = vmatprep.subr.mxu0 %v939_v21  ;;  %v882_v20 = vld [vmem:[%s5609_s7 + $0x230] sm:$0xff]  ;;  %v877_v21 = vld [vmem:[%s5609_s7 + $0x208] sm:$0xff] }
 0x249   :  { %1243 = vmatpush2.msra.mxu1 %v936_v22  ;;  %1314 = vmatpush2.msra.mxu0 %v938_v23  ;;  %v879_v22 = vld [vmem:[%s5609_s7 + $0x218] sm:$0xff]  ;;  %v876_v23 = vld [vmem:[%s5609_s7 + $0x200] sm:$0xff] }
 0x24a   :  { %1244 = vmatprep.subr.mxu1 %v933_v24  ;;  %1315 = vmatprep.subr.mxu0 %v935_v25  ;;  %v878_v24 = vld [vmem:[%s5609_s7 + $0x210] sm:$0xff]  ;;  %v4379_v25 = vmax.f32 %v3987_v3, 0.0  ;;  %v1779_v3 = vld [vmem:[%s5612_s13 + $0x1c8] sm:$0xff] }
 0x24b   :  { %1245 = vmatpush2.msra.mxu1 %v932_v26  ;;  %1316 = vmatpush2.msra.mxu0 %v934_v27  ;;  %v1783_v26 = vld [vmem:[%s5612_s13 + $0x1e8] sm:$0xff]  ;;  %v1782_v27 = vld [vmem:[%s5612_s13 + $0x1e0] sm:$0xff] }
 0x24c   :  { %1246 = vmatprep.subr.mxu1 %v929_v28  ;;  %1317 = vmatprep.subr.mxu0 %v931_v29  ;;  %v1778_v28 = vld [vmem:[%s5612_s13 + $0x1c0] sm:$0xff]  ;;  %v1775_v29 = vld [vmem:[%s5612_s13 + $0x1a8] sm:$0xff] }
 0x24d   :  { %1247 = vmatpush2.msra.mxu1 %v928_v30  ;;  %1318 = vmatpush2.msra.mxu0 %v930_v31  ;;  %v2471_v30 = vmov 0.0   ;;  %v1413_v31 = vld [vmem:[%s5613_s10 + $0xf8] sm:$0xff] }
 0x24e   :  { %1248 = vmatprep.subr.mxu1 %v925_v32  ;;  %1319 = vmatprep.subr.mxu0 %v927_v33  ;;  %v1397_v32 = vld [vmem:[%s5613_s10 + $0x78] sm:$0xff]  ;;  %v1412_v33 = vld [vmem:[%s5613_s10 + $0xf0] sm:$0xff] }
 0x24f   :  { %1249 = vmatpush2.msra.mxu1 %v924_v34  ;;  %1320 = vmatpush2.msra.mxu0 %v926_v35  ;;  %v1774_v34 = vld [vmem:[%s5612_s13 + $0x1a0] sm:$0xff]  ;;  %v1396_v35 = vld [vmem:[%s5613_s10 + $0x70] sm:$0xff] }
 0x250   :  { %1250 = vmatprep.subr.mxu1 %v921_v36  ;;  %1321 = vmatprep.subr.mxu0 %v923_v37  ;;  %v1771_v36 = vld [vmem:[%s5612_s13 + $0x188] sm:$0xff] }
 0x251   :  { %1251 = vmatpush2.msra.mxu1 %v920_v38  ;;  %1322 = vmatpush2.msra.mxu0 %v922_v39  ;;  %v1411_v37 = vld [vmem:[%s5613_s10 + $0xe8] sm:$0xff]  ;;  %v1770_v38 = vld [vmem:[%s5612_s13 + $0x180] sm:$0xff] }
 0x252   :  { %1252 = vmatprep.subr.mxu1 %v917_v40  ;;  %1323 = vmatprep.subr.mxu0 %v919_v41  ;;  %v1395_v39 = vld [vmem:[%s5613_s10 + $0x68] sm:$0xff]  ;;  %v1410_v41 = vld [vmem:[%s5613_s10 + $0xe0] sm:$0xff] }
 0x253   :  { %1253 = vmatpush2.msra.mxu1 %v916_v42  ;;  %1324 = vmatpush2.msra.mxu0 %v918_v43  ;;  %v1767_v40 = vld [vmem:[%s5612_s13 + $0x168] sm:$0xff]  ;;  %v1766_v42 = vld [vmem:[%s5612_s13 + $0x160] sm:$0xff] }
 0x254   :  { %1254 = vmatprep.subr.mxu1 %v913_v44  ;;  %1325 = vmatprep.subr.mxu0 %v915_v45  ;;  %v1394_v43 = vld [vmem:[%s5613_s10 + $0x60] sm:$0xff]  ;;  %v1763_v44 = vld [vmem:[%s5612_s13 + $0x148] sm:$0xff]  ;;  %v1409_v45 = vld [vmem:[%s5613_s10 + $0xd8] sm:$0xff] }
 0x255   :  { %1255 = vmatpush2.msra.mxu1 %v912_v46  ;;  %1326 = vmatpush2.msra.mxu0 %v914_v47  ;;  %v1762_v46 = vld [vmem:[%s5612_s13 + $0x140] sm:$0xff]  ;;  %v1393_v47 = vld [vmem:[%s5613_s10 + $0x58] sm:$0xff] }
 0x256   :  { %1256 = vmatprep.subr.mxu1 %v909_v48  ;;  %1327 = vmatprep.subr.mxu0 %v911_v49  ;;  %v1759_v48 = vld [vmem:[%s5612_s13 + $0x128] sm:$0xff]  ;;  %v1408_v49 = vld [vmem:[%s5613_s10 + $0xd0] sm:$0xff] }
 0x257   :  { %1257 = vmatpush2.msra.mxu1 %v908_v50  ;;  %1328 = vmatpush2.msra.mxu0 %v910_v51  ;;  %v1758_v50 = vld [vmem:[%s5612_s13 + $0x120] sm:$0xff]  ;;  %v1392_v51 = vld [vmem:[%s5613_s10 + $0x50] sm:$0xff] }
 0x258   :  { %1258 = vmatprep.subr.mxu1 %v905_v52  ;;  %1329 = vmatprep.subr.mxu0 %v907_v53  ;;  %v1755_v52 = vld [vmem:[%s5612_s13 + $0x108] sm:$0xff] }
 0x259   :  { %1259 = vmatpush2.msra.mxu1 %v904_v54  ;;  %1330 = vmatpush2.msra.mxu0 %v906_v55  ;;  %v1407_v53 = vld [vmem:[%s5613_s10 + $0xc8] sm:$0xff]  ;;  %v1754_v54 = vld [vmem:[%s5612_s13 + $0x100] sm:$0xff] }
 0x25a   :  { %1260 = vmatprep.subr.mxu1 %v901_v56  ;;  %1331 = vmatprep.subr.mxu0 %v903_v57  ;;  %v1391_v55 = vld [vmem:[%s5613_s10 + $0x48] sm:$0xff]  ;;  %v1406_v57 = vld [vmem:[%s5613_s10 + $0xc0] sm:$0xff] }
 0x25b   :  { %1261 = vmatpush2.msra.mxu1 %v900_v58  ;;  %1332 = vmatpush2.msra.mxu0 %v902_v59  ;;  %v1751_v56 = vld [vmem:[%s5612_s13 + $0xe8] sm:$0xff]  ;;  %v1750_v58 = vld [vmem:[%s5612_s13 + $0xe0] sm:$0xff] }
 0x25c   :  { %1262 = vmatprep.subr.mxu1 %v897_v60  ;;  %1333 = vmatprep.subr.mxu0 %v899_v61  ;;  %v1390_v59 = vld [vmem:[%s5613_s10 + $0x40] sm:$0xff]  ;;  %v1747_v60 = vld [vmem:[%s5612_s13 + $0xc8] sm:$0xff]  ;;  %v1405_v61 = vld [vmem:[%s5613_s10 + $0xb8] sm:$0xff] }
 0x25d   :  { %1263 = vmatpush2.msra.mxu1 %v896_v62  ;;  %1334 = vmatpush2.msra.mxu0 %v898_v63  ;;  %v1746_v62 = vld [vmem:[%s5612_s13 + $0xc0] sm:$0xff]  ;;  %v1389_v63 = vld [vmem:[%s5613_s10 + $0x38] sm:$0xff] }
 0x25e   :  { %1264 = vmatprep.subr.mxu1 %v893_v0  ;;  %1335 = vmatprep.subr.mxu0 %v895_v1  ;;  %v1743_v0 = vld [vmem:[%s5612_s13 + $0xa8] sm:$0xff]  ;;  %v1404_v1 = vld [vmem:[%s5613_s10 + $0xb0] sm:$0xff] }
 0x25f   :  { %1265 = vmatpush2.msra.mxu1 %v892_v2  ;;  %1336 = vmatpush2.msra.mxu0 %v894_v4  ;;  %v1742_v2 = vld [vmem:[%s5612_s13 + $0xa0] sm:$0xff]  ;;  %v1388_v4 = vld [vmem:[%s5613_s10 + $0x30] sm:$0xff] }
 0x260   :  { %1266 = vmatprep.subr.mxu1 %v889_v5  ;;  %1337 = vmatprep.subr.mxu0 %v891_v6  ;;  %v1739_v5 = vld [vmem:[%s5612_s13 + $0x88] sm:$0xff] }
 0x261   :  { %1267 = vmatpush2.msra.mxu1 %v888_v9  ;;  %1338 = vmatpush2.msra.mxu0 %v890_v10  ;;  %v1403_v6 = vld [vmem:[%s5613_s10 + $0xa8] sm:$0xff]  ;;  %v1738_v9 = vld [vmem:[%s5612_s13 + $0x80] sm:$0xff] }
 0x262   :  { %1268 = vmatprep.subr.mxu1 %v885_v11  ;;  %1339 = vmatprep.subr.mxu0 %v887_v13  ;;  %v1387_v10 = vld [vmem:[%s5613_s10 + $0x28] sm:$0xff]  ;;  %v1402_v13 = vld [vmem:[%s5613_s10 + $0xa0] sm:$0xff] }
 0x263   :  { %1269 = vmatpush2.msra.mxu1 %v884_v14  ;;  %1340 = vmatpush2.msra.mxu0 %v886_v15  ;;  %v1735_v11 = vld [vmem:[%s5612_s13 + $0x68] sm:$0xff]  ;;  %v1734_v14 = vld [vmem:[%s5612_s13 + $0x60] sm:$0xff] }
 0x264   :  { %1270 = vmatprep.subr.mxu1 %v881_v16  ;;  %1341 = vmatprep.subr.mxu0 %v883_v17  ;;  %v1731_v15 = vld [vmem:[%s5612_s13 + $0x48] sm:$0xff]  ;;  %v1730_v16 = vld [vmem:[%s5612_s13 + $0x40] sm:$0xff] }
 0x265   :  { %1271 = vmatpush2.msra.mxu1 %v880_v18  ;;  %1342 = vmatpush2.msra.mxu0 %v882_v20  ;;  %v1727_v17 = vld [vmem:[%s5612_s13 + $0x28] sm:$0xff]  ;;  %v1726_v18 = vld [vmem:[%s5612_s13 + $0x20] sm:$0xff] }
 0x266   :  { %1272 = vmatprep.subr.mxu1 %v877_v21  ;;  %1343 = vmatprep.subr.mxu0 %v879_v22  ;;  %v1723_v20 = vld [vmem:[%s5612_s13 + $0x8] sm:$0xff]  ;;  %v1722_v21 = vld [vmem:[%s5612_s13] sm:$0xff] }
 0x267   :  { %1273 = vmatpush2.msra.mxu1 %v876_v23  ;;  %1344 = vmatpush2.msra.mxu0 %v878_v24  ;;  %v4552_v22 = vld [vmem:[%s5614_s2] sm:$0xff]  ;;  %v1654_v23 = vld [vmem:[%s5615_s12 + $0x1e8] sm:$0xff] }
 0x268   :  { %1275 = vmatmul.mubr.f32.vlgmr.msra.gmra.mxu1 %v4379_v25  ;;  %1346 = vmatmul.mubr.f32.vlgmr.msra.gmra.mxu0 %v4379_v25  ;;  %v1653_v24 = vld [vmem:[%s5615_s12 + $0x1e0] sm:$0xff] }
 0x269   :  { %1786 = vmatprep.subr.mxu0 %v1783_v26  ;;  %1850 = vmatprep.mubr.f32.mxu0 %v2471_v30  ;;  %v1650_v26 = vld [vmem:[%s5615_s12 + $0x1c8] sm:$0xff] }
 0x26a   :  { %1787 = vmatpush1.msra.mxu0 %v1782_v27  ;;  %2400 = vmatprep.subr.mxu1 %v1413_v31  ;;  %v1649_v27 = vld [vmem:[%s5615_s12 + $0x1c0] sm:$0xff] }
 0x26b   :  { %1788 = vmatprep.subr.mxu0 %v1779_v3  ;;  %2401 = vmatpush3.msra.mxu1 %v1397_v32  ;;  %v1646_v3 = vld [vmem:[%s5615_s12 + $0x1a8] sm:$0xff]  ;;  %v1641_v31 = vld [vmem:[%s5615_s12 + $0x180] sm:$0xff] }
 0x26c   :  { %1789 = vmatpush1.msra.mxu0 %v1778_v28  ;;  %2402 = vmatprep.subr.mxu1 %v1412_v33  ;;  %v1645_v28 = vld [vmem:[%s5615_s12 + $0x1a0] sm:$0xff]  ;;  %v1638_v32 = vld [vmem:[%s5615_s12 + $0x168] sm:$0xff] }
 0x26d   :  { %1790 = vmatprep.subr.mxu0 %v1775_v29  ;;  %2403 = vmatpush3.msra.mxu1 %v1396_v35  ;;  %v1642_v29 = vld [vmem:[%s5615_s12 + $0x188] sm:$0xff]  ;;  %v1637_v33 = vld [vmem:[%s5615_s12 + $0x160] sm:$0xff] }
 0x26e   :  { %1791 = vmatpush1.msra.mxu0 %v1774_v34  ;;  %2404 = vmatprep.subr.mxu1 %v1411_v37  ;;  %v1634_v34 = vld [vmem:[%s5615_s12 + $0x148] sm:$0xff]  ;;  %v1633_v35 = vld [vmem:[%s5615_s12 + $0x140] sm:$0xff] }
 0x26f   :  { %1792 = vmatprep.subr.mxu0 %v1771_v36  ;;  %2405 = vmatpush3.msra.mxu1 %v1395_v39  ;;  %v1630_v36 = vld [vmem:[%s5615_s12 + $0x128] sm:$0xff]  ;;  %v1629_v37 = vld [vmem:[%s5615_s12 + $0x120] sm:$0xff] }
 0x270   :  { %1793 = vmatpush1.msra.mxu0 %v1770_v38  ;;  %2406 = vmatprep.subr.mxu1 %v1410_v41  ;;  %v1626_v38 = vld [vmem:[%s5615_s12 + $0x108] sm:$0xff]  ;;  %v1625_v39 = vld [vmem:[%s5615_s12 + $0x100] sm:$0xff] }
 0x271   :  { %1794 = vmatprep.subr.mxu0 %v1767_v40  ;;  %2407 = vmatpush3.msra.mxu1 %v1394_v43  ;;  %v1622_v40 = vld [vmem:[%s5615_s12 + $0xe8] sm:$0xff]  ;;  %v1621_v41 = vld [vmem:[%s5615_s12 + $0xe0] sm:$0xff] }
 0x272   :  { %1795 = vmatpush1.msra.mxu0 %v1766_v42  ;;  %2408 = vmatprep.subr.mxu1 %v1409_v45  ;;  %v1618_v42 = vld [vmem:[%s5615_s12 + $0xc8] sm:$0xff]  ;;  %v1617_v43 = vld [vmem:[%s5615_s12 + $0xc0] sm:$0xff] }
 0x273   :  { %1796 = vmatprep.subr.mxu0 %v1763_v44  ;;  %2409 = vmatpush3.msra.mxu1 %v1393_v47  ;;  %v1614_v44 = vld [vmem:[%s5615_s12 + $0xa8] sm:$0xff]  ;;  %v1613_v45 = vld [vmem:[%s5615_s12 + $0xa0] sm:$0xff] }
 0x274   :  { %1797 = vmatpush1.msra.mxu0 %v1762_v46  ;;  %2410 = vmatprep.subr.mxu1 %v1408_v49  ;;  %v1610_v46 = vld [vmem:[%s5615_s12 + $0x88] sm:$0xff]  ;;  %v1609_v47 = vld [vmem:[%s5615_s12 + $0x80] sm:$0xff] }
 0x275   :  { %1798 = vmatprep.subr.mxu0 %v1759_v48  ;;  %2411 = vmatpush3.msra.mxu1 %v1392_v51  ;;  %v1606_v48 = vld [vmem:[%s5615_s12 + $0x68] sm:$0xff]  ;;  %v1605_v49 = vld [vmem:[%s5615_s12 + $0x60] sm:$0xff] }
 0x276   :  { %1799 = vmatpush1.msra.mxu0 %v1758_v50  ;;  %2412 = vmatprep.subr.mxu1 %v1407_v53  ;;  %v1602_v50 = vld [vmem:[%s5615_s12 + $0x48] sm:$0xff]  ;;  %v1601_v51 = vld [vmem:[%s5615_s12 + $0x40] sm:$0xff] }
 0x277   :  { %1800 = vmatprep.subr.mxu0 %v1755_v52  ;;  %2413 = vmatpush3.msra.mxu1 %v1391_v55  ;;  %v1598_v52 = vld [vmem:[%s5615_s12 + $0x28] sm:$0xff]  ;;  %v1597_v53 = vld [vmem:[%s5615_s12 + $0x20] sm:$0xff] }
 0x278   :  { %1801 = vmatpush1.msra.mxu0 %v1754_v54  ;;  %2414 = vmatprep.subr.mxu1 %v1406_v57  ;;  %v1594_v54 = vld [vmem:[%s5615_s12 + $0x8] sm:$0xff]  ;;  %v1593_v55 = vld [vmem:[%s5615_s12] sm:$0xff] }
 0x279   :  { %1802 = vmatprep.subr.mxu0 %v1751_v56  ;;  %2415 = vmatpush3.msra.mxu1 %v1390_v59  ;;  %v1718_v56 = vld [vmem:[%s5615_s12 + $0x3e8] sm:$0xff]  ;;  %v1717_v57 = vld [vmem:[%s5615_s12 + $0x3e0] sm:$0xff] }
 0x27a   :  { %1803 = vmatpush1.msra.mxu0 %v1750_v58  ;;  %2416 = vmatprep.subr.mxu1 %v1405_v61  ;;  %v1714_v58 = vld [vmem:[%s5615_s12 + $0x3c8] sm:$0xff]  ;;  %v1386_v59 = vld [vmem:[%s5613_s10 + $0x20] sm:$0xff]  ;;  %v1401_v61 = vld [vmem:[%s5613_s10 + $0x98] sm:$0xff] }
 0x27b   :  { %1804 = vmatprep.subr.mxu0 %v1747_v60  ;;  %2417 = vmatpush3.msra.mxu1 %v1389_v63  ;;  %v1713_v60 = vld [vmem:[%s5615_s12 + $0x3c0] sm:$0xff]  ;;  %v1385_v63 = vld [vmem:[%s5613_s10 + $0x18] sm:$0xff] }
 0x27c   :  { %1805 = vmatpush1.msra.mxu0 %v1746_v62  ;;  %2418 = vmatprep.subr.mxu1 %v1404_v1  ;;  %v1710_v62 = vld [vmem:[%s5615_s12 + $0x3a8] sm:$0xff]  ;;  %v1400_v1 = vld [vmem:[%s5613_s10 + $0x90] sm:$0xff] }
 0x27d   :  { %1806 = vmatprep.subr.mxu0 %v1743_v0  ;;  %2419 = vmatpush3.msra.mxu1 %v1388_v4  ;;  %v1709_v0 = vld [vmem:[%s5615_s12 + $0x3a0] sm:$0xff]  ;;  %v1384_v4 = vld [vmem:[%s5613_s10 + $0x10] sm:$0xff] }
 0x27e   :  { %1807 = vmatpush1.msra.mxu0 %v1742_v2  ;;  %2420 = vmatprep.subr.mxu1 %v1403_v6  ;;  %v1706_v2 = vld [vmem:[%s5615_s12 + $0x388] sm:$0xff] }
 0x27f   :  { %1808 = vmatprep.subr.mxu0 %v1739_v5  ;;  %2421 = vmatpush3.msra.mxu1 %v1387_v10  ;;  %v1705_v5 = vld [vmem:[%s5615_s12 + $0x380] sm:$0xff]  ;;  %v1399_v6 = vld [vmem:[%s5613_s10 + $0x88] sm:$0xff] }
 0x280   :  { %1809 = vmatpush1.msra.mxu0 %v1738_v9  ;;  %2422 = vmatprep.subr.mxu1 %v1402_v13  ;;  %v1702_v9 = vld [vmem:[%s5615_s12 + $0x368] sm:$0xff]  ;;  %v1398_v13 = vld [vmem:[%s5613_s10 + $0x80] sm:$0xff] }
 0x281   :  { %1810 = vmatprep.subr.mxu0 %v1735_v11  ;;  %2423 = vmatpush3.msra.mxu1 %v1386_v59  ;;  %v1383_v10 = vld [vmem:[%s5613_s10 + $0x8] sm:$0xff]  ;;  %v1701_v11 = vld [vmem:[%s5615_s12 + $0x360] sm:$0xff] }
 0x282   :  { %1811 = vmatpush1.msra.mxu0 %v1734_v14  ;;  %2424 = vmatprep.subr.mxu1 %v1401_v61  ;;  %v1382_v14 = vld [vmem:[%s5613_s10] sm:$0xff]  ;;  %v2113_v59 = vld [vmem:[%s5616_s15 + $0x68] sm:$0xff]  ;;  %v2111_v61 = vld [vmem:[%s5616_s15 + $0x58] sm:$0xff] }
 0x283   :  { %1812 = vmatprep.subr.mxu0 %v1731_v15  ;;  %2425 = vmatpush3.msra.mxu1 %v1385_v63  ;;  %v1698_v15 = vld [vmem:[%s5615_s12 + $0x348] sm:$0xff] }
 0x284   :  { %1813 = vmatpush1.msra.mxu0 %v1730_v16  ;;  %2426 = vmatprep.subr.mxu1 %v1400_v1  ;;  %v1697_v16 = vld [vmem:[%s5615_s12 + $0x340] sm:$0xff]  ;;  %v2109_v63 = vld [vmem:[%s5616_s15 + $0x48] sm:$0xff]  ;;  %v2107_v1 = vld [vmem:[%s5616_s15 + $0x38] sm:$0xff] }
 0x285   :  { %1814 = vmatprep.subr.mxu0 %v1727_v17  ;;  %2427 = vmatpush3.msra.mxu1 %v1384_v4  ;;  %v1445_v17 = vld [vmem:[%s5613_s10 + $0x1f8] sm:$0xff]  ;;  %v2105_v4 = vld [vmem:[%s5616_s15 + $0x28] sm:$0xff] }
 0x286   :  { %1815 = vmatpush1.msra.mxu0 %v1726_v18  ;;  %2428 = vmatprep.subr.mxu1 %v1399_v6  ;;  %v1694_v18 = vld [vmem:[%s5615_s12 + $0x328] sm:$0xff]  ;;  %v2103_v6 = vld [vmem:[%s5616_s15 + $0x18] sm:$0xff] }
 0x287   :  { %1816 = vmatprep.subr.mxu0 %v1723_v20  ;;  %2429 = vmatpush3.msra.mxu1 %v1383_v10  ;;  %v1693_v20 = vld [vmem:[%s5615_s12 + $0x320] sm:$0xff]  ;;  %v2101_v10 = vld [vmem:[%s5616_s15 + $0x8] sm:$0xff] }
 0x288   :  { %1817 = vmatpush1.msra.mxu0 %v1722_v21  ;;  %2430 = vmatprep.subr.mxu1 %v1398_v13  ;;  %v1690_v21 = vld [vmem:[%s5615_s12 + $0x308] sm:$0xff]  ;;  %v2163_v13 = vld [vmem:[%s5616_s15 + $0x1f8] sm:$0xff] }
 0x289   :  { %1851 = vmatmul.mubr.f32.vlgmr.msra.gmra.mxu0 %v4552_v22  ;;  %1928 = vmatprep.subr.mxu0 %v1654_v23  ;;  %v1689_v23 = vld [vmem:[%s5615_s12 + $0x300] sm:$0xff] }
 0x28a   :  { %1929 = vmatpush1.msra.mxu0 %v1653_v24  ;;  %1992 = vmatprep.mubr.f32.mxu0 %v4005_v19  ;;  %v1686_v24 = vld [vmem:[%s5615_s12 + $0x2e8] sm:$0xff] }
 0x28b   :  { %1930 = vmatprep.subr.mxu0 %v1650_v26  ;;  %2431 = vmatpush3.msra.mxu1 %v1382_v14  ;;  %v1685_v26 = vld [vmem:[%s5615_s12 + $0x2e0] sm:$0xff]  ;;  %v2162_v14 = vld [vmem:[%s5616_s15 + $0x1f0] sm:$0xff] }
 0x28c   :  { %1931 = vmatpush1.msra.mxu0 %v1649_v27  ;;  %2435 = vmatprep.subr.mxu1 %v1445_v17  ;;  %v1682_v27 = vld [vmem:[%s5615_s12 + $0x2c8] sm:$0xff]  ;;  %v2159_v17 = vld [vmem:[%s5616_s15 + $0x1d8] sm:$0xff] }
 0x28d   :  { %1932 = vmatprep.subr.mxu0 %v1646_v3  ;;  %v1681_v3 = vld [vmem:[%s5615_s12 + $0x2c0] sm:$0xff] }
 0x28e   :  { %1933 = vmatpush1.msra.mxu0 %v1645_v28  ;;  %v1678_v28 = vld [vmem:[%s5615_s12 + $0x2a8] sm:$0xff] }
 0x28f   :  { %1934 = vmatprep.subr.mxu0 %v1642_v29  ;;  %v1677_v29 = vld [vmem:[%s5615_s12 + $0x2a0] sm:$0xff] }
 0x290   :  { %1935 = vmatpush1.msra.mxu0 %v1641_v31  ;;  %v1674_v31 = vld [vmem:[%s5615_s12 + $0x288] sm:$0xff] }
 0x291   :  { %1936 = vmatprep.subr.mxu0 %v1638_v32  ;;  %v1673_v32 = vld [vmem:[%s5615_s12 + $0x280] sm:$0xff] }
 0x292   :  { %1937 = vmatpush1.msra.mxu0 %v1637_v33  ;;  %v1670_v33 = vld [vmem:[%s5615_s12 + $0x268] sm:$0xff] }
 0x293   :  { %1938 = vmatprep.subr.mxu0 %v1634_v34  ;;  %v1669_v34 = vld [vmem:[%s5615_s12 + $0x260] sm:$0xff] }
 0x294   :  { %1939 = vmatpush1.msra.mxu0 %v1633_v35  ;;  %v1666_v35 = vld [vmem:[%s5615_s12 + $0x248] sm:$0xff] }
 0x295   :  { %1940 = vmatprep.subr.mxu0 %v1630_v36  ;;  %v1665_v36 = vld [vmem:[%s5615_s12 + $0x240] sm:$0xff] }
 0x296   :  { %1941 = vmatpush1.msra.mxu0 %v1629_v37  ;;  %v1662_v37 = vld [vmem:[%s5615_s12 + $0x228] sm:$0xff] }
 0x297   :  { %1942 = vmatprep.subr.mxu0 %v1626_v38  ;;  %v1661_v38 = vld [vmem:[%s5615_s12 + $0x220] sm:$0xff] }
 0x298   :  { %1943 = vmatpush1.msra.mxu0 %v1625_v39  ;;  %v1658_v39 = vld [vmem:[%s5615_s12 + $0x208] sm:$0xff] }
 0x299   :  { %1944 = vmatprep.subr.mxu0 %v1622_v40  ;;  %v1657_v40 = vld [vmem:[%s5615_s12 + $0x200] sm:$0xff] }
 0x29a   :  { %1945 = vmatpush1.msra.mxu0 %v1621_v41  ;;  %v2131_v41 = vld [vmem:[%s5616_s15 + $0xf8] sm:$0xff] }
 0x29b   :  { %1946 = vmatprep.subr.mxu0 %v1618_v42  ;;  %v2130_v42 = vld [vmem:[%s5616_s15 + $0xf0] sm:$0xff] }
 0x29c   :  { %1947 = vmatpush1.msra.mxu0 %v1617_v43  ;;  %v2129_v43 = vld [vmem:[%s5616_s15 + $0xe8] sm:$0xff] }
 0x29d   :  { %1948 = vmatprep.subr.mxu0 %v1614_v44  ;;  %v2128_v44 = vld [vmem:[%s5616_s15 + $0xe0] sm:$0xff] }
 0x29e   :  { %1949 = vmatpush1.msra.mxu0 %v1613_v45  ;;  %v2127_v45 = vld [vmem:[%s5616_s15 + $0xd8] sm:$0xff] }
 0x29f   :  { %1950 = vmatprep.subr.mxu0 %v1610_v46  ;;  %v2126_v46 = vld [vmem:[%s5616_s15 + $0xd0] sm:$0xff] }
 0x2a0   :  { %1951 = vmatpush1.msra.mxu0 %v1609_v47  ;;  %v2125_v47 = vld [vmem:[%s5616_s15 + $0xc8] sm:$0xff] }
 0x2a1   :  { %1952 = vmatprep.subr.mxu0 %v1606_v48  ;;  %v2124_v48 = vld [vmem:[%s5616_s15 + $0xc0] sm:$0xff] }
 0x2a2   :  { %1953 = vmatpush1.msra.mxu0 %v1605_v49  ;;  %v2123_v49 = vld [vmem:[%s5616_s15 + $0xb8] sm:$0xff] }
 0x2a3   :  { %1954 = vmatprep.subr.mxu0 %v1602_v50  ;;  %v2122_v50 = vld [vmem:[%s5616_s15 + $0xb0] sm:$0xff] }
 0x2a4   :  { %1955 = vmatpush1.msra.mxu0 %v1601_v51  ;;  %v2121_v51 = vld [vmem:[%s5616_s15 + $0xa8] sm:$0xff] }
 0x2a5   :  { %1956 = vmatprep.subr.mxu0 %v1598_v52  ;;  %v2120_v52 = vld [vmem:[%s5616_s15 + $0xa0] sm:$0xff] }
 0x2a6   :  { %1957 = vmatpush1.msra.mxu0 %v1597_v53  ;;  %v2119_v53 = vld [vmem:[%s5616_s15 + $0x98] sm:$0xff] }
 0x2a7   :  { %1958 = vmatprep.subr.mxu0 %v1594_v54  ;;  %v2118_v54 = vld [vmem:[%s5616_s15 + $0x90] sm:$0xff] }
 0x2a8   :  { %1959 = vmatpush1.msra.mxu0 %v1593_v55  ;;  %v2117_v55 = vld [vmem:[%s5616_s15 + $0x88] sm:$0xff] }
 0x2a9   :  { %1960 = vmatprep.subr.mxu0 %v1718_v56  ;;  %v2116_v56 = vld [vmem:[%s5616_s15 + $0x80] sm:$0xff] }
 0x2aa   :  { %1961 = vmatpush2.msra.mxu0 %v1717_v57  ;;  %v2115_v57 = vld [vmem:[%s5616_s15 + $0x78] sm:$0xff] }
 0x2ab   :  { %1962 = vmatprep.subr.mxu0 %v1714_v58  ;;  %v2114_v58 = vld [vmem:[%s5616_s15 + $0x70] sm:$0xff] }
 0x2ac   :  { %1963 = vmatpush2.msra.mxu0 %v1713_v60  ;;  %v2112_v60 = vld [vmem:[%s5616_s15 + $0x60] sm:$0xff] }
 0x2ad   :  { %1964 = vmatprep.subr.mxu0 %v1710_v62  ;;  %v2110_v62 = vld [vmem:[%s5616_s15 + $0x50] sm:$0xff] }
 0x2ae   :  { %1965 = vmatpush2.msra.mxu0 %v1709_v0  ;;  %v2108_v0 = vld [vmem:[%s5616_s15 + $0x40] sm:$0xff] }
 0x2af   :  { %1966 = vmatprep.subr.mxu0 %v1706_v2  ;;  %v2106_v2 = vld [vmem:[%s5616_s15 + $0x30] sm:$0xff] }
 0x2b0   :  { %1967 = vmatpush2.msra.mxu0 %v1705_v5  ;;  %v2104_v5 = vld [vmem:[%s5616_s15 + $0x20] sm:$0xff] }
 0x2b1   :  { %1968 = vmatprep.subr.mxu0 %v1702_v9  ;;  %v2102_v9 = vld [vmem:[%s5616_s15 + $0x10] sm:$0xff] }
 0x2b2   :  { %1969 = vmatpush2.msra.mxu0 %v1701_v11  ;;  %v2100_v11 = vld [vmem:[%s5616_s15] sm:$0xff] }
 0x2b3   :  { %1970 = vmatprep.subr.mxu0 %v1698_v15  ;;  %v2161_v15 = vld [vmem:[%s5616_s15 + $0x1e8] sm:$0xff] }
 0x2b4   :  { %1971 = vmatpush2.msra.mxu0 %v1697_v16  ;;  %v2160_v16 = vld [vmem:[%s5616_s15 + $0x1e0] sm:$0xff] }
 0x2b5   :  { %1972 = vmatprep.subr.mxu0 %v1694_v18  ;;  %v2158_v18 = vld [vmem:[%s5616_s15 + $0x1d0] sm:$0xff] }
 0x2b6   :  { %1973 = vmatpush2.msra.mxu0 %v1693_v20  ;;  %v2157_v20 = vld [vmem:[%s5616_s15 + $0x1c8] sm:$0xff] }
 0x2b7   :  { %1974 = vmatprep.subr.mxu0 %v1690_v21  ;;  %v2156_v21 = vld [vmem:[%s5616_s15 + $0x1c0] sm:$0xff] }
 0x2b8   :  { %1975 = vmatpush2.msra.mxu0 %v1689_v23  ;;  %v2155_v23 = vld [vmem:[%s5616_s15 + $0x1b8] sm:$0xff] }
 0x2b9   :  { %1976 = vmatprep.subr.mxu0 %v1686_v24  ;;  %v2154_v24 = vld [vmem:[%s5616_s15 + $0x1b0] sm:$0xff] }
 0x2ba   :  { %1977 = vmatpush2.msra.mxu0 %v1685_v26  ;;  %v2153_v26 = vld [vmem:[%s5616_s15 + $0x1a8] sm:$0xff] }
 0x2bb   :  { %1978 = vmatprep.subr.mxu0 %v1682_v27  ;;  %v2152_v27 = vld [vmem:[%s5616_s15 + $0x1a0] sm:$0xff] }
 0x2bc   :  { %1979 = vmatpush2.msra.mxu0 %v1681_v3  ;;  %v2151_v3 = vld [vmem:[%s5616_s15 + $0x198] sm:$0xff] }
 0x2bd   :  { %1980 = vmatprep.subr.mxu0 %v1678_v28  ;;  %v2150_v28 = vld [vmem:[%s5616_s15 + $0x190] sm:$0xff] }
 0x2be   :  { %1981 = vmatpush2.msra.mxu0 %v1677_v29  ;;  %v2149_v29 = vld [vmem:[%s5616_s15 + $0x188] sm:$0xff] }
 0x2bf   :  { %1982 = vmatprep.subr.mxu0 %v1674_v31  ;;  %v2148_v31 = vld [vmem:[%s5616_s15 + $0x180] sm:$0xff] }
 0x2c0   :  { %1983 = vmatpush2.msra.mxu0 %v1673_v32  ;;  %v2147_v32 = vld [vmem:[%s5616_s15 + $0x178] sm:$0xff] }
 0x2c1   :  { %1984 = vmatprep.subr.mxu0 %v1670_v33  ;;  %v2146_v33 = vld [vmem:[%s5616_s15 + $0x170] sm:$0xff] }
 0x2c2   :  { %1985 = vmatpush2.msra.mxu0 %v1669_v34  ;;  %v2145_v34 = vld [vmem:[%s5616_s15 + $0x168] sm:$0xff] }
 0x2c3   :  { %1986 = vmatprep.subr.mxu0 %v1666_v35  ;;  %v2144_v35 = vld [vmem:[%s5616_s15 + $0x160] sm:$0xff] }
 0x2c4   :  { %1987 = vmatpush2.msra.mxu0 %v1665_v36  ;;  %v2143_v36 = vld [vmem:[%s5616_s15 + $0x158] sm:$0xff] }
 0x2c5   :  { %1988 = vmatprep.subr.mxu0 %v1662_v37  ;;  %v2142_v37 = vld [vmem:[%s5616_s15 + $0x150] sm:$0xff] }
 0x2c6   :  { %1989 = vmatpush2.msra.mxu0 %v1661_v38  ;;  %v2141_v38 = vld [vmem:[%s5616_s15 + $0x148] sm:$0xff] }
 0x2c7   :  { %1990 = vmatprep.subr.mxu0 %v1658_v39  ;;  %v2140_v39 = vld [vmem:[%s5616_s15 + $0x140] sm:$0xff] }
 0x2c8   :  { %1991 = vmatpush2.msra.mxu0 %v1657_v40  ;;  %v2139_v40 = vld [vmem:[%s5616_s15 + $0x138] sm:$0xff] }
 0x2c9   :  { %1993 = vmatmul.mubr.f32.vlgmr.msra.gmra.mxu0 %v4379_v25  ;;  %2240 = vmatprep.subr.mxu0 %v2131_v41  ;;  %v2138_v41 = vld [vmem:[%s5616_s15 + $0x130] sm:$0xff] }
 0x2ca   :  { %2241 = vmatpush1.msra.mxu0 %v2130_v42  ;;  %v2137_v42 = vld [vmem:[%s5616_s15 + $0x128] sm:$0xff] }
 0x2cb   :  { %2242 = vmatprep.subr.mxu0 %v2129_v43  ;;  %v2136_v43 = vld [vmem:[%s5616_s15 + $0x120] sm:$0xff] }
 0x2cc   :  { %2243 = vmatpush1.msra.mxu0 %v2128_v44  ;;  %v2135_v44 = vld [vmem:[%s5616_s15 + $0x118] sm:$0xff] }
 0x2cd   :  { %2244 = vmatprep.subr.mxu0 %v2127_v45  ;;  %v2134_v45 = vld [vmem:[%s5616_s15 + $0x110] sm:$0xff] }
 0x2ce   :  { %2245 = vmatpush1.msra.mxu0 %v2126_v46  ;;  %v2133_v46 = vld [vmem:[%s5616_s15 + $0x108] sm:$0xff] }
 0x2cf   :  { %2246 = vmatprep.subr.mxu0 %v2125_v47  ;;  %v2132_v47 = vld [vmem:[%s5616_s15 + $0x100] sm:$0xff] }
 0x2d0   :  { %2247 = vmatpush1.msra.mxu0 %v2124_v48 }
 0x2d1   :  { %2248 = vmatprep.subr.mxu0 %v2123_v49 }
 0x2d2   :  { %2249 = vmatpush1.msra.mxu0 %v2122_v50  ;;  %v4976_v50 = vld [vmem:[%s5617_s9] sm:$0xf] }
 0x2d3   :  { %2250 = vmatprep.subr.mxu0 %v2121_v51  ;;  %v1368_v51 = vsub.s32 3, %v3742_v7 }
 0x2d4   :  { %2251 = vmatpush1.msra.mxu0 %v2120_v52 }
 0x2d5   :  { %2252 = vmatprep.subr.mxu0 %v2119_v53 }
 0x2d6   :  { %2253 = vmatpush1.msra.mxu0 %v2118_v54 }
 0x2d7   :  { %2254 = vmatprep.subr.mxu0 %v2117_v55  ;;  %v1357_v55 = vrot.slane %v4976_v50, %v3745_v8 }
 0x2d8   :  { %2255 = vmatpush1.msra.mxu0 %v2116_v56 }
 0x2d9   :  { %2256 = vmatprep.subr.mxu0 %v2115_v57 }
 0x2da   :  { %2257 = vmatpush1.msra.mxu0 %v2114_v58  ;;  %v1361_v58 = vrot.slane %v4976_v50, %v3751_v12 }
 0x2db   :  { %2258 = vmatprep.subr.mxu0 %v2113_v59  ;;  %v1369_v59 = vrot.slane %v4976_v50, %v1368_v51 }
 0x2dc   :  { %2259 = vmatpush1.msra.mxu0 %v2112_v60 }
 0x2dd   :  { %2260 = vmatprep.subr.mxu0 %v2111_v61 }
 0x2de   :  { %2261 = vmatpush1.msra.mxu0 %v2110_v62 }
 0x2df   :  { %2262 = vmatprep.subr.mxu0 %v2109_v63 }
 0x2e0   :  { %2263 = vmatpush1.msra.mxu0 %v2108_v0 }
 0x2e1   :  { %2264 = vmatprep.subr.mxu0 %v2107_v1 }
 0x2e2   :  { %2265 = vmatpush1.msra.mxu0 %v2106_v2 }
 0x2e3   :  { %2266 = vmatprep.subr.mxu0 %v2105_v4 }
 0x2e4   :  { %2267 = vmatpush1.msra.mxu0 %v2104_v5 }
 0x2e5   :  { %2268 = vmatprep.subr.mxu0 %v2103_v6  ;;  %v1429_v6 = vld [vmem:[%s5613_s10 + $0x178] sm:$0xff] }
 0x2e6   :  { %2269 = vmatpush1.msra.mxu0 %v2102_v9 }
 0x2e7   :  { %2270 = vmatprep.subr.mxu0 %v2101_v10  ;;  %v1134_v48 = vpop.f32.mrf.mxu1  ;;  %v4971_v49 = vpop.f32.mrf.mxu0  ;;  %v1444_v10 = vld [vmem:[%s5613_s10 + $0x1f0] sm:$0xff] }
 0x2e8   :  { %2271 = vmatpush1.msra.mxu0 %v2100_v11  ;;  %v1428_v11 = vld [vmem:[%s5613_s10 + $0x170] sm:$0xff] }
 0x2e9   :  { %2272 = vmatprep.subr.mxu0 %v2163_v13  ;;  %v1136_v52 = vpop.f32.mrf.mxu1  ;;  %v1207_v53 = vpop.f32.mrf.mxu0  ;;  %v1443_v13 = vld [vmem:[%s5613_s10 + $0x1e8] sm:$0xff] }
 0x2ea   :  { %2273 = vmatpush2.msra.mxu0 %v2162_v14  ;;  %v1427_v14 = vld [vmem:[%s5613_s10 + $0x168] sm:$0xff] }
 0x2eb   :  { %2274 = vmatprep.subr.mxu0 %v2161_v15  ;;  %v1442_v15 = vld [vmem:[%s5613_s10 + $0x1e0] sm:$0xff] }
 0x2ec   :  { %2275 = vmatpush2.msra.mxu0 %v2160_v16  ;;  %v1426_v16 = vld [vmem:[%s5613_s10 + $0x160] sm:$0xff] }
 0x2ed   :  { %2276 = vmatprep.subr.mxu0 %v2159_v17  ;;  %v1441_v17 = vld [vmem:[%s5613_s10 + $0x1d8] sm:$0xff] }
 0x2ee   :  { %2277 = vmatpush2.msra.mxu0 %v2158_v18  ;;  %v1425_v18 = vld [vmem:[%s5613_s10 + $0x158] sm:$0xff] }
 0x2ef   :  { %2278 = vmatprep.subr.mxu0 %v2157_v20  ;;  %v1440_v20 = vld [vmem:[%s5613_s10 + $0x1d0] sm:$0xff] }
 0x2f0   :  { %2279 = vmatpush2.msra.mxu0 %v2156_v21  ;;  %v1424_v21 = vld [vmem:[%s5613_s10 + $0x150] sm:$0xff] }
 0x2f1   :  { %2280 = vmatprep.subr.mxu0 %v2155_v23  ;;  %v1439_v23 = vld [vmem:[%s5613_s10 + $0x1c8] sm:$0xff] }
 0x2f2   :  { %2281 = vmatpush2.msra.mxu0 %v2154_v24  ;;  %v1423_v24 = vld [vmem:[%s5613_s10 + $0x148] sm:$0xff] }
 0x2f3   :  { %2282 = vmatprep.subr.mxu0 %v2153_v26  ;;  %v1438_v26 = vld [vmem:[%s5613_s10 + $0x1c0] sm:$0xff] }
 0x2f4   :  { %2283 = vmatpush2.msra.mxu0 %v2152_v27  ;;  %v1422_v27 = vld [vmem:[%s5613_s10 + $0x140] sm:$0xff] }
 0x2f5   :  { %2284 = vmatprep.subr.mxu0 %v2151_v3  ;;  %v1437_v3 = vld [vmem:[%s5613_s10 + $0x1b8] sm:$0xff] }
 0x2f6   :  { %2285 = vmatpush2.msra.mxu0 %v2150_v28  ;;  %v1421_v28 = vld [vmem:[%s5613_s10 + $0x138] sm:$0xff] }
 0x2f7   :  { %2286 = vmatprep.subr.mxu0 %v2149_v29  ;;  %v1436_v29 = vld [vmem:[%s5613_s10 + $0x1b0] sm:$0xff] }
 0x2f8   :  { %2287 = vmatpush2.msra.mxu0 %v2148_v31  ;;  %v1420_v31 = vld [vmem:[%s5613_s10 + $0x130] sm:$0xff] }
 0x2f9   :  { %2288 = vmatprep.subr.mxu0 %v2147_v32  ;;  %v1435_v32 = vld [vmem:[%s5613_s10 + $0x1a8] sm:$0xff] }
 0x2fa   :  { %2289 = vmatpush2.msra.mxu0 %v2146_v33  ;;  %v1364_v33 = vsub.s32 2, %v3742_v7 }
 0x2fb   :  { %2290 = vmatprep.subr.mxu0 %v2145_v34  ;;  %v1419_v34 = vld [vmem:[%s5613_s10 + $0x128] sm:$0xff] }
 0x2fc   :  { %2291 = vmatpush2.msra.mxu0 %v2144_v35  ;;  %v1434_v35 = vld [vmem:[%s5613_s10 + $0x1a0] sm:$0xff] }
 0x2fd   :  { %2292 = vmatprep.subr.mxu0 %v2143_v36  ;;  %v1418_v36 = vld [vmem:[%s5613_s10 + $0x120] sm:$0xff] }
 0x2fe   :  { %2293 = vmatpush2.msra.mxu0 %v2142_v37  ;;  %v1433_v37 = vld [vmem:[%s5613_s10 + $0x198] sm:$0xff] }
 0x2ff   :  { %2294 = vmatprep.subr.mxu0 %v2141_v38 }
 0x300   :  { %2295 = vmatpush2.msra.mxu0 %v2140_v39  ;;  %v1365_v39 = vrot.slane %v4976_v50, %v1364_v33  ;;  %v1784_v50 = vld [vmem:[%s5612_s13 + $0x1f0] sm:$0xff] }
 0x301   :  { %2296 = vmatprep.subr.mxu0 %v2139_v40  ;;  %v1417_v40 = vld [vmem:[%s5613_s10 + $0x118] sm:$0xff] }
 0x302   :  { %2297 = vmatpush2.msra.mxu0 %v2138_v41  ;;  %v1432_v41 = vld [vmem:[%s5613_s10 + $0x190] sm:$0xff] }
 0x303   :  { %2298 = vmatprep.subr.mxu0 %v2137_v42  ;;  %v1416_v42 = vld [vmem:[%s5613_s10 + $0x110] sm:$0xff] }
 0x304   :  { %2299 = vmatpush2.msra.mxu0 %v2136_v43  ;;  %v1431_v43 = vld [vmem:[%s5613_s10 + $0x188] sm:$0xff] }
 0x305   :  { %2300 = vmatprep.subr.mxu0 %v2135_v44 }
 0x306   :  { %2301 = vmatpush2.msra.mxu0 %v2134_v45  ;;  %v1415_v45 = vld [vmem:[%s5613_s10 + $0x108] sm:$0xff] }
 0x307   :  { %2302 = vmatprep.subr.mxu0 %v2133_v46  ;;  %v1430_v46 = vld [vmem:[%s5613_s10 + $0x180] sm:$0xff] }
 0x308   :  { %2303 = vmatpush2.msra.mxu0 %v2132_v47  ;;  %v1414_v47 = vld [vmem:[%s5613_s10 + $0x100] sm:$0xff] }
 0x328   :  { %v1276_v54 = vpop.f32.mrf.mxu1  ;;  %v4981_v56 = vpop.f32.mrf.mxu0 }
 0x329   :  { %v1277_v57 = vadd.f32 %v1276_v54, %v1134_v48  ;;  %v1348_v38 = vadd.f32 %v4981_v56, %v4971_v49  ;;  %v1785_v48 = vld [vmem:[%s5612_s13 + $0x1f8] sm:$0xff] }
 0x32a   :  { %v1278_v60 = vpop.f32.mrf.mxu1  ;;  %v1349_v61 = vpop.f32.mrf.mxu0  ;;  %v1777_v54 = vld [vmem:[%s5612_s13 + $0x1b8] sm:$0xff] }
 0x32b   :  { %v1279_v62 = vadd.f32 %v1278_v60, %v1136_v52  ;;  %v1350_v63 = vadd.f32 %v1349_v61, %v1207_v53  ;;  %v1374_v0 = vadd.f32 %v1357_v55, %v1277_v57  ;;  %v1376_v44 = vadd.f32 %v1365_v39, %v1348_v38  ;;  %v1781_v52 = vld [vmem:[%s5612_s13 + $0x1d8] sm:$0xff]  ;;  %v1780_v53 = vld [vmem:[%s5612_s13 + $0x1d0] sm:$0xff] }
 0x32c   :  { %v1776_v55 = vld [vmem:[%s5612_s13 + $0x1b0] sm:$0xff]  ;;  %v1773_v56 = vld [vmem:[%s5612_s13 + $0x198] sm:$0xff] }
 0x32d   :  { %v1375_v1 = vadd.f32 %v1361_v58, %v1279_v62  ;;  %v1377_v2 = vadd.f32 %v1369_v59, %v1350_v63  ;;  %v1378_v5 = vmax.f32 %v1374_v0, 0.0  ;;  %v1380_v49 = vmax.f32 %v1376_v44, 0.0  ;;  %v1772_v57 = vld [vmem:[%s5612_s13 + $0x190] sm:$0xff]  ;;  %v1765_v59 = vld [vmem:[%s5612_s13 + $0x158] sm:$0xff] }
 0x32e   :  { %v1768_v58 = vld [vmem:[%s5612_s13 + $0x170] sm:$0xff]  ;;  %v1761_v61 = vld [vmem:[%s5612_s13 + $0x138] sm:$0xff] }
 0x32f   :  { %v1379_v4 = vmax.f32 %v1375_v1, 0.0  ;;  %v1381_v9 = vmax.f32 %v1377_v2, 0.0  ;;  %v1764_v60 = vld [vmem:[%s5612_s13 + $0x150] sm:$0xff]  ;;  %v1757_v63 = vld [vmem:[%s5612_s13 + $0x118] sm:$0xff] }
 0x330   :  { %v1760_v62 = vld [vmem:[%s5612_s13 + $0x130] sm:$0xff]  ;;  %v1753_v1 = vld [vmem:[%s5612_s13 + $0xf8] sm:$0xff] }
 0x331   :  { %1517 = vmatprep.mubr.f32.mxu1 %v1379_v4  ;;  %v1756_v0 = vld [vmem:[%s5612_s13 + $0x110] sm:$0xff]  ;;  %v1749_v4 = vld [vmem:[%s5612_s13 + $0xd8] sm:$0xff] }
 0x332   :  { %1518 = vmatmul.mubr.f32.vlgmr.msra.gmra.mxu1 %v1378_v5  ;;  %v1752_v2 = vld [vmem:[%s5612_s13 + $0xf0] sm:$0xff]  ;;  %v1624_v39 = vld [vmem:[%s5615_s12 + $0xf8] sm:$0xff] }
 0x333   :  { %2436 = vmatpush3.msra.mxu1 %v1429_v6  ;;  %1587 = vmatprep.mubr.f32.mxu1 %v1381_v9  ;;  %v1748_v5 = vld [vmem:[%s5612_s13 + $0xd0] sm:$0xff]  ;;  %v1745_v6 = vld [vmem:[%s5612_s13 + $0xb8] sm:$0xff] }
 0x334   :  { %2437 = vmatprep.subr.mxu1 %v1444_v10  ;;  %v1744_v9 = vld [vmem:[%s5612_s13 + $0xb0] sm:$0xff]  ;;  %v1741_v10 = vld [vmem:[%s5612_s13 + $0x98] sm:$0xff] }
 0x335   :  { %2438 = vmatpush3.msra.mxu1 %v1428_v11  ;;  %v1740_v11 = vld [vmem:[%s5612_s13 + $0x90] sm:$0xff]  ;;  %v1616_v44 = vld [vmem:[%s5615_s12 + $0xb8] sm:$0xff] }
 0x336   :  { %2439 = vmatprep.subr.mxu1 %v1443_v13  ;;  %v1737_v13 = vld [vmem:[%s5612_s13 + $0x78] sm:$0xff]  ;;  %v1627_v38 = vld [vmem:[%s5615_s12 + $0x110] sm:$0xff] }
 0x337   :  { %2440 = vmatpush3.msra.mxu1 %v1427_v14  ;;  %v1736_v14 = vld [vmem:[%s5612_s13 + $0x70] sm:$0xff] }
 0x338   :  { %2441 = vmatprep.subr.mxu1 %v1442_v15  ;;  %v1733_v15 = vld [vmem:[%s5612_s13 + $0x58] sm:$0xff] }
 0x339   :  { %2442 = vmatpush3.msra.mxu1 %v1426_v16  ;;  %v1732_v16 = vld [vmem:[%s5612_s13 + $0x50] sm:$0xff] }
 0x33a   :  { %2443 = vmatprep.subr.mxu1 %v1441_v17  ;;  %v1729_v17 = vld [vmem:[%s5612_s13 + $0x38] sm:$0xff] }
 0x33b   :  { %2444 = vmatpush3.msra.mxu1 %v1425_v18  ;;  %v1728_v18 = vld [vmem:[%s5612_s13 + $0x30] sm:$0xff] }
 0x33c   :  { %2445 = vmatprep.subr.mxu1 %v1440_v20  ;;  %v1725_v20 = vld [vmem:[%s5612_s13 + $0x18] sm:$0xff] }
 0x33d   :  { %2446 = vmatpush3.msra.mxu1 %v1424_v21  ;;  %v1724_v21 = vld [vmem:[%s5612_s13 + $0x10] sm:$0xff] }
 0x33e   :  { %2447 = vmatprep.subr.mxu1 %v1439_v23  ;;  %v1656_v23 = vld [vmem:[%s5615_s12 + $0x1f8] sm:$0xff] }
 0x33f   :  { %2448 = vmatpush3.msra.mxu1 %v1423_v24  ;;  %v1655_v24 = vld [vmem:[%s5615_s12 + $0x1f0] sm:$0xff] }
 0x340   :  { %2449 = vmatprep.subr.mxu1 %v1438_v26  ;;  %v1652_v26 = vld [vmem:[%s5615_s12 + $0x1d8] sm:$0xff] }
 0x341   :  { %2450 = vmatpush3.msra.mxu1 %v1422_v27  ;;  %v1651_v27 = vld [vmem:[%s5615_s12 + $0x1d0] sm:$0xff] }
 0x342   :  { %2451 = vmatprep.subr.mxu1 %v1437_v3  ;;  %v1648_v3 = vld [vmem:[%s5615_s12 + $0x1b8] sm:$0xff] }
 0x343   :  { %2452 = vmatpush3.msra.mxu1 %v1421_v28  ;;  %v1647_v28 = vld [vmem:[%s5615_s12 + $0x1b0] sm:$0xff] }
 0x344   :  { %2453 = vmatprep.subr.mxu1 %v1436_v29  ;;  %v1643_v29 = vld [vmem:[%s5615_s12 + $0x190] sm:$0xff] }
 0x345   :  { %2454 = vmatpush3.msra.mxu1 %v1420_v31  ;;  %v1639_v31 = vld [vmem:[%s5615_s12 + $0x170] sm:$0xff] }
 0x346   :  { %2455 = vmatprep.subr.mxu1 %v1435_v32  ;;  %v1636_v32 = vld [vmem:[%s5615_s12 + $0x158] sm:$0xff] }
 0x347   :  { %2456 = vmatpush3.msra.mxu1 %v1419_v34  ;;  %v1635_v34 = vld [vmem:[%s5615_s12 + $0x150] sm:$0xff] }
 0x348   :  { %2457 = vmatprep.subr.mxu1 %v1434_v35  ;;  %v1632_v35 = vld [vmem:[%s5615_s12 + $0x138] sm:$0xff] }
 0x349   :  { %2458 = vmatpush3.msra.mxu1 %v1418_v36  ;;  %v1631_v36 = vld [vmem:[%s5615_s12 + $0x130] sm:$0xff] }
 0x34a   :  { %2459 = vmatprep.subr.mxu1 %v1433_v37  ;;  %v1628_v37 = vld [vmem:[%s5615_s12 + $0x118] sm:$0xff] }
 0x34b   :  { %2460 = vmatpush3.msra.mxu1 %v1417_v40  ;;  %v1623_v40 = vld [vmem:[%s5615_s12 + $0xf0] sm:$0xff] }
 0x34c   :  { %2461 = vmatprep.subr.mxu1 %v1432_v41  ;;  %v1620_v41 = vld [vmem:[%s5615_s12 + $0xd8] sm:$0xff] }
 0x34d   :  { %2462 = vmatpush3.msra.mxu1 %v1416_v42  ;;  %v1852_v42 = vpop.f32.mrf.mxu0 }
 0x34e   :  { %2463 = vmatprep.subr.mxu1 %v1431_v43  ;;  %v1619_v43 = vld [vmem:[%s5615_s12 + $0xd0] sm:$0xff] }
 0x34f   :  { %2464 = vmatpush3.msra.mxu1 %v1415_v45  ;;  %v1615_v45 = vld [vmem:[%s5615_s12 + $0xb0] sm:$0xff] }
 0x350   :  { %2465 = vmatprep.subr.mxu1 %v1430_v46  ;;  %v1854_v46 = vpop.f32.mrf.mxu0 }
 0x351   :  { %2466 = vmatpush3.msra.mxu1 %v1414_v47  ;;  %v1612_v47 = vld [vmem:[%s5615_s12 + $0x98] sm:$0xff] }
 0x352   :  { %1588 = vmatmul.mubr.f32.vlgmr.msra.gmra.mxu1 %v1380_v49  ;;  %1857 = vmatprep.subr.mxu1 %v1785_v48  ;;  %v5258_v48 = vld [vmem:[%s5618_s14] sm:$0xf]  ;;  %v1611_v49 = vld [vmem:[%s5615_s12 + $0x90] sm:$0xff] }
 0x353   :  { %1858 = vmatpush1.msra.mxu1 %v1784_v50  ;;  %1921 = vmatprep.mubr.f32.mxu1 %v2471_v30  ;;  %v1769_v30 = vld [vmem:[%s5612_s13 + $0x178] sm:$0xff] }
 0x354   :  { %1859 = vmatprep.subr.mxu1 %v1781_v52  ;;  %v1608_v50 = vld [vmem:[%s5615_s12 + $0x78] sm:$0xff]  ;;  %v1607_v52 = vld [vmem:[%s5615_s12 + $0x70] sm:$0xff] }
 0x355   :  { %1860 = vmatpush1.msra.mxu1 %v1780_v53 }
 0x356   :  { %1861 = vmatprep.subr.mxu1 %v1777_v54  ;;  %v2075_v54 = vrot.slane %v5258_v48, %v3745_v8 }
 0x357   :  { %1862 = vmatpush1.msra.mxu1 %v1776_v55  ;;  %v1604_v55 = vld [vmem:[%s5615_s12 + $0x58] sm:$0xff] }
 0x358   :  { %1863 = vmatprep.subr.mxu1 %v1773_v56 }
 0x359   :  { %1864 = vmatpush1.msra.mxu1 %v1772_v57  ;;  %v2079_v57 = vrot.slane %v5258_v48, %v3751_v12 }
 0x35a   :  { %1865 = vmatprep.subr.mxu1 %v1769_v30  ;;  %v1603_v30 = vld [vmem:[%s5615_s12 + $0x50] sm:$0xff] }
 0x35b   :  { %1866 = vmatpush1.msra.mxu1 %v1768_v58 }
 0x35c   :  { %1867 = vmatprep.subr.mxu1 %v1765_v59  ;;  %v1600_v59 = vld [vmem:[%s5615_s12 + $0x38] sm:$0xff] }
 0x35d   :  { %1868 = vmatpush1.msra.mxu1 %v1764_v60 }
 0x35e   :  { %1869 = vmatprep.subr.mxu1 %v1761_v61  ;;  %v1599_v61 = vld [vmem:[%s5615_s12 + $0x30] sm:$0xff] }
 0x35f   :  { %1870 = vmatpush1.msra.mxu1 %v1760_v62 }
 0x360   :  { %1871 = vmatprep.subr.mxu1 %v1757_v63  ;;  %v1596_v63 = vld [vmem:[%s5615_s12 + $0x18] sm:$0xff] }
 0x361   :  { %1872 = vmatpush1.msra.mxu1 %v1756_v0 }
 0x362   :  { %1873 = vmatprep.subr.mxu1 %v1753_v1  ;;  %v1595_v1 = vld [vmem:[%s5615_s12 + $0x10] sm:$0xff] }
 0x363   :  { %1874 = vmatpush1.msra.mxu1 %v1752_v2  ;;  %v1720_v2 = vld [vmem:[%s5615_s12 + $0x3f8] sm:$0xff] }
 0x364   :  { %1875 = vmatprep.subr.mxu1 %v1749_v4 }
 0x365   :  { %1876 = vmatpush1.msra.mxu1 %v1748_v5  ;;  %v1719_v5 = vld [vmem:[%s5615_s12 + $0x3f0] sm:$0xff] }
 0x366   :  { %1877 = vmatprep.subr.mxu1 %v1745_v6 }
 0x367   :  { %1878 = vmatpush1.msra.mxu1 %v1744_v9  ;;  %v1716_v9 = vld [vmem:[%s5615_s12 + $0x3d8] sm:$0xff] }
 0x368   :  { %1879 = vmatprep.subr.mxu1 %v1741_v10  ;;  %v1715_v10 = vld [vmem:[%s5615_s12 + $0x3d0] sm:$0xff] }
 0x369   :  { %1880 = vmatpush1.msra.mxu1 %v1740_v11  ;;  %v1712_v11 = vld [vmem:[%s5615_s12 + $0x3b8] sm:$0xff] }
 0x36a   :  { %1881 = vmatprep.subr.mxu1 %v1737_v13  ;;  %v1711_v13 = vld [vmem:[%s5615_s12 + $0x3b0] sm:$0xff] }
 0x36b   :  { %1882 = vmatpush1.msra.mxu1 %v1736_v14  ;;  %v1708_v14 = vld [vmem:[%s5615_s12 + $0x398] sm:$0xff] }
 0x36c   :  { %1883 = vmatprep.subr.mxu1 %v1733_v15  ;;  %v1707_v15 = vld [vmem:[%s5615_s12 + $0x390] sm:$0xff] }
 0x36d   :  { %1884 = vmatpush1.msra.mxu1 %v1732_v16  ;;  %v1704_v16 = vld [vmem:[%s5615_s12 + $0x378] sm:$0xff] }
 0x36e   :  { %1885 = vmatprep.subr.mxu1 %v1729_v17  ;;  %v1703_v17 = vld [vmem:[%s5615_s12 + $0x370] sm:$0xff] }
 0x36f   :  { %1886 = vmatpush1.msra.mxu1 %v1728_v18  ;;  %v1700_v18 = vld [vmem:[%s5615_s12 + $0x358] sm:$0xff] }
 0x370   :  { %1887 = vmatprep.subr.mxu1 %v1725_v20  ;;  %v1699_v20 = vld [vmem:[%s5615_s12 + $0x350] sm:$0xff] }
 0x371   :  { %1888 = vmatpush1.msra.mxu1 %v1724_v21  ;;  %v1696_v21 = vld [vmem:[%s5615_s12 + $0x338] sm:$0xff] }
 0x372   :  { %1922 = vmatmul.mubr.f32.vlgmr.msra.gmra.mxu1 %v4552_v22  ;;  %1999 = vmatprep.subr.mxu1 %v1656_v23  ;;  %v1644_v22 = vld [vmem:[%s5615_s12 + $0x198] sm:$0xff]  ;;  %v1695_v23 = vld [vmem:[%s5615_s12 + $0x330] sm:$0xff] }
 0x373   :  { %2000 = vmatpush1.msra.mxu1 %v1655_v24  ;;  %2063 = vmatprep.mubr.f32.mxu1 %v4005_v19  ;;  %v1640_v19 = vld [vmem:[%s5615_s12 + $0x178] sm:$0xff] }
 0x374   :  { %2001 = vmatprep.subr.mxu1 %v1652_v26  ;;  %v1692_v24 = vld [vmem:[%s5615_s12 + $0x318] sm:$0xff]  ;;  %v1691_v26 = vld [vmem:[%s5615_s12 + $0x310] sm:$0xff] }
 0x375   :  { %2002 = vmatpush1.msra.mxu1 %v1651_v27  ;;  %v1688_v27 = vld [vmem:[%s5615_s12 + $0x2f8] sm:$0xff] }
 0x376   :  { %2003 = vmatprep.subr.mxu1 %v1648_v3  ;;  %v1687_v3 = vld [vmem:[%s5615_s12 + $0x2f0] sm:$0xff] }
 0x377   :  { %2004 = vmatpush1.msra.mxu1 %v1647_v28  ;;  %v1684_v28 = vld [vmem:[%s5615_s12 + $0x2d8] sm:$0xff] }
 0x378   :  { %2005 = vmatprep.subr.mxu1 %v1644_v22  ;;  %v1683_v22 = vld [vmem:[%s5615_s12 + $0x2d0] sm:$0xff] }
 0x379   :  { %2006 = vmatpush1.msra.mxu1 %v1643_v29  ;;  %v1680_v29 = vld [vmem:[%s5615_s12 + $0x2b8] sm:$0xff] }
 0x37a   :  { %2007 = vmatprep.subr.mxu1 %v1640_v19  ;;  %v1679_v19 = vld [vmem:[%s5615_s12 + $0x2b0] sm:$0xff] }
 0x37b   :  { %2008 = vmatpush1.msra.mxu1 %v1639_v31  ;;  %v1676_v31 = vld [vmem:[%s5615_s12 + $0x298] sm:$0xff] }
 0x37c   :  { %2009 = vmatprep.subr.mxu1 %v1636_v32  ;;  %v1675_v32 = vld [vmem:[%s5615_s12 + $0x290] sm:$0xff] }
 0x37d   :  { %2010 = vmatpush1.msra.mxu1 %v1635_v34  ;;  %v1672_v34 = vld [vmem:[%s5615_s12 + $0x278] sm:$0xff] }
 0x37e   :  { %2011 = vmatprep.subr.mxu1 %v1632_v35  ;;  %v1671_v35 = vld [vmem:[%s5615_s12 + $0x270] sm:$0xff] }
 0x37f   :  { %2012 = vmatpush1.msra.mxu1 %v1631_v36  ;;  %v1668_v36 = vld [vmem:[%s5615_s12 + $0x258] sm:$0xff] }
 0x380   :  { %2013 = vmatprep.subr.mxu1 %v1628_v37  ;;  %v1667_v37 = vld [vmem:[%s5615_s12 + $0x250] sm:$0xff] }
 0x381   :  { %2014 = vmatpush1.msra.mxu1 %v1627_v38  ;;  %v1664_v38 = vld [vmem:[%s5615_s12 + $0x238] sm:$0xff] }
 0x382   :  { %2015 = vmatprep.subr.mxu1 %v1624_v39  ;;  %v1663_v39 = vld [vmem:[%s5615_s12 + $0x230] sm:$0xff] }
 0x383   :  { %2016 = vmatpush1.msra.mxu1 %v1623_v40  ;;  %v1660_v40 = vld [vmem:[%s5615_s12 + $0x218] sm:$0xff] }
 0x384   :  { %2017 = vmatprep.subr.mxu1 %v1620_v41  ;;  %v1659_v41 = vld [vmem:[%s5615_s12 + $0x210] sm:$0xff] }
 0x385   :  { %2018 = vmatpush1.msra.mxu1 %v1619_v43  ;;  %v2194_v43 = vld [vmem:[%s5616_s15 + $0x2f0] sm:$0xff] }
 0x386   :  { %2019 = vmatprep.subr.mxu1 %v1616_v44  ;;  %v2193_v44 = vld [vmem:[%s5616_s15 + $0x2e8] sm:$0xff] }
 0x387   :  { %2020 = vmatpush1.msra.mxu1 %v1615_v45  ;;  %v2192_v45 = vld [vmem:[%s5616_s15 + $0x2e0] sm:$0xff] }
 0x388   :  { %2021 = vmatprep.subr.mxu1 %v1612_v47  ;;  %v2189_v47 = vld [vmem:[%s5616_s15 + $0x2c8] sm:$0xff] }
 0x389   :  { %v1994_v53 = vpop.f32.mrf.mxu0  ;;  %2022 = vmatpush1.msra.mxu1 %v1611_v49  ;;  %v2188_v49 = vld [vmem:[%s5616_s15 + $0x2c0] sm:$0xff] }
 0x38a   :  { %v1995_v56 = vadd.f32 %v1994_v53, %v1852_v42  ;;  %2023 = vmatprep.subr.mxu1 %v1608_v50  ;;  %v2195_v42 = vld [vmem:[%s5616_s15 + $0x2f8] sm:$0xff]  ;;  %v2185_v53 = vld [vmem:[%s5616_s15 + $0x2a8] sm:$0xff] }
 0x38b   :  { %v1996_v58 = vpop.f32.mrf.mxu0  ;;  %2024 = vmatpush1.msra.mxu1 %v1607_v52  ;;  %v2187_v50 = vld [vmem:[%s5616_s15 + $0x2b8] sm:$0xff]  ;;  %v2186_v52 = vld [vmem:[%s5616_s15 + $0x2b0] sm:$0xff] }
 0x38c   :  { %v1997_v60 = vadd.f32 %v1996_v58, %v1854_v46  ;;  %2025 = vmatprep.subr.mxu1 %v1604_v55  ;;  %v2092_v62 = vadd.f32 %v2075_v54, %v1995_v56  ;;  %v2190_v46 = vld [vmem:[%s5616_s15 + $0x2d0] sm:$0xff]  ;;  %v2184_v54 = vld [vmem:[%s5616_s15 + $0x2a0] sm:$0xff]  ;;  %v2183_v55 = vld [vmem:[%s5616_s15 + $0x298] sm:$0xff] }
 0x38d   :  { %2026 = vmatpush1.msra.mxu1 %v1603_v30  ;;  %v2182_v56 = vld [vmem:[%s5616_s15 + $0x290] sm:$0xff]  ;;  %v2180_v30 = vld [vmem:[%s5616_s15 + $0x280] sm:$0xff]  ;;  %v2179_v58 = vld [vmem:[%s5616_s15 + $0x278] sm:$0xff] }
 0x38e   :  { %v2093_v0 = vadd.f32 %v2079_v57, %v1997_v60  ;;  %2027 = vmatprep.subr.mxu1 %v1600_v59  ;;  %v2096_v6 = vmax.f32 %v2092_v62, 0.0  ;;  %v2181_v57 = vld [vmem:[%s5616_s15 + $0x288] sm:$0xff]  ;;  %v2178_v59 = vld [vmem:[%s5616_s15 + $0x270] sm:$0xff]  ;;  %v2175_v62 = vld [vmem:[%s5616_s15 + $0x258] sm:$0xff] }
 0x38f   :  { %2028 = vmatpush1.msra.mxu1 %v1599_v61  ;;  %v2177_v60 = vld [vmem:[%s5616_s15 + $0x268] sm:$0xff]  ;;  %v2176_v61 = vld [vmem:[%s5616_s15 + $0x260] sm:$0xff] }
 0x390   :  { %v2097_v4 = vmax.f32 %v2093_v0, 0.0  ;;  %2029 = vmatprep.subr.mxu1 %v1596_v63  ;;  %v2174_v63 = vld [vmem:[%s5616_s15 + $0x250] sm:$0xff]  ;;  %v2173_v0 = vld [vmem:[%s5616_s15 + $0x248] sm:$0xff] }
 0x391   :  { %2030 = vmatpush1.msra.mxu1 %v1595_v1  ;;  %v2172_v1 = vld [vmem:[%s5616_s15 + $0x240] sm:$0xff] }
 0x392   :  { %2031 = vmatprep.subr.mxu1 %v1720_v2  ;;  %2304 = vmatprep.mubr.f32.mxu0 %v2097_v4  ;;  %v2171_v2 = vld [vmem:[%s5616_s15 + $0x238] sm:$0xff]  ;;  %v2170_v4 = vld [vmem:[%s5616_s15 + $0x230] sm:$0xff] }
 0x393   :  { %2032 = vmatpush2.msra.mxu1 %v1719_v5  ;;  %2305 = vmatmul.mubr.f32.vlgmr.msra.gmra.mxu0 %v2096_v6  ;;  %v2169_v5 = vld [vmem:[%s5616_s15 + $0x228] sm:$0xff]  ;;  %v2168_v6 = vld [vmem:[%s5616_s15 + $0x220] sm:$0xff] }
 0x394   :  { %2033 = vmatprep.subr.mxu1 %v1716_v9  ;;  %v2167_v9 = vld [vmem:[%s5616_s15 + $0x218] sm:$0xff] }
 0x395   :  { %2034 = vmatpush2.msra.mxu1 %v1715_v10  ;;  %v2166_v10 = vld [vmem:[%s5616_s15 + $0x210] sm:$0xff] }
 0x396   :  { %2035 = vmatprep.subr.mxu1 %v1712_v11  ;;  %v2165_v11 = vld [vmem:[%s5616_s15 + $0x208] sm:$0xff] }
 0x397   :  { %2036 = vmatpush2.msra.mxu1 %v1711_v13  ;;  %v2164_v13 = vld [vmem:[%s5616_s15 + $0x200] sm:$0xff] }
 0x398   :  { %2037 = vmatprep.subr.mxu1 %v1708_v14  ;;  %v2227_v14 = vld [vmem:[%s5616_s15 + $0x3f8] sm:$0xff] }
 0x399   :  { %2038 = vmatpush2.msra.mxu1 %v1707_v15  ;;  %v2226_v15 = vld [vmem:[%s5616_s15 + $0x3f0] sm:$0xff] }
 0x39a   :  { %2039 = vmatprep.subr.mxu1 %v1704_v16  ;;  %v2225_v16 = vld [vmem:[%s5616_s15 + $0x3e8] sm:$0xff] }
 0x39b   :  { %2040 = vmatpush2.msra.mxu1 %v1703_v17  ;;  %v2224_v17 = vld [vmem:[%s5616_s15 + $0x3e0] sm:$0xff] }
 0x39c   :  { %2041 = vmatprep.subr.mxu1 %v1700_v18  ;;  %v2223_v18 = vld [vmem:[%s5616_s15 + $0x3d8] sm:$0xff] }
 0x39d   :  { %2042 = vmatpush2.msra.mxu1 %v1699_v20  ;;  %v2222_v20 = vld [vmem:[%s5616_s15 + $0x3d0] sm:$0xff] }
 0x39e   :  { %2043 = vmatprep.subr.mxu1 %v1696_v21  ;;  %v2221_v21 = vld [vmem:[%s5616_s15 + $0x3c8] sm:$0xff] }
 0x39f   :  { %2044 = vmatpush2.msra.mxu1 %v1695_v23  ;;  %v2220_v23 = vld [vmem:[%s5616_s15 + $0x3c0] sm:$0xff] }
 0x3a0   :  { %2045 = vmatprep.subr.mxu1 %v1692_v24  ;;  %v2219_v24 = vld [vmem:[%s5616_s15 + $0x3b8] sm:$0xff] }
 0x3a1   :  { %2046 = vmatpush2.msra.mxu1 %v1691_v26  ;;  %v2218_v26 = vld [vmem:[%s5616_s15 + $0x3b0] sm:$0xff] }
 0x3a2   :  { %2047 = vmatprep.subr.mxu1 %v1688_v27  ;;  %v2217_v27 = vld [vmem:[%s5616_s15 + $0x3a8] sm:$0xff] }
 0x3a3   :  { %2048 = vmatpush2.msra.mxu1 %v1687_v3  ;;  %v2216_v3 = vld [vmem:[%s5616_s15 + $0x3a0] sm:$0xff] }
 0x3a4   :  { %2049 = vmatprep.subr.mxu1 %v1684_v28  ;;  %v2215_v28 = vld [vmem:[%s5616_s15 + $0x398] sm:$0xff] }
 0x3a5   :  { %2050 = vmatpush2.msra.mxu1 %v1683_v22  ;;  %v2214_v22 = vld [vmem:[%s5616_s15 + $0x390] sm:$0xff] }
 0x3a6   :  { %2051 = vmatprep.subr.mxu1 %v1680_v29  ;;  %v2213_v29 = vld [vmem:[%s5616_s15 + $0x388] sm:$0xff] }
 0x3a7   :  { %2052 = vmatpush2.msra.mxu1 %v1679_v19  ;;  %v2212_v19 = vld [vmem:[%s5616_s15 + $0x380] sm:$0xff] }
 0x3a8   :  { %2053 = vmatprep.subr.mxu1 %v1676_v31  ;;  %v2211_v31 = vld [vmem:[%s5616_s15 + $0x378] sm:$0xff] }
 0x3a9   :  { %2054 = vmatpush2.msra.mxu1 %v1675_v32  ;;  %v2210_v32 = vld [vmem:[%s5616_s15 + $0x370] sm:$0xff] }
 0x3aa   :  { %2055 = vmatprep.subr.mxu1 %v1672_v34  ;;  %v2209_v34 = vld [vmem:[%s5616_s15 + $0x368] sm:$0xff] }
 0x3ab   :  { %2056 = vmatpush2.msra.mxu1 %v1671_v35  ;;  %v2208_v35 = vld [vmem:[%s5616_s15 + $0x360] sm:$0xff] }
 0x3ac   :  { %2057 = vmatprep.subr.mxu1 %v1668_v36  ;;  %v2207_v36 = vld [vmem:[%s5616_s15 + $0x358] sm:$0xff] }
 0x3ad   :  { %2058 = vmatpush2.msra.mxu1 %v1667_v37  ;;  %v2206_v37 = vld [vmem:[%s5616_s15 + $0x350] sm:$0xff] }
 0x3ae   :  { %2059 = vmatprep.subr.mxu1 %v1664_v38  ;;  %v2205_v38 = vld [vmem:[%s5616_s15 + $0x348] sm:$0xff] }
 0x3af   :  { %2060 = vmatpush2.msra.mxu1 %v1663_v39  ;;  %v2204_v39 = vld [vmem:[%s5616_s15 + $0x340] sm:$0xff] }
 0x3b0   :  { %2061 = vmatprep.subr.mxu1 %v1660_v40  ;;  %v2203_v40 = vld [vmem:[%s5616_s15 + $0x338] sm:$0xff] }
 0x3b1   :  { %2062 = vmatpush2.msra.mxu1 %v1659_v41  ;;  %v2202_v41 = vld [vmem:[%s5616_s15 + $0x330] sm:$0xff] }
 0x3b2   :  { %2064 = vmatmul.mubr.f32.vlgmr.msra.gmra.mxu1 %v4379_v25  ;;  %2311 = vmatprep.subr.mxu1 %v2195_v42  ;;  %v2191_v25 = vld [vmem:[%s5616_s15 + $0x2d8] sm:$0xff]  ;;  %v2201_v42 = vld [vmem:[%s5616_s15 + $0x328] sm:$0xff] }
 0x3b3   :  { %2312 = vmatpush1.msra.mxu1 %v2194_v43  ;;  %v2200_v43 = vld [vmem:[%s5616_s15 + $0x320] sm:$0xff] }
 0x3b4   :  { %2313 = vmatprep.subr.mxu1 %v2193_v44  ;;  %v2199_v44 = vld [vmem:[%s5616_s15 + $0x318] sm:$0xff] }
 0x3b5   :  { %2314 = vmatpush1.msra.mxu1 %v2192_v45  ;;  %v2198_v45 = vld [vmem:[%s5616_s15 + $0x310] sm:$0xff] }
 0x3b6   :  { %2315 = vmatprep.subr.mxu1 %v2191_v25  ;;  %v2197_v25 = vld [vmem:[%s5616_s15 + $0x308] sm:$0xff] }
 0x3b7   :  { %2316 = vmatpush1.msra.mxu1 %v2190_v46  ;;  %v2196_v46 = vld [vmem:[%s5616_s15 + $0x300] sm:$0xff] }
 0x3b8   :  { %2317 = vmatprep.subr.mxu1 %v2189_v47 }
 0x3b9   :  { %2318 = vmatpush1.msra.mxu1 %v2188_v49 }
 0x3ba   :  { %2319 = vmatprep.subr.mxu1 %v2187_v50 }
 0x3bb   :  { %2320 = vmatpush1.msra.mxu1 %v2186_v52  ;;  %v2399_v52 = vld [vmem:[%s5619_s11] ss:$0 sm:$0xff] }
 0x3bc   :  { %2321 = vmatprep.subr.mxu1 %v2185_v53 }
 0x3bd   :  { %2322 = vmatpush1.msra.mxu1 %v2184_v54 }
 0x3be   :  { %2323 = vmatprep.subr.mxu1 %v2183_v55 }
 0x3bf   :  { %2324 = vmatpush1.msra.mxu1 %v2182_v56 }
 0x3c0   :  { %2325 = vmatprep.subr.mxu1 %v2181_v57 }
 0x3c1   :  { %2326 = vmatpush1.msra.mxu1 %v2180_v30 }
 0x3c2   :  { %2327 = vmatprep.subr.mxu1 %v2179_v58 }
 0x3c3   :  { %2328 = vmatpush1.msra.mxu1 %v2178_v59 }
 0x3c4   :  { %2329 = vmatprep.subr.mxu1 %v2177_v60  ;;  %v2083_v60 = vrot.slane %v5258_v48, %v1364_v33 }
 0x3c5   :  { %2330 = vmatpush1.msra.mxu1 %v2176_v61 }
 0x3c6   :  { %2331 = vmatprep.subr.mxu1 %v2175_v62  ;;  %v2087_v62 = vrot.slane %v5258_v48, %v1368_v51 }
 0x3c7   :  { %2332 = vmatpush1.msra.mxu1 %v2174_v63 }
 0x3c8   :  { %2333 = vmatprep.subr.mxu1 %v2173_v0 }
 0x3c9   :  { %2334 = vmatpush1.msra.mxu1 %v2172_v1 }
 0x3ca   :  { %2335 = vmatprep.subr.mxu1 %v2171_v2 }
 0x3cb   :  { %2336 = vmatpush1.msra.mxu1 %v2170_v4 }
 0x3cc   :  { %2337 = vmatprep.subr.mxu1 %v2169_v5 }
 0x3cd   :  { %2338 = vmatpush1.msra.mxu1 %v2168_v6  ;;  %v2228_v6 = vld [vmem:[%s5621_s16] sm:$0x3] }
 0x3ce   :  { %2339 = vmatprep.subr.mxu1 %v2167_v9  ;;  %v2233_v33 = vrot.slane %v2228_v6, %v3745_v8 }
 0x3cf   :  { %2340 = vmatpush1.msra.mxu1 %v2166_v10  ;;  %v2237_v10 = vrot.slane %v2228_v6, %v3751_v12 }
 0x3d0   :  { %2341 = vmatprep.subr.mxu1 %v2165_v11 }
 0x3d1   :  { %2342 = vmatpush1.msra.mxu1 %v2164_v13 }
 0x3d2   :  { %2343 = vmatprep.subr.mxu1 %v2227_v14 }
 0x3d3   :  { %2344 = vmatpush2.msra.mxu1 %v2226_v15 }
 0x3d4   :  { %2345 = vmatprep.subr.mxu1 %v2225_v16 }
 0x3d5   :  { %2346 = vmatpush2.msra.mxu1 %v2224_v17 }
 0x3d6   :  { %2347 = vmatprep.subr.mxu1 %v2223_v18 }
 0x3d7   :  { %2348 = vmatpush2.msra.mxu1 %v2222_v20 }
 0x3d8   :  { %2349 = vmatprep.subr.mxu1 %v2221_v21 }
 0x3d9   :  { %2350 = vmatpush2.msra.mxu1 %v2220_v23 }
 0x3da   :  { %2351 = vmatprep.subr.mxu1 %v2219_v24 }
 0x3db   :  { %2352 = vmatpush2.msra.mxu1 %v2218_v26 }
 0x3dc   :  { %2353 = vmatprep.subr.mxu1 %v2217_v27 }
 0x3dd   :  { %2354 = vmatpush2.msra.mxu1 %v2216_v3 }
 0x3de   :  { %2355 = vmatprep.subr.mxu1 %v2215_v28 }
 0x3df   :  { %2356 = vmatpush2.msra.mxu1 %v2214_v22 }
 0x3e0   :  { %2357 = vmatprep.subr.mxu1 %v2213_v29 }
 0x3e1   :  { %2358 = vmatpush2.msra.mxu1 %v2212_v19 }
 0x3e2   :  { %2359 = vmatprep.subr.mxu1 %v2211_v31 }
 0x3e3   :  { %2360 = vmatpush2.msra.mxu1 %v2210_v32 }
 0x3e4   :  { %2361 = vmatprep.subr.mxu1 %v2209_v34 }
 0x3e5   :  { %2362 = vmatpush2.msra.mxu1 %v2208_v35 }
 0x3e6   :  { %2363 = vmatprep.subr.mxu1 %v2207_v36 }
 0x3e7   :  { %2364 = vmatpush2.msra.mxu1 %v2206_v37 }
 0x3e8   :  { %2365 = vmatprep.subr.mxu1 %v2205_v38 }
 0x3e9   :  { %2366 = vmatpush2.msra.mxu1 %v2204_v39 }
 0x3ea   :  { %2367 = vmatprep.subr.mxu1 %v2203_v40 }
 0x3eb   :  { %2368 = vmatpush2.msra.mxu1 %v2202_v41 }
 0x3ec   :  { %2369 = vmatprep.subr.mxu1 %v2201_v42 }
 0x3ed   :  { %2370 = vmatpush2.msra.mxu1 %v2200_v43 }
 0x3ee   :  { %2371 = vmatprep.subr.mxu1 %v2199_v44 }
 0x3ef   :  { %2372 = vmatpush2.msra.mxu1 %v2198_v45 }
 0x3f0   :  { %2373 = vmatprep.subr.mxu1 %v2197_v25 }
 0x3f1   :  { %2374 = vmatpush2.msra.mxu1 %v2196_v46 }
 0x3f2   :  { %v2432_v47 = vpop.f32.mrf.mxu1 }
 0x3f4   :  { %v2433_v49 = vpop.f32.mrf.mxu1 }
 0x3f5   :  { %v2434_v50 = vadd.f32 %v2433_v49, %v2432_v47 }
 0x3f7   :  { %v1520_v55 = vadd.f32 %v2434_v50, %v2399_v52 }
 0x412   :  { %v2467_v53 = vpop.f32.mrf.mxu1 }
 0x414   :  { %v2468_v54 = vpop.f32.mrf.mxu1 }
 0x415   :  { %v2469_v56 = vadd.f32 %v2468_v54, %v2467_v53 }
 0x417   :  { %v1590_v57 = vadd.f32 %v2469_v56, %v1520_v55 }
 0x419   :  { %2382 = vst [vmem:[%s5620_s17] sm:$0xff] %v1590_v57 }
 0x432   :  { %v1923_v30 = vpop.f32.mrf.mxu1 }
 0x434   :  { %v1925_v58 = vpop.f32.mrf.mxu1 }
 0x453   :  { %v2306_v9 = vpop.f32.mrf.mxu0 }
 0x454   :  { %v2307_v11 = vadd.f32 %v2306_v9, %v2233_v33 }
 0x455   :  { %v2308_v7 = vpop.f32.mrf.mxu0 }
 0x456   :  { %v2309_v48 = vadd.f32 %v2308_v7, %v2237_v10 }
 0x472   :  { %v2065_v59 = vpop.f32.mrf.mxu1 }
 0x473   :  { %v2066_v61 = vadd.f32 %v2065_v59, %v1923_v30 }
 0x474   :  { %v2067_v63 = vpop.f32.mrf.mxu1 }
 0x475   :  { %v2068_v0 = vadd.f32 %v2067_v63, %v1925_v58  ;;  %v2094_v1 = vadd.f32 %v2083_v60, %v2066_v61 }
 0x477   :  { %v2095_v2 = vadd.f32 %v2087_v62, %v2068_v0  ;;  %v2098_v5 = vmax.f32 %v2094_v1, 0.0 }
 0x479   :  { %v2099_v4 = vmax.f32 %v2095_v2, 0.0 }
 0x47b   :  { %2375 = vmatprep.mubr.f32.mxu1 %v2099_v4 }
 0x47c   :  { %2376 = vmatmul.mubr.f32.vlgmr.msra.gmra.mxu1 %v2098_v5 }
 0x53c   :  { %v2377_v51 = vpop.f32.mrf.mxu1 }
 0x53d   :  { %v2378_v13 = vadd.f32 %v2377_v51, %v2307_v11 }
 0x53e   :  { %v2379_v14 = vpop.f32.mrf.mxu1 }
 0x53f   :  { %2383 = vst [vmem:[%s5622_s18] sm:$0xff] %v2378_v13  ;;  %v2380_v15 = vadd.f32 %v2379_v14, %v2309_v48 }
 0x541   :  { %2384 = vst [vmem:[%s5622_s18 + $0x8] sm:$0xff] %v2380_v15 }

</bundles_post_ra>
